<compile_context>
chip_gen: v5e
topology: v5e:2x2
jax: 0.10.0
libtpu: 0.0.40
codegen_flags: <defaults>
</compile_context>

<pallas_src>
import functools

import numpy as np
import jax
import jax.numpy as jnp
from jax.experimental import pallas as pl
from jax.experimental.pallas import tpu as pltpu


def _gaussian_1d(window_size: int, sigma: float) -> np.ndarray:
    xs = np.arange(window_size)
    g = np.exp(-((xs - window_size // 2) ** 2) / (2.0 * sigma ** 2))
    return (g / g.sum()).astype(np.float32)


def _band_matrix(n: int, g: np.ndarray) -> np.ndarray:
    """Band matrix M with M[i, r] = g[r - i + p] (zero-padded conv taps)."""
    w = g.shape[0]
    p = w // 2
    m = np.zeros((n, n), dtype=np.float32)
    for i in range(n):
        for a in range(w):
            r = i + a - p
            if 0 <= r < n:
                m[i, r] = g[a]
    return m


def _ssim_kernel(img1_ref, img2_ref, b_ref, a_ref, out_ref, *, C, H, W):
    # Whole-block loads: (C*H, W) f32 planes for this batch element.
    x1 = img1_ref[0]
    x2 = img2_ref[0]

    # Five convolution inputs, row-stacked into a single (5*C*H, W) operand
    # with whole-block elementwise ops (no per-channel Python unrolling).
    s = jnp.concatenate([x1, x2, x1 * x1, x2 * x2, x1 * x2], axis=0)

    # Horizontal (along-W) Gaussian pass: one f32 MXU matmul for all 5*C planes.
    t = jnp.dot(s, b_ref[...], preferred_element_type=jnp.float32,
                precision=jax.lax.Precision.HIGHEST)            # (5*C*H, W)

    # Single fused per-plane relayout so H becomes the contraction dim.
    u = jnp.transpose(t.reshape(5 * C, H, W), (0, 2, 1)).reshape(5 * C * W, H)

    # Vertical (along-H) pass; A is symmetric so right-multiplying == conv.
    v = jnp.dot(u, a_ref[...], preferred_element_type=jnp.float32,
                precision=jax.lax.Precision.HIGHEST)            # (5*C*W, H)

    # Leading-axis indexing of the reshaped result (no sliced full-plane copies).
    v5 = v.reshape(5, C * W, H)
    mu1, mu2, e11, e22, e12 = v5[0], v5[1], v5[2], v5[3], v5[4]

    mu1_sq = mu1 * mu1
    mu2_sq = mu2 * mu2
    mu1_mu2 = mu1 * mu2
    sigma1_sq = e11 - mu1_sq
    sigma2_sq = e22 - mu2_sq
    sigma12 = e12 - mu1_mu2

    c1 = 0.01 ** 2
    c2 = 0.03 ** 2
    num = (2.0 * mu1_mu2 + c1) * (2.0 * sigma12 + c2)
    den = (mu1_sq + mu2_sq + c1) * (sigma1_sq + sigma2_sq + c2)
    ssim_map = num / den

    # Per-batch partial sum (no cross-step accumulation -> grid is parallel).
    out_ref[0] = jnp.sum(ssim_map, keepdims=True)


def ssim_pallas(img1, img2, window_size: int = 11, sigma: float = 1.5,
                size_average: bool = True):
    """SSIM forward matching the PyTorch SSIM module."""
    N, C, H, W = img1.shape
    g = _gaussian_1d(window_size, sigma)
    a_mat = jnp.asarray(_band_matrix(H, g), dtype=jnp.float32)   # vertical taps
    b_mat = jnp.asarray(_band_matrix(W, g), dtype=jnp.float32)   # horizontal taps

    # Lane-dense 2D image blocks: (N, C*H, W).
    img1_r = img1.reshape(N, C * H, W)
    img2_r = img2.reshape(N, C * H, W)

    # Derive the VMEM cap from the actual per-step working set:
    #   2 double-buffered inputs + s/t/u/v stacks (5 planes each, f32)
    #   + ~8 full-plane f32 temps in the SSIM arithmetic + 2x tap matrices.
    plane_bytes = C * H * W * 4
    needed = 32 * plane_bytes + 2 * (H * H + W * W) * 4
    vmem_limit = max(32 << 20, min(int(needed * 1.25), 100 << 20))

    flops = int(2 * 5 * C * H * W * (H + W)) * N          # two band matmuls / plane
    bytes_accessed = int(2 * N * C * H * W * 4 + (H * H + W * W) * 4 + N * 4)

    kernel = functools.partial(_ssim_kernel, C=C, H=H, W=W)

    partial = pl.pallas_call(
        kernel,
        out_shape=jax.ShapeDtypeStruct((N, 1, 1), jnp.float32),
        grid_spec=pltpu.PrefetchScalarGridSpec(
            num_scalar_prefetch=0,
            grid=(N,),
            in_specs=[
                pl.BlockSpec((1, C * H, W), lambda n: (n, 0, 0)),
                pl.BlockSpec((1, C * H, W), lambda n: (n, 0, 0)),
                # Constant index_maps: the tap matrices are DMA'd once and
                # stay resident in VMEM across the whole grid.
                pl.BlockSpec((W, W), lambda n: (0, 0)),
                pl.BlockSpec((H, H), lambda n: (0, 0)),
            ],
            out_specs=pl.BlockSpec((1, 1, 1), lambda n: (n, 0, 0)),
        ),
        compiler_params=pltpu.CompilerParams(
            dimension_semantics=("parallel",),
            vmem_limit_bytes=vmem_limit,
        ),
        cost_estimate=pl.CostEstimate(
            flops=flops,
            transcendentals=0,
            bytes_accessed=bytes_accessed),
    )(img1_r, img2_r, b_mat, a_mat)

    sums = partial[:, 0, 0]                                # (N,) SSIM-map sums
    if size_average:
        return jnp.sum(sums) / (N * C * H * W)
    # size_average=False: per-batch mean, matching ssim_map.mean(1).mean(1).mean(1)
    return sums / (C * H * W)


def _ssim_reference(img1, img2, window_size: int = 11, sigma: float = 1.5):
    """Pure-JAX reference mirroring torch F.conv2d (groups=C, zero padding)."""
    N, C, H, W = img1.shape
    g = _gaussian_1d(window_size, sigma)
    w2d = jnp.asarray(np.outer(g, g), dtype=jnp.float32)
    window = jnp.broadcast_to(w2d[None, None], (C, 1, window_size, window_size))

    def conv(x):
        return jax.lax.conv_general_dilated(
            x, window, window_strides=(1, 1),
            padding=[(window_size // 2, window_size // 2)] * 2,
            feature_group_count=C,
            dimension_numbers=("NCHW", "OIHW", "NCHW"),
            precision=jax.lax.Precision.HIGHEST)

    mu1 = conv(img1)
    mu2 = conv(img2)
    mu1_sq, mu2_sq, mu1_mu2 = mu1 * mu1, mu2 * mu2, mu1 * mu2
    sigma1_sq = conv(img1 * img1) - mu1_sq
    sigma2_sq = conv(img2 * img2) - mu2_sq
    sigma12 = conv(img1 * img2) - mu1_mu2
    C1, C2 = 0.01 ** 2, 0.03 ** 2
    ssim_map = ((2 * mu1_mu2 + C1) * (2 * sigma12 + C2)
                / ((mu1_sq + mu2_sq + C1) * (sigma1_sq + sigma2_sq + C2)))
    return ssim_map.mean()


if __name__ == "__main__":
    key = jax.random.PRNGKey(0)
    k1, k2 = jax.random.split(key)
    N, C, H, W = 2, 4, 16, 16
    img1 = jax.random.uniform(k1, (N, C, H, W), dtype=jnp.float32)
    img2 = jax.random.uniform(k2, (N, C, H, W), dtype=jnp.float32)

    out = ssim_pallas(img1, img2)
    out = jax.block_until_ready(out)

    ref = _ssim_reference(img1, img2)
    assert abs(float(out) - float(ref)) < 2e-3, (float(out), float(ref))
    print("KERNEL_OK")
</pallas_src>

<mosaic_0001>
module attributes {stable_mosaic.version = 11 : i64} {
  func.func @_ssim_kernel(%arg0: i32, %arg1: memref<1x64x16xf32, #tpu.memory_space<vmem>>, %arg2: memref<1x64x16xf32, #tpu.memory_space<vmem>>, %arg3: memref<16x16xf32, #tpu.memory_space<vmem>>, %arg4: memref<16x16xf32, #tpu.memory_space<vmem>>, %arg5: memref<1x1x1xf32, #tpu.memory_space<vmem>>) attributes {dimension_semantics = [#tpu.dimension_semantics<parallel>], iteration_bounds = array<i64: 2>, scalar_prefetch = 0 : i64, scratch_operands = 0 : i64, tpu.core_type = #tpu.core_type<tc>, window_params = [{transform_indices = @transform_0, window_bounds = array<i64: 1, 64, 16>}, {transform_indices = @transform_1, window_bounds = array<i64: 1, 64, 16>}, {pipeline_mode = #tpu.pipeline_mode<synchronous>, transform_indices = @transform_2, window_bounds = array<i64: 16, 16>}, {pipeline_mode = #tpu.pipeline_mode<synchronous>, transform_indices = @transform_3, window_bounds = array<i64: 16, 16>}, {transform_indices = @transform_4, window_bounds = array<i64: 1, 1, 1>}]} {
    %c0 = arith.constant 0 : index
    %c0_0 = arith.constant 0 : index
    %c0_1 = arith.constant 0 : index
    %0 = vector.load %arg1[%c0, %c0_0, %c0_1] : memref<1x64x16xf32, #tpu.memory_space<vmem>>, vector<1x64x16xf32>
    %1 = vector.shape_cast %0 : vector<1x64x16xf32> to vector<64x16xf32>
    %c0_2 = arith.constant 0 : index
    %c0_3 = arith.constant 0 : index
    %c0_4 = arith.constant 0 : index
    %2 = vector.load %arg2[%c0_2, %c0_3, %c0_4] : memref<1x64x16xf32, #tpu.memory_space<vmem>>, vector<1x64x16xf32>
    %3 = vector.shape_cast %2 : vector<1x64x16xf32> to vector<64x16xf32>
    %4 = arith.mulf %1, %1 : vector<64x16xf32>
    %5 = arith.mulf %3, %3 : vector<64x16xf32>
    %6 = arith.mulf %1, %3 : vector<64x16xf32>
    %7 = tpu.concatenate %1, %3, %4, %5, %6 in 0 : vector<64x16xf32>, vector<64x16xf32>, vector<64x16xf32>, vector<64x16xf32>, vector<64x16xf32> -> vector<320x16xf32>
    %c0_5 = arith.constant 0 : index
    %c0_6 = arith.constant 0 : index
    %8 = vector.load %arg3[%c0_5, %c0_6] : memref<16x16xf32, #tpu.memory_space<vmem>>, vector<16x16xf32>
    %cst = arith.constant dense<0.000000e+00> : vector<320x16xf32>
    %9 = tpu.matmul %7, %8, %cst {dimension_numbers = #tpu.dot_dimension_numbers<[1], [0], [0], [1], [0, 0, 1, 1], [], []>, precision = #tpu.contract_precision<fp32>} : vector<320x16xf32>, vector<16x16xf32>, vector<320x16xf32> -> vector<320x16xf32>
    %10 = vector.shape_cast %9 : vector<320x16xf32> to vector<20x16x16xf32>
    %11 = tpu.transpose %10, [0, 2, 1] : vector<20x16x16xf32> -> vector<20x16x16xf32>
    %12 = vector.shape_cast %11 : vector<20x16x16xf32> to vector<320x16xf32>
    %c0_7 = arith.constant 0 : index
    %c0_8 = arith.constant 0 : index
    %13 = vector.load %arg4[%c0_7, %c0_8] : memref<16x16xf32, #tpu.memory_space<vmem>>, vector<16x16xf32>
    %cst_9 = arith.constant dense<0.000000e+00> : vector<320x16xf32>
    %14 = tpu.matmul %12, %13, %cst_9 {dimension_numbers = #tpu.dot_dimension_numbers<[1], [0], [0], [1], [0, 0, 1, 1], [], []>, precision = #tpu.contract_precision<fp32>} : vector<320x16xf32>, vector<16x16xf32>, vector<320x16xf32> -> vector<320x16xf32>
    %15 = vector.shape_cast %14 : vector<320x16xf32> to vector<5x64x16xf32>
    %16 = vector.extract_strided_slice %15 {offsets = [0, 0, 0], sizes = [1, 64, 16], strides = [1, 1, 1]} : vector<5x64x16xf32> to vector<1x64x16xf32>
    %17 = vector.shape_cast %16 : vector<1x64x16xf32> to vector<64x16xf32>
    %18 = vector.extract_strided_slice %15 {offsets = [1, 0, 0], sizes = [1, 64, 16], strides = [1, 1, 1]} : vector<5x64x16xf32> to vector<1x64x16xf32>
    %19 = vector.shape_cast %18 : vector<1x64x16xf32> to vector<64x16xf32>
    %20 = vector.extract_strided_slice %15 {offsets = [2, 0, 0], sizes = [1, 64, 16], strides = [1, 1, 1]} : vector<5x64x16xf32> to vector<1x64x16xf32>
    %21 = vector.shape_cast %20 : vector<1x64x16xf32> to vector<64x16xf32>
    %22 = vector.extract_strided_slice %15 {offsets = [3, 0, 0], sizes = [1, 64, 16], strides = [1, 1, 1]} : vector<5x64x16xf32> to vector<1x64x16xf32>
    %23 = vector.shape_cast %22 : vector<1x64x16xf32> to vector<64x16xf32>
    %24 = vector.extract_strided_slice %15 {offsets = [4, 0, 0], sizes = [1, 64, 16], strides = [1, 1, 1]} : vector<5x64x16xf32> to vector<1x64x16xf32>
    %25 = vector.shape_cast %24 : vector<1x64x16xf32> to vector<64x16xf32>
    %26 = arith.mulf %17, %17 : vector<64x16xf32>
    %27 = arith.mulf %19, %19 : vector<64x16xf32>
    %28 = arith.mulf %17, %19 : vector<64x16xf32>
    %29 = arith.subf %21, %26 : vector<64x16xf32>
    %30 = arith.subf %23, %27 : vector<64x16xf32>
    %31 = arith.subf %25, %28 : vector<64x16xf32>
    %cst_10 = arith.constant 2.000000e+00 : f32
    %32 = vector.broadcast %cst_10 : f32 to vector<64x16xf32>
    %33 = arith.mulf %32, %28 : vector<64x16xf32>
    %cst_11 = arith.constant 9.99999974E-5 : f32
    %34 = vector.broadcast %cst_11 : f32 to vector<64x16xf32>
    %35 = arith.addf %33, %34 : vector<64x16xf32>
    %cst_12 = arith.constant 2.000000e+00 : f32
    %36 = vector.broadcast %cst_12 : f32 to vector<64x16xf32>
    %37 = arith.mulf %36, %31 : vector<64x16xf32>
    %cst_13 = arith.constant 8.99999984E-4 : f32
    %38 = vector.broadcast %cst_13 : f32 to vector<64x16xf32>
    %39 = arith.addf %37, %38 : vector<64x16xf32>
    %40 = arith.mulf %35, %39 : vector<64x16xf32>
    %41 = arith.addf %26, %27 : vector<64x16xf32>
    %cst_14 = arith.constant 9.99999974E-5 : f32
    %42 = vector.broadcast %cst_14 : f32 to vector<64x16xf32>
    %43 = arith.addf %41, %42 : vector<64x16xf32>
    %44 = arith.addf %29, %30 : vector<64x16xf32>
    %cst_15 = arith.constant 8.99999984E-4 : f32
    %45 = vector.broadcast %cst_15 : f32 to vector<64x16xf32>
    %46 = arith.addf %44, %45 : vector<64x16xf32>
    %47 = arith.mulf %43, %46 : vector<64x16xf32>
    %48 = arith.divf %40, %47 : vector<64x16xf32>
    %49 = vector.shape_cast %48 : vector<64x16xf32> to vector<1x64x16xf32>
    %cst_16 = arith.constant dense<0.000000e+00> : vector<1xf32>
    %50 = vector.multi_reduction <add>, %49, %cst_16 [1, 2] : vector<1x64x16xf32> to vector<1xf32>
    %51 = vector.shape_cast %50 : vector<1xf32> to vector<1x1x1xf32>
    %52 = vector.extract %51[0, 0, 0] : f32 from vector<1x1x1xf32>
    %53 = vector.broadcast %52 : f32 to vector<1x1xf32>
    %c0_17 = arith.constant 0 : index
    %c0_18 = arith.constant 0 : index
    %c0_19 = arith.constant 0 : index
    %54 = vector.load %arg5[%c0_17, %c0_18, %c0_19] : memref<1x1x1xf32, #tpu.memory_space<vmem>>, vector<1x1x1xf32>
    %55 = vector.shape_cast %54 : vector<1x1x1xf32> to vector<1x1xf32>
    %56 = vector.shape_cast %53 : vector<1x1xf32> to vector<1x1x1xf32>
    tpu.vector_store %arg5[%c0_17, %c0_18, %c0_19], %56 {strides = array<i32>} : memref<1x1x1xf32, #tpu.memory_space<vmem>>, vector<1x1x1xf32>,
    return
  }
  func.func @transform_0(%arg0: i32) -> (i32, i32, i32) {
    %c0_i32 = arith.constant 0 : i32
    %c0_i32_0 = arith.constant 0 : i32
    %c0_i32_1 = arith.constant 0 : i32
    return %arg0, %c0_i32, %c0_i32_0 : i32, i32, i32
  }
  func.func @transform_1(%arg0: i32) -> (i32, i32, i32) {
    %c0_i32 = arith.constant 0 : i32
    %c0_i32_0 = arith.constant 0 : i32
    %c0_i32_1 = arith.constant 0 : i32
    return %arg0, %c0_i32, %c0_i32_0 : i32, i32, i32
  }
  func.func @transform_2(%arg0: i32) -> (i32, i32) {
    %c0_i32 = arith.constant 0 : i32
    %c0_i32_0 = arith.constant 0 : i32
    %c0_i32_1 = arith.constant 0 : i32
    return %c0_i32, %c0_i32_0 : i32, i32
  }
  func.func @transform_3(%arg0: i32) -> (i32, i32) {
    %c0_i32 = arith.constant 0 : i32
    %c0_i32_0 = arith.constant 0 : i32
    %c0_i32_1 = arith.constant 0 : i32
    return %c0_i32, %c0_i32_0 : i32, i32
  }
  func.func @transform_4(%arg0: i32) -> (i32, i32, i32) {
    %c0_i32 = arith.constant 0 : i32
    %c0_i32_0 = arith.constant 0 : i32
    %c0_i32_1 = arith.constant 0 : i32
    return %arg0, %c0_i32, %c0_i32_0 : i32, i32, i32
  }
}

</mosaic_0001>

<bundles_post_ra>
// kernel: tpu_custom_call.1
= control target key start
LH: loop header
LB: loop body
LE: loop exit
PB: predicated region body
PF: predicated region fallthrough
CT: control target
= control target key end

     0   :  { %s4282_s15 = smov 0   ;;  %s5747_s0 = inlined_call_operand.vmem [shape: f32[2,64,16], index: 0, kind: input, shape index: {}]   ;;  %s5748_s1 = inlined_call_operand.vmem [shape: f32[2,64,16], index: 1, kind: input, shape index: {}]   ;;  %s5749_s2 = inlined_call_operand.vmem [shape: f32[16,16], index: 2, kind: input, shape index: {}]   ;;  %s5750_s3 = inlined_call_operand.vmem [shape: f32[16,16], index: 3, kind: input, shape index: {}]   ;;  %s5751_s4 = inlined_call_operand.vmem [shape: f32[2,1,1], index: 4, kind: output, shape index: {}]  }
   0x1 LB: > { %s4209_s16 = sadd.s32 4294967295, %s4255_s15   ;;  %p4213_p0 = scmp.ge.s32.totalorder %s4255_s15, 1  ;;  %s4255_s15 = sphi %s4282_s15, %s14_s15  }
   0x2   : > { %p172_p1 = scmp.lt.s32.totalorder %s4255_s15, 3 }
   0x4   : > { %p173_p2 = pnand %p4213_p0, %p172_p1 }
   0x6   : > { %176 = sbr.rel (%p173_p2) target bundleno = 1615 (0x64f), region = 36 }
   0xb   : > { %v255_v0 = vld [vmem:[%s5749_s2 + $0x8] sm:$0xff]  ;;  %v254_v1 = vld [vmem:[%s5749_s2] sm:$0xff]  ;;  %p201_p3 = scmp.lt.s32.totalorder %s4209_s16, 1  ;;  %vm256_vm0 = vcmask 130048  }
   0xc   : > { %v391_v2 = vand.u32 4294901760, %v255_v0  ;;  %v393_v3 = vand.u32 4294901760, %v254_v1 }
   0xd   : > { %s5942_s16 = smov (!%p201_p3, %s4209_s16), 1 }
   0xe   : > { %v731_v4 = vsub.f32 %v255_v0, %v391_v2  ;;  %v737_v5 = vsub.f32 %v254_v1, %v393_v3  ;;  %1139 = vmatpush.msra.mxu3 %v391_v2  ;;  %392 = vmatpush.msra.mxu0 %v391_v2  ;;  %s4220_s21 = sshll.u32 %s5942_s16, 6  ;;  %s213_s8 = scalar_lea.vmem %s5751_s4, %s5942_s16 }
   0xf   : > { %s4304_s24 = scalar_lea.vmem %s5747_s0, %s4220_s21  ;;  %s4377_s27 = scalar_lea.vmem %s5748_s1, %s4220_s21 }
  0x10   : > { %v732_v6 = vand.u32 4294901760, %v731_v4  ;;  %919 = vmatpush.msra.mxu2 %v731_v4  ;;  %v738_v7 = vand.u32 4294901760, %v737_v5  ;;  %1141 = vmatpush.msra.mxu3 %v393_v3  ;;  %v4307_v8 = vld [vmem:[%s4304_s24] sm:$0xff]  ;;  %v4310_v9 = vld [vmem:[%s4304_s24 + $0x8] sm:$0xff]  ;;  %v4321_v16 = vld [vmem:[%s4304_s24 + $0x10] sm:$0xff] }
  0x11   : > { %394 = vmatpush.msra.mxu0 %v393_v3  ;;  %v258_v12 = vsel %vm256_vm0, %v4307_v8, 0  ;;  %v261_v13 = vsel %vm256_vm0, %v4310_v9, 0  ;;  %v264_v21 = vsel %vm256_vm0, %v4321_v16, 0  ;;  %v4331_v27 = vld [vmem:[%s4304_s24 + $0x18] sm:$0xff]  ;;  %v4340_v34 = vld [vmem:[%s4304_s24 + $0x20] sm:$0xff]  ;;  %v4349_v41 = vld [vmem:[%s4304_s24 + $0x28] sm:$0xff] }
  0x12   : > { %v733_v10 = vsub.f32 %v731_v4, %v732_v6  ;;  %v739_v11 = vsub.f32 %v737_v5, %v738_v7  ;;  %922 = vmatpush.msra.mxu2 %v737_v5  ;;  %v4316_v14 = vand.u32 4294901760, %v258_v12  ;;  %v4318_v15 = vand.u32 4294901760, %v261_v13  ;;  %v4358_v48 = vld [vmem:[%s4304_s24 + $0x30] sm:$0xff]  ;;  %v4367_v55 = vld [vmem:[%s4304_s24 + $0x38] sm:$0xff]  ;;  %v4383_v62 = vld [vmem:[%s4377_s27] sm:$0xff] }
  0x13   : > { %1400 = vmatpush.msrb.mxu0 %v732_v6  ;;  %v4328_v25 = vand.u32 4294901760, %v264_v21  ;;  %v267_v30 = vsel %vm256_vm0, %v4331_v27, 0  ;;  %v270_v37 = vsel %vm256_vm0, %v4340_v34, 0  ;;  %v273_v44 = vsel %vm256_vm0, %v4349_v41, 0  ;;  %v4392_v5 = vld [vmem:[%s4377_s27 + $0x8] sm:$0xff] }
  0x14   : > { %v734_v17 = vand.u32 4294901760, %v733_v10  ;;  %v740_v18 = vand.u32 4294901760, %v739_v11  ;;  %v396_v19 = vsub.f32 %v258_v12, %v4316_v14  ;;  %v404_v20 = vsub.f32 %v261_v13, %v4318_v15 }
  0x15   : > { %1404 = vmatpush.msrb.mxu0 %v738_v7  ;;  %v412_v29 = vsub.f32 %v264_v21, %v4328_v25  ;;  %v4337_v33 = vand.u32 4294901760, %v267_v30  ;;  %v4346_v40 = vand.u32 4294901760, %v270_v37  ;;  %v4355_v47 = vand.u32 4294901760, %v273_v44 }
  0x16   : > { %735 = vmatpush.msra.mxu1 %v734_v17  ;;  %925 = vmatmul.f32.vlgmr.msra.gmra.mxu2 %v396_v19  ;;  %v397_v22 = vand.u32 4294901760, %v396_v19  ;;  %v405_v24 = vand.u32 4294901760, %v404_v20  ;;  %v276_v51 = vsel %vm256_vm0, %v4358_v48, 0  ;;  %v279_v58 = vsel %vm256_vm0, %v4367_v55, 0  ;;  %v4401_v17 = vld [vmem:[%s4377_s27 + $0x10] sm:$0xff] }
  0x17   : > { %v413_v32 = vand.u32 4294901760, %v412_v29  ;;  %v420_v36 = vsub.f32 %v267_v30, %v4337_v33  ;;  %v428_v43 = vsub.f32 %v270_v37, %v4346_v40  ;;  %v436_v50 = vsub.f32 %v273_v44, %v4355_v47  ;;  %v4428_v44 = vld [vmem:[%s4377_s27 + $0x28] sm:$0xff] }
  0x18   : > { %741 = vmatpush.msra.mxu1 %v740_v18  ;;  %1145 = vmatmul.f32.vlgmr.msra.gmra.mxu3 %v397_v22  ;;  %v398_v23 = vsub.f32 %v396_v19, %v397_v22  ;;  %v406_v28 = vsub.f32 %v404_v20, %v405_v24  ;;  %v4364_v54 = vand.u32 4294901760, %v276_v51  ;;  %v4380_v61 = vand.u32 4294901760, %v279_v58 }
  0x19   : > { %743 = vmatmul.f32.vlgmr.msra.gmra.mxu1 %v4316_v14  ;;  %v414_v35 = vsub.f32 %v412_v29, %v413_v32  ;;  %v421_v39 = vand.u32 4294901760, %v420_v36  ;;  %v429_v46 = vand.u32 4294901760, %v428_v43  ;;  %v437_v53 = vand.u32 4294901760, %v436_v50 }
  0x1a   : > { %1581 = vmatpush.msrb.mxu1 %v391_v2  ;;  %v399_v26 = vand.u32 4294901760, %v398_v23  ;;  %v407_v31 = vand.u32 4294901760, %v406_v28  ;;  %v444_v57 = vsub.f32 %v276_v51, %v4364_v54  ;;  %v452_v0 = vsub.f32 %v279_v58, %v4380_v61 }
  0x1b   : > { %v415_v38 = vand.u32 4294901760, %v414_v35  ;;  %v422_v42 = vsub.f32 %v420_v36, %v421_v39  ;;  %v430_v49 = vsub.f32 %v428_v43, %v429_v46  ;;  %v438_v56 = vsub.f32 %v436_v50, %v437_v53  ;;  %v4419_v35 = vld [vmem:[%s4377_s27 + $0x20] sm:$0xff] }
  0x1c   : > { %1583 = vmatpush.msrb.mxu1 %v393_v3  ;;  %400 = vmatmul.f32.vlgmr.msra.gmra.mxu0 %v399_v26  ;;  %v445_v60 = vand.u32 4294901760, %v444_v57  ;;  %v282_v1 = vsel %vm256_vm0, %v4383_v62, 0  ;;  %v453_v3 = vand.u32 4294901760, %v452_v0  ;;  %v285_v10 = vsel %vm256_vm0, %v4392_v5, 0 }
  0x1d   : > { %v423_v45 = vand.u32 4294901760, %v422_v42  ;;  %v431_v52 = vand.u32 4294901760, %v430_v49  ;;  %v439_v59 = vand.u32 4294901760, %v438_v56  ;;  %v4389_v4 = vand.u32 4294901760, %v282_v1 }
  0x1e   : > { %930 = vmatmul.f32.gmra.mxu2 %v404_v20  ;;  %v446_v63 = vsub.f32 %v444_v57, %v445_v60  ;;  %v454_v6 = vsub.f32 %v452_v0, %v453_v3  ;;  %v4398_v13 = vand.u32 4294901760, %v285_v10  ;;  %v288_v20 = vsel %vm256_vm0, %v4401_v17, 0 }
  0x1f   : > { %v460_v7 = vsub.f32 %v282_v1, %v4389_v4  ;;  %v4407_v23 = vand.u32 4294901760, %v288_v20  ;;  %v297_v49 = vsel %vm256_vm0, %v4428_v44, 0 }
  0x20   : > { %1151 = vmatmul.f32.gmra.mxu3 %v405_v24  ;;  %v447_v2 = vand.u32 4294901760, %v446_v63  ;;  %v455_v11 = vand.u32 4294901760, %v454_v6  ;;  %v468_v19 = vsub.f32 %v285_v10, %v4398_v13  ;;  %v4410_v24 = vld [vmem:[%s4377_s27 + $0x18] sm:$0xff] }
  0x21   : > { %747 = vmatmul.f32.gmra.mxu1 %v4318_v15  ;;  %v461_v12 = vand.u32 4294901760, %v460_v7  ;;  %v476_v28 = vsub.f32 %v288_v20, %v4407_v23 }
  0x22   : > { %v469_v22 = vand.u32 4294901760, %v468_v19 }
  0x23   : > { %v462_v18 = vsub.f32 %v460_v7, %v461_v12 }
  0x24   : > { %408 = vmatmul.f32.gmra.mxu0 %v407_v31  ;;  %v470_v26 = vsub.f32 %v468_v19, %v469_v22  ;;  %v477_v31 = vand.u32 4294901760, %v476_v28 }
  0x25   : > { %v463_v21 = vand.u32 4294901760, %v462_v18 }
  0x26   : > { %935 = vmatmul.f32.gmra.mxu2 %v412_v29  ;;  %v291_v29 = vsel %vm256_vm0, %v4410_v24, 0  ;;  %v471_v30 = vand.u32 4294901760, %v470_v26  ;;  %v231_v26 = vmul.f32 %v4310_v9, %v4310_v9 }
  0x28   : > { %1157 = vmatmul.f32.gmra.mxu3 %v413_v32  ;;  %v4416_v32 = vand.u32 4294901760, %v291_v29 }
  0x29   : > { %751 = vmatmul.f32.gmra.mxu1 %v4328_v25 }
  0x2a   : > { %v484_v37 = vsub.f32 %v291_v29, %v4416_v32 }
  0x2c   : > { %416 = vmatmul.f32.gmra.mxu0 %v415_v38  ;;  %v294_v38 = vsel %vm256_vm0, %v4419_v35, 0  ;;  %v485_v42 = vand.u32 4294901760, %v484_v37 }
  0x2e   : > { %940 = vmatmul.f32.gmra.mxu2 %v420_v36  ;;  %v478_v36 = vsub.f32 %v476_v28, %v477_v31 }
  0x30   : > { %1163 = vmatmul.f32.gmra.mxu3 %v421_v39  ;;  %v479_v39 = vand.u32 4294901760, %v478_v36 }
  0x31   : > { %755 = vmatmul.f32.gmra.mxu1 %v4337_v33 }
  0x34   : > { %424 = vmatmul.f32.gmra.mxu0 %v423_v45  ;;  %v486_v45 = vsub.f32 %v484_v37, %v485_v42 }
  0x36   : > { %945 = vmatmul.f32.gmra.mxu2 %v428_v43  ;;  %v4425_v43 = vand.u32 4294901760, %v294_v38 }
  0x38   : > { %1169 = vmatmul.f32.gmra.mxu3 %v429_v46  ;;  %v492_v46 = vsub.f32 %v294_v38, %v4425_v43  ;;  %v232_v38 = vmul.f32 %v4321_v16, %v4321_v16 }
  0x39   : > { %759 = vmatmul.f32.gmra.mxu1 %v4346_v40 }
  0x3a   : > { %v493_v51 = vand.u32 4294901760, %v492_v46 }
  0x3c   : > { %432 = vmatmul.f32.gmra.mxu0 %v431_v52  ;;  %v4434_v52 = vand.u32 4294901760, %v297_v49  ;;  %v494_v56 = vsub.f32 %v492_v46, %v493_v51 }
  0x3e   : > { %950 = vmatmul.f32.gmra.mxu2 %v436_v50  ;;  %v487_v50 = vand.u32 4294901760, %v486_v45 }
  0x40   : > { %1175 = vmatmul.f32.gmra.mxu3 %v437_v53  ;;  %v4437_v53 = vld [vmem:[%s4377_s27 + $0x30] sm:$0xff] }
  0x41   : > { %763 = vmatmul.f32.gmra.mxu1 %v4355_v47  ;;  %v300_v58 = vsel %vm256_vm0, %v4437_v53, 0 }
  0x42   : > { %v4443_v63 = vand.u32 4294901760, %v300_v58 }
  0x44   : > { %440 = vmatmul.f32.gmra.mxu0 %v439_v59  ;;  %v495_v59 = vand.u32 4294901760, %v494_v56 }
  0x46   : > { %955 = vmatmul.f32.gmra.mxu2 %v444_v57  ;;  %v500_v57 = vsub.f32 %v297_v49, %v4434_v52 }
  0x48   : > { %1181 = vmatmul.f32.gmra.mxu3 %v445_v60  ;;  %v501_v60 = vand.u32 4294901760, %v500_v57 }
  0x49   : > { %767 = vmatmul.f32.gmra.mxu1 %v4364_v54 }
  0x4a   : > { %v502_v1 = vsub.f32 %v500_v57, %v501_v60 }
  0x4c   : > { %448 = vmatmul.f32.gmra.mxu0 %v447_v2  ;;  %v508_v2 = vsub.f32 %v300_v58, %v4443_v63  ;;  %v503_v6 = vand.u32 4294901760, %v502_v1  ;;  %v233_v58 = vmul.f32 %v4331_v27, %v4331_v27 }
  0x4e   : > { %960 = vmatmul.f32.gmra.mxu2 %v452_v0  ;;  %v4446_v0 = vld [vmem:[%s4377_s27 + $0x38] sm:$0xff] }
  0x50   : > { %1187 = vmatmul.f32.gmra.mxu3 %v453_v3  ;;  %v303_v3 = vsel %vm256_vm0, %v4446_v0, 0 }
  0x51   : > { %771 = vmatmul.f32.gmra.mxu1 %v4380_v61  ;;  %v4452_v10 = vand.u32 4294901760, %v303_v3 }
  0x53   : > { %v516_v18 = vsub.f32 %v303_v3, %v4452_v10 }
  0x54   : > { %456 = vmatmul.f32.gmra.mxu0 %v455_v11  ;;  %v230_v11 = vmul.f32 %v4307_v8, %v4307_v8 }
  0x56   : > { %965 = vmatmul.f32.gmra.mxu2 %v460_v7  ;;  %v509_v7 = vand.u32 4294901760, %v508_v2 }
  0x58   : > { %1193 = vmatmul.f32.gmra.mxu3 %v461_v12  ;;  %v510_v12 = vsub.f32 %v508_v2, %v509_v7 }
  0x59   : > { %775 = vmatmul.f32.gmra.mxu1 %v4389_v4 }
  0x5a   : > { %v511_v20 = vand.u32 4294901760, %v510_v12 }
  0x5c   : > { %464 = vmatmul.f32.gmra.mxu0 %v463_v21  ;;  %v517_v21 = vand.u32 4294901760, %v516_v18 }
  0x5e   : > { %970 = vmatmul.f32.gmra.mxu2 %v468_v19  ;;  %v306_v19 = vsel %vm256_vm0, %v230_v11, 0 }
  0x60   : > { %1199 = vmatmul.f32.gmra.mxu3 %v469_v22  ;;  %v4459_v22 = vand.u32 4294901760, %v306_v19 }
  0x61   : > { %779 = vmatmul.f32.gmra.mxu1 %v4398_v13 }
  0x62   : > { %v524_v29 = vsub.f32 %v306_v19, %v4459_v22 }
  0x64   : > { %472 = vmatmul.f32.gmra.mxu0 %v471_v30  ;;  %v309_v30 = vsel %vm256_vm0, %v231_v26, 0  ;;  %v525_v36 = vand.u32 4294901760, %v524_v29  ;;  %v234_v26 = vmul.f32 %v4340_v34, %v4340_v34 }
  0x66   : > { %975 = vmatmul.f32.gmra.mxu2 %v476_v28  ;;  %v518_v28 = vsub.f32 %v516_v18, %v517_v21 }
  0x68   : > { %1205 = vmatmul.f32.gmra.mxu3 %v477_v31  ;;  %v519_v31 = vand.u32 4294901760, %v518_v28 }
  0x69   : > { %783 = vmatmul.f32.gmra.mxu1 %v4407_v23 }
  0x6c   : > { %480 = vmatmul.f32.gmra.mxu0 %v479_v39  ;;  %v526_v39 = vsub.f32 %v524_v29, %v525_v36 }
  0x6e   : > { %980 = vmatmul.f32.gmra.mxu2 %v484_v37  ;;  %v4466_v37 = vand.u32 4294901760, %v309_v30  ;;  %v527_v49 = vand.u32 4294901760, %v526_v39  ;;  %v318_v39 = vsel %vm256_vm0, %v234_v26, 0 }
  0x70   : > { %1211 = vmatmul.f32.gmra.mxu3 %v485_v42  ;;  %v532_v42 = vsub.f32 %v309_v30, %v4466_v37 }
  0x71   : > { %787 = vmatmul.f32.gmra.mxu1 %v4416_v32 }
  0x74   : > { %488 = vmatmul.f32.gmra.mxu0 %v487_v50  ;;  %v533_v50 = vand.u32 4294901760, %v532_v42 }
  0x76   : > { %985 = vmatmul.f32.gmra.mxu2 %v492_v46  ;;  %v312_v46 = vsel %vm256_vm0, %v232_v38, 0 }
  0x78   : > { %1217 = vmatmul.f32.gmra.mxu3 %v493_v51  ;;  %v4473_v51 = vand.u32 4294901760, %v312_v46 }
  0x79   : > { %791 = vmatmul.f32.gmra.mxu1 %v4425_v43 }
  0x7a   : > { %v540_v3 = vsub.f32 %v312_v46, %v4473_v51 }
  0x7c   : > { %496 = vmatmul.f32.gmra.mxu0 %v495_v59 }
  0x7e   : > { %990 = vmatmul.f32.gmra.mxu2 %v500_v57 }
  0x80   : > { %1223 = vmatmul.f32.gmra.mxu3 %v501_v60 }
  0x81   : > { %795 = vmatmul.f32.gmra.mxu1 %v4434_v52 }
  0x84   : > { %504 = vmatmul.f32.gmra.mxu0 %v503_v6 }
  0x86   : > { %995 = vmatmul.f32.gmra.mxu2 %v508_v2  ;;  %v534_v2 = vsub.f32 %v532_v42, %v533_v50 }
  0x88   : > { %1229 = vmatmul.f32.gmra.mxu3 %v509_v7  ;;  %v315_v7 = vsel %vm256_vm0, %v233_v58, 0  ;;  %v535_v12 = vand.u32 4294901760, %v534_v2 }
  0x89   : > { %799 = vmatmul.f32.gmra.mxu1 %v4443_v63  ;;  %v4482_v19 = vand.u32 4294901760, %v315_v7 }
  0x8c   : > { %512 = vmatmul.f32.gmra.mxu0 %v511_v20 }
  0x8e   : > { %1000 = vmatmul.f32.gmra.mxu2 %v516_v18  ;;  %v541_v18 = vand.u32 4294901760, %v540_v3 }
  0x90   : > { %1235 = vmatmul.f32.gmra.mxu3 %v517_v21 }
  0x91   : > { %803 = vmatmul.f32.gmra.mxu1 %v4452_v10 }
  0x94   : > { %520 = vmatmul.f32.gmra.mxu0 %v519_v31  ;;  %v542_v31 = vsub.f32 %v540_v3, %v541_v18 }
  0x96   : > { %v744_v45 = vpop.f32.mrf.mxu1  ;;  %1005 = vmatmul.f32.gmra.mxu2 %v524_v29 }
  0x98   : > { %1241 = vmatmul.f32.gmra.mxu3 %v525_v36  ;;  %v548_v36 = vsub.f32 %v315_v7, %v4482_v19 }
  0x99   : > { %807 = vmatmul.f32.gmra.mxu1 %v4459_v22  ;;  %v401_v56 = vpop.f32.mrf.mxu0  ;;  %v926_v57 = vpop.f32.mrf.mxu2 }
  0x9a   : > { %v745_v59 = vadd.f32 %v744_v45, %v401_v56  ;;  %v543_v45 = vand.u32 4294901760, %v542_v31  ;;  %v549_v46 = vand.u32 4294901760, %v548_v36 }
  0x9b   : > { %v1146_v60 = vpop.f32.mrf.mxu3 }
  0x9c   : > { %v927_v1 = vadd.f32 %v926_v57, %v745_v59  ;;  %528 = vmatmul.f32.gmra.mxu0 %v527_v49  ;;  %v4491_v49 = vand.u32 4294901760, %v318_v39  ;;  %v235_v57 = vmul.f32 %v4349_v41, %v4349_v41 }
  0x9e   : > { %v748_v6 = vpop.f32.mrf.mxu1  ;;  %v4479_v11 = vadd.f32 %v1146_v60, %v927_v1  ;;  %1010 = vmatmul.f32.gmra.mxu2 %v532_v42  ;;  %v550_v1 = vsub.f32 %v548_v36, %v549_v46  ;;  %v556_v2 = vsub.f32 %v318_v39, %v4491_v49 }
  0xa0   : > { %1247 = vmatmul.f32.gmra.mxu3 %v533_v50 }
  0xa1   : > { %811 = vmatmul.f32.gmra.mxu1 %v4466_v37  ;;  %v409_v20 = vpop.f32.mrf.mxu0  ;;  %v931_v21 = vpop.f32.mrf.mxu2 }
  0xa2   : > { %v749_v28 = vadd.f32 %v748_v6, %v409_v20  ;;  %v321_v6 = vsel %vm256_vm0, %v235_v57, 0 }
  0xa3   : > { %v1152_v29 = vpop.f32.mrf.mxu3  ;;  %v4500_v20 = vand.u32 4294901760, %v321_v6 }
  0xa4   : > { %v932_v30 = vadd.f32 %v931_v21, %v749_v28  ;;  %536 = vmatmul.f32.gmra.mxu0 %v535_v12  ;;  %v551_v12 = vand.u32 4294901760, %v550_v1  ;;  %v236_v28 = vmul.f32 %v4358_v48, %v4358_v48 }
  0xa5   : > { %v564_v39 = vsub.f32 %v321_v6, %v4500_v20 }
  0xa6   : > { %v752_v38 = vpop.f32.mrf.mxu1  ;;  %v4488_v42 = vadd.f32 %v1152_v29, %v932_v30  ;;  %1015 = vmatmul.f32.gmra.mxu2 %v540_v3 }
  0xa8   : > { %1253 = vmatmul.f32.gmra.mxu3 %v541_v18  ;;  %v557_v18 = vand.u32 4294901760, %v556_v2 }
  0xa9   : > { %815 = vmatmul.f32.gmra.mxu1 %v4473_v51  ;;  %v417_v50 = vpop.f32.mrf.mxu0  ;;  %v936_v56 = vpop.f32.mrf.mxu2 }
  0xaa   : > { %v753_v58 = vadd.f32 %v752_v38, %v417_v50  ;;  %v558_v38 = vsub.f32 %v556_v2, %v557_v18 }
  0xab   : > { %v1158_v59 = vpop.f32.mrf.mxu3 }
  0xac   : > { %v937_v60 = vadd.f32 %v936_v56, %v753_v58  ;;  %544 = vmatmul.f32.gmra.mxu0 %v543_v45  ;;  %v324_v45 = vsel %vm256_vm0, %v236_v28, 0  ;;  %v559_v50 = vand.u32 4294901760, %v558_v38  ;;  %v565_v56 = vand.u32 4294901760, %v564_v39 }
  0xad   : > { %v4509_v57 = vand.u32 4294901760, %v324_v45 }
  0xae   : > { %v756_v3 = vpop.f32.mrf.mxu1  ;;  %v4497_v7 = vadd.f32 %v1158_v59, %v937_v60  ;;  %1020 = vmatmul.f32.gmra.mxu2 %v548_v36  ;;  %v237_v60 = vmul.f32 %v4367_v55, %v4367_v55 }
  0xaf   : > { %5801 = vst [vmem:[#allocation2_spill] sm:$0xff] %v4509_v57 }
  0xb0   : > { %1259 = vmatmul.f32.gmra.mxu3 %v549_v46 }
  0xb1   : > { %819 = vmatmul.f32.gmra.mxu1 %v4482_v19  ;;  %v425_v21 = vpop.f32.mrf.mxu0  ;;  %v941_v26 = vpop.f32.mrf.mxu2 }
  0xb2   : > { %v757_v29 = vadd.f32 %v756_v3, %v425_v21  ;;  %v572_v21 = vsub.f32 %v324_v45, %v4509_v57 }
  0xb3   : > { %v1164_v30 = vpop.f32.mrf.mxu3 }
  0xb4   : > { %v942_v31 = vadd.f32 %v941_v26, %v757_v29  ;;  %552 = vmatmul.f32.gmra.mxu0 %v551_v12  ;;  %v566_v12 = vsub.f32 %v564_v39, %v565_v56  ;;  %v327_v26 = vsel %vm256_vm0, %v237_v60, 0  ;;  %v573_v29 = vand.u32 4294901760, %v572_v21 }
  0xb6   : > { %v760_v36 = vpop.f32.mrf.mxu1  ;;  %v4506_v46 = vadd.f32 %v1164_v30, %v942_v31  ;;  %1025 = vmatmul.f32.gmra.mxu2 %v556_v2  ;;  %v567_v28 = vand.u32 4294901760, %v566_v12  ;;  %v4518_v30 = vand.u32 4294901760, %v327_v26 }
  0xb8   : > { %1265 = vmatmul.f32.gmra.mxu3 %v557_v18  ;;  %5802 = vst [vmem:[#allocation3_spill] sm:$0xff] %v4518_v30  ;;  %v580_v60 = vsub.f32 %v327_v26, %v4518_v30 }
  0xb9   : > { %823 = vmatmul.f32.gmra.mxu1 %v4491_v49  ;;  %v433_v58 = vpop.f32.mrf.mxu0  ;;  %v946_v59 = vpop.f32.mrf.mxu2 }
  0xba   : > { %v761_v1 = vadd.f32 %v760_v36, %v433_v58  ;;  %v238_v36 = vmul.f32 %v4383_v62, %v4383_v62 }
  0xbb   : > { %v1170_v3 = vpop.f32.mrf.mxu3 }
  0xbc   : > { %v947_v6 = vadd.f32 %v946_v59, %v761_v1  ;;  %560 = vmatmul.f32.gmra.mxu0 %v559_v50  ;;  %v574_v59 = vsub.f32 %v572_v21, %v573_v29  ;;  %v330_v1 = vsel %vm256_vm0, %v238_v36, 0 }
  0xbd   : > { %v4527_v12 = vand.u32 4294901760, %v330_v1 }
  0xbe   : > { %v764_v2 = vpop.f32.mrf.mxu1  ;;  %v4515_v18 = vadd.f32 %v1170_v3, %v947_v6  ;;  %1030 = vmatmul.f32.gmra.mxu2 %v564_v39  ;;  %v575_v3 = vand.u32 4294901760, %v574_v59  ;;  %v581_v6 = vand.u32 4294901760, %v580_v60 }
  0xbf   : > { %5804 = vst [vmem:[#allocation5_spill] sm:$0xff] %v4527_v12 }
  0xc0   : > { %1271 = vmatmul.f32.gmra.mxu3 %v565_v56  ;;  %v582_v36 = vsub.f32 %v580_v60, %v581_v6 }
  0xc1   : > { %827 = vmatmul.f32.gmra.mxu1 %v4500_v20  ;;  %v441_v31 = vpop.f32.mrf.mxu0  ;;  %v951_v38 = vpop.f32.mrf.mxu2 }
  0xc2   : > { %v765_v50 = vadd.f32 %v764_v2, %v441_v31  ;;  %v583_v59 = vand.u32 4294901760, %v582_v36 }
  0xc3   : > { %v1176_v45 = vpop.f32.mrf.mxu3 }
  0xc4   : > { %v952_v58 = vadd.f32 %v951_v38, %v765_v50  ;;  %568 = vmatmul.f32.gmra.mxu0 %v567_v28  ;;  %v239_v28 = vmul.f32 %v4392_v5, %v4392_v5 }
  0xc6   : > { %v768_v39 = vpop.f32.mrf.mxu1  ;;  %v4524_v56 = vadd.f32 %v1176_v45, %v952_v58  ;;  %1035 = vmatmul.f32.gmra.mxu2 %v572_v21  ;;  %v588_v45 = vsub.f32 %v330_v1, %v4527_v12  ;;  %v333_v58 = vsel %vm256_vm0, %v239_v28, 0 }
  0xc8   : > { %5803 = vst [vmem:[#allocation4_spill] sm:$0xff] %v4524_v56  ;;  %1277 = vmatmul.f32.gmra.mxu3 %v573_v29  ;;  %v4536_v56 = vand.u32 4294901760, %v333_v58 }
  0xc9   : > { %831 = vmatmul.f32.gmra.mxu1 %v4509_v57  ;;  %v449_v2 = vpop.f32.mrf.mxu0  ;;  %v956_v31 = vpop.f32.mrf.mxu2  ;;  %v589_v57 = vand.u32 4294901760, %v588_v45 }
  0xca   : > { %v769_v38 = vadd.f32 %v768_v39, %v449_v2  ;;  %5806 = vst [vmem:[#allocation7_spill] sm:$0xff] %v4536_v56 }
  0xcb   : > { %v1182_v26 = vpop.f32.mrf.mxu3  ;;  %v590_v28 = vsub.f32 %v588_v45, %v589_v57 }
  0xcc   : > { %v957_v50 = vadd.f32 %v956_v31, %v769_v38  ;;  %576 = vmatmul.f32.gmra.mxu0 %v575_v3  ;;  %v240_v3 = vmul.f32 %v4401_v17, %v4401_v17 }
  0xcd   : > { %v591_v36 = vand.u32 4294901760, %v590_v28 }
  0xce   : > { %v772_v21 = vpop.f32.mrf.mxu1  ;;  %v4533_v29 = vadd.f32 %v1182_v26, %v957_v50  ;;  %1040 = vmatmul.f32.gmra.mxu2 %v580_v60  ;;  %v596_v26 = vsub.f32 %v333_v58, %v4536_v56  ;;  %v336_v50 = vsel %vm256_vm0, %v240_v3, 0 }
  0xd0   : > { %5805 = vst [vmem:[#allocation6_spill] sm:$0xff] %v4533_v29  ;;  %1283 = vmatmul.f32.gmra.mxu3 %v581_v6  ;;  %v4545_v29 = vand.u32 4294901760, %v336_v50 }
  0xd1   : > { %835 = vmatmul.f32.gmra.mxu1 %v4518_v30  ;;  %v457_v39 = vpop.f32.mrf.mxu0  ;;  %v961_v2 = vpop.f32.mrf.mxu2  ;;  %v597_v30 = vand.u32 4294901760, %v596_v26 }
  0xd2   : > { %v773_v31 = vadd.f32 %v772_v21, %v457_v39  ;;  %5808 = vst [vmem:[#allocation9_spill] sm:$0xff] %v4545_v29 }
  0xd3   : > { %v1188_v1 = vpop.f32.mrf.mxu3  ;;  %v598_v3 = vsub.f32 %v596_v26, %v597_v30 }
  0xd4   : > { %v962_v38 = vadd.f32 %v961_v2, %v773_v31  ;;  %584 = vmatmul.f32.gmra.mxu0 %v583_v59  ;;  %v241_v59 = vmul.f32 %v4410_v24, %v4410_v24 }
  0xd5   : > { %v599_v28 = vand.u32 4294901760, %v598_v3 }
  0xd6   : > { %v776_v60 = vpop.f32.mrf.mxu1  ;;  %v4542_v6 = vadd.f32 %v1188_v1, %v962_v38  ;;  %1045 = vmatmul.f32.gmra.mxu2 %v588_v45  ;;  %v604_v1 = vsub.f32 %v336_v50, %v4545_v29  ;;  %v339_v38 = vsel %vm256_vm0, %v241_v59, 0 }
  0xd8   : > { %5807 = vst [vmem:[#allocation8_spill] sm:$0xff] %v4542_v6  ;;  %1289 = vmatmul.f32.gmra.mxu3 %v589_v57  ;;  %v4554_v6 = vand.u32 4294901760, %v339_v38 }
  0xd9   : > { %839 = vmatmul.f32.gmra.mxu1 %v4527_v12  ;;  %v465_v21 = vpop.f32.mrf.mxu0  ;;  %v966_v39 = vpop.f32.mrf.mxu2  ;;  %v605_v12 = vand.u32 4294901760, %v604_v1 }
  0xda   : > { %v777_v2 = vadd.f32 %v776_v60, %v465_v21  ;;  %5810 = vst [vmem:[#allocation11_spill] sm:$0xff] %v4554_v6 }
  0xdb   : > { %v1194_v58 = vpop.f32.mrf.mxu3  ;;  %v606_v59 = vsub.f32 %v604_v1, %v605_v12 }
  0xdc   : > { %v967_v31 = vadd.f32 %v966_v39, %v777_v2  ;;  %592 = vmatmul.f32.gmra.mxu0 %v591_v36  ;;  %v242_v36 = vmul.f32 %v4419_v35, %v4419_v35 }
  0xdd   : > { %v607_v3 = vand.u32 4294901760, %v606_v59 }
  0xde   : > { %v780_v45 = vpop.f32.mrf.mxu1  ;;  %v4551_v57 = vadd.f32 %v1194_v58, %v967_v31  ;;  %1050 = vmatmul.f32.gmra.mxu2 %v596_v26  ;;  %v612_v58 = vsub.f32 %v339_v38, %v4554_v6  ;;  %v342_v31 = vsel %vm256_vm0, %v242_v36, 0 }
  0xe0   : > { %5809 = vst [vmem:[#allocation10_spill] sm:$0xff] %v4551_v57  ;;  %1295 = vmatmul.f32.gmra.mxu3 %v597_v30  ;;  %v4563_v57 = vand.u32 4294901760, %v342_v31 }
  0xe1   : > { %843 = vmatmul.f32.gmra.mxu1 %v4536_v56  ;;  %v473_v60 = vpop.f32.mrf.mxu0  ;;  %v971_v21 = vpop.f32.mrf.mxu2  ;;  %v613_v56 = vand.u32 4294901760, %v612_v58 }
  0xe2   : > { %v781_v39 = vadd.f32 %v780_v45, %v473_v60  ;;  %5812 = vst [vmem:[#allocation13_spill] sm:$0xff] %v4563_v57 }
  0xe3   : > { %v1200_v50 = vpop.f32.mrf.mxu3  ;;  %v614_v36 = vsub.f32 %v612_v58, %v613_v56 }
  0xe4   : > { %v972_v2 = vadd.f32 %v971_v21, %v781_v39  ;;  %600 = vmatmul.f32.gmra.mxu0 %v599_v28  ;;  %v243_v28 = vmul.f32 %v4428_v44, %v4428_v44 }
  0xe5   : > { %v615_v59 = vand.u32 4294901760, %v614_v36 }
  0xe6   : > { %v784_v26 = vpop.f32.mrf.mxu1  ;;  %v4560_v30 = vadd.f32 %v1200_v50, %v972_v2  ;;  %1055 = vmatmul.f32.gmra.mxu2 %v604_v1  ;;  %v620_v50 = vsub.f32 %v342_v31, %v4563_v57  ;;  %v345_v2 = vsel %vm256_vm0, %v243_v28, 0 }
  0xe8   : > { %5811 = vst [vmem:[#allocation12_spill] sm:$0xff] %v4560_v30  ;;  %1301 = vmatmul.f32.gmra.mxu3 %v605_v12  ;;  %v4572_v30 = vand.u32 4294901760, %v345_v2 }
  0xe9   : > { %847 = vmatmul.f32.gmra.mxu1 %v4545_v29  ;;  %v481_v45 = vpop.f32.mrf.mxu0  ;;  %v976_v60 = vpop.f32.mrf.mxu2  ;;  %v621_v29 = vand.u32 4294901760, %v620_v50 }
  0xea   : > { %v785_v21 = vadd.f32 %v784_v26, %v481_v45  ;;  %5814 = vst [vmem:[#allocation15_spill] sm:$0xff] %v4572_v30 }
  0xeb   : > { %v1206_v38 = vpop.f32.mrf.mxu3  ;;  %v622_v28 = vsub.f32 %v620_v50, %v621_v29 }
  0xec   : > { %v977_v39 = vadd.f32 %v976_v60, %v785_v21  ;;  %608 = vmatmul.f32.gmra.mxu0 %v607_v3  ;;  %v244_v3 = vmul.f32 %v4437_v53, %v4437_v53 }
  0xed   : > { %v623_v36 = vand.u32 4294901760, %v622_v28 }
  0xee   : > { %v788_v1 = vpop.f32.mrf.mxu1  ;;  %v4569_v12 = vadd.f32 %v1206_v38, %v977_v39  ;;  %1060 = vmatmul.f32.gmra.mxu2 %v612_v58  ;;  %v628_v38 = vsub.f32 %v345_v2, %v4572_v30  ;;  %v348_v39 = vsel %vm256_vm0, %v244_v3, 0 }
  0xf0   : > { %5813 = vst [vmem:[#allocation14_spill] sm:$0xff] %v4569_v12  ;;  %1307 = vmatmul.f32.gmra.mxu3 %v613_v56  ;;  %v4581_v12 = vand.u32 4294901760, %v348_v39 }
  0xf1   : > { %851 = vmatmul.f32.gmra.mxu1 %v4554_v6  ;;  %v489_v26 = vpop.f32.mrf.mxu0  ;;  %v981_v45 = vpop.f32.mrf.mxu2  ;;  %v629_v6 = vand.u32 4294901760, %v628_v38 }
  0xf2   : > { %v789_v60 = vadd.f32 %v788_v1, %v489_v26 }
  0xf3   : > { %v1212_v31 = vpop.f32.mrf.mxu3  ;;  %v630_v3 = vsub.f32 %v628_v38, %v629_v6 }
  0xf4   : > { %v982_v21 = vadd.f32 %v981_v45, %v789_v60  ;;  %616 = vmatmul.f32.gmra.mxu0 %v615_v59  ;;  %v245_v59 = vmul.f32 %v4446_v0, %v4446_v0 }
  0xf5   : > { %v631_v28 = vand.u32 4294901760, %v630_v3 }
  0xf6   : > { %v792_v58 = vpop.f32.mrf.mxu1  ;;  %v4578_v56 = vadd.f32 %v1212_v31, %v982_v21  ;;  %1065 = vmatmul.f32.gmra.mxu2 %v620_v50  ;;  %v636_v31 = vsub.f32 %v348_v39, %v4581_v12  ;;  %v351_v21 = vsel %vm256_vm0, %v245_v59, 0 }
  0xf8   : > { %5815 = vst [vmem:[#allocation16_spill] sm:$0xff] %v4578_v56  ;;  %1313 = vmatmul.f32.gmra.mxu3 %v621_v29  ;;  %v4590_v56 = vand.u32 4294901760, %v351_v21 }
  0xf9   : > { %855 = vmatmul.f32.gmra.mxu1 %v4563_v57  ;;  %v497_v1 = vpop.f32.mrf.mxu0  ;;  %v986_v26 = vpop.f32.mrf.mxu2  ;;  %v637_v57 = vand.u32 4294901760, %v636_v31 }
  0xfa   : > { %v793_v45 = vadd.f32 %v792_v58, %v497_v1 }
  0xfb   : > { %v1218_v2 = vpop.f32.mrf.mxu3  ;;  %v638_v59 = vsub.f32 %v636_v31, %v637_v57 }
  0xfc   : > { %v987_v60 = vadd.f32 %v986_v26, %v793_v45  ;;  %624 = vmatmul.f32.gmra.mxu0 %v623_v36  ;;  %v246_v36 = vmul.f32 %v4383_v62, %v4307_v8 }
  0xfd   : > { %v639_v3 = vand.u32 4294901760, %v638_v59 }
  0xfe   : > { %v796_v50 = vpop.f32.mrf.mxu1  ;;  %v4587_v29 = vadd.f32 %v1218_v2, %v987_v60  ;;  %1070 = vmatmul.f32.gmra.mxu2 %v628_v38  ;;  %v644_v2 = vsub.f32 %v351_v21, %v4590_v56  ;;  %v354_v60 = vsel %vm256_vm0, %v246_v36, 0 }
 0x100   : > { %5816 = vst [vmem:[#allocation17_spill] sm:$0xff] %v4587_v29  ;;  %1319 = vmatmul.f32.gmra.mxu3 %v629_v6  ;;  %v4599_v29 = vand.u32 4294901760, %v354_v60 }
 0x101   : > { %859 = vmatmul.f32.gmra.mxu1 %v4572_v30  ;;  %v505_v58 = vpop.f32.mrf.mxu0  ;;  %v991_v1 = vpop.f32.mrf.mxu2  ;;  %v645_v30 = vand.u32 4294901760, %v644_v2 }
 0x102   : > { %v797_v26 = vadd.f32 %v796_v50, %v505_v58  ;;  %v247_v50 = vmul.f32 %v4392_v5, %v4310_v9  ;;  %v652_v36 = vsub.f32 %v354_v60, %v4599_v29 }
 0x103   : > { %v1224_v39 = vpop.f32.mrf.mxu3 }
 0x104   : > { %v992_v45 = vadd.f32 %v991_v1, %v797_v26  ;;  %632 = vmatmul.f32.gmra.mxu0 %v631_v28  ;;  %v646_v1 = vsub.f32 %v644_v2, %v645_v30  ;;  %v357_v26 = vsel %vm256_vm0, %v247_v50, 0 }
 0x105   : > { %v4608_v59 = vand.u32 4294901760, %v357_v26 }
 0x106   : > { %v800_v38 = vpop.f32.mrf.mxu1  ;;  %v4596_v6 = vadd.f32 %v1224_v39, %v992_v45  ;;  %1075 = vmatmul.f32.gmra.mxu2 %v636_v31  ;;  %v647_v39 = vand.u32 4294901760, %v646_v1  ;;  %v653_v45 = vand.u32 4294901760, %v652_v36  ;;  %v249_v1 = vmul.f32 %v4410_v24, %v4331_v27 }
 0x107   : > { %v660_v50 = vsub.f32 %v357_v26, %v4608_v59  ;;  %v250_v27 = vmul.f32 %v4419_v35, %v4340_v34  ;;  %v251_v34 = vmul.f32 %v4428_v44, %v4349_v41 }
 0x108   : > { %1325 = vmatmul.f32.gmra.mxu3 %v637_v57 }
 0x109   : > { %863 = vmatmul.f32.gmra.mxu1 %v4581_v12  ;;  %v513_v8 = vpop.f32.mrf.mxu0  ;;  %v996_v62 = vpop.f32.mrf.mxu2 }
 0x10a   : > { %v801_v28 = vadd.f32 %v800_v38, %v513_v8  ;;  %v248_v38 = vmul.f32 %v4401_v17, %v4321_v16 }
 0x10b   : > { %v1230_v21 = vpop.f32.mrf.mxu3 }
 0x10c   : > { %v997_v58 = vadd.f32 %v996_v62, %v801_v28  ;;  %640 = vmatmul.f32.gmra.mxu0 %v639_v3  ;;  %v654_v62 = vsub.f32 %v652_v36, %v653_v45 }
 0x10e   : > { %v804_v31 = vpop.f32.mrf.mxu1  ;;  %v4605_v57 = vadd.f32 %v1230_v21, %v997_v58  ;;  %1080 = vmatmul.f32.gmra.mxu2 %v644_v2  ;;  %v655_v21 = vand.u32 4294901760, %v654_v62  ;;  %v661_v58 = vand.u32 4294901760, %v660_v50 }
 0x110   : > { %1331 = vmatmul.f32.gmra.mxu3 %v645_v30  ;;  %v360_v30 = vsel %vm256_vm0, %v248_v38, 0 }
 0x111   : > { %867 = vmatmul.f32.gmra.mxu1 %v4590_v56  ;;  %v521_v9 = vpop.f32.mrf.mxu0  ;;  %v1001_v5 = vpop.f32.mrf.mxu2  ;;  %v4619_v16 = vand.u32 4294901760, %v360_v30 }
 0x112   : > { %v805_v3 = vadd.f32 %v804_v31, %v521_v9  ;;  %v662_v31 = vsub.f32 %v660_v50, %v661_v58 }
 0x113   : > { %v1236_v60 = vpop.f32.mrf.mxu3  ;;  %v668_v26 = vsub.f32 %v360_v30, %v4619_v16 }
 0x114   : > { %v1002_v8 = vadd.f32 %v1001_v5, %v805_v3  ;;  %648 = vmatmul.f32.gmra.mxu0 %v647_v39 }
 0x115   : > { %v669_v9 = vand.u32 4294901760, %v668_v26 }
 0x116   : > { %v4613_v2 = vpop.f32.mrf.mxu1  ;;  %v4616_v28 = vadd.f32 %v1236_v60, %v1002_v8  ;;  %1085 = vmatmul.f32.gmra.mxu2 %v652_v36  ;;  %v363_v36 = vsel %vm256_vm0, %v249_v1, 0  ;;  %v366_v8 = vsel %vm256_vm0, %v250_v27, 0  ;;  %v252_v27 = vmul.f32 %v4437_v53, %v4358_v48 }
 0x117   : > { %v4630_v5 = vand.u32 4294901760, %v363_v36  ;;  %v670_v24 = vsub.f32 %v668_v26, %v669_v9  ;;  %v4641_v30 = vand.u32 4294901760, %v366_v8 }
 0x118   : > { %1337 = vmatmul.f32.gmra.mxu3 %v653_v45  ;;  %v663_v45 = vand.u32 4294901760, %v662_v31  ;;  %v369_v31 = vsel %vm256_vm0, %v251_v34, 0  ;;  %v372_v34 = vsel %vm256_vm0, %v252_v27, 0 }
 0x119   : > { %871 = vmatmul.f32.gmra.mxu1 %v4599_v29  ;;  %v4621_v17 = vpop.f32.mrf.mxu0  ;;  %5817 = vst [vmem:[#allocation18_spill] sm:$0xff] %v4630_v5  ;;  %v676_v3 = vsub.f32 %v363_v36, %v4630_v5  ;;  %v671_v62 = vand.u32 4294901760, %v670_v24  ;;  %v4657_v44 = vand.u32 4294901760, %v369_v31 }
 0x11a   : > { %5818 = vst [vmem:[#allocation19_spill] sm:$0xff] %v4641_v30 }
 0x11c   : > { %656 = vmatmul.f32.gmra.mxu0 %v655_v21 }
 0x11e   : > { %v4626_v39 = vpop.f32.mrf.mxu1  ;;  %1090 = vmatmul.f32.gmra.mxu2 %v660_v50  ;;  %v677_v50 = vand.u32 4294901760, %v676_v3 }
 0x120   : > { %1343 = vmatmul.f32.gmra.mxu3 %v661_v58  ;;  %v678_v35 = vsub.f32 %v676_v3, %v677_v50  ;;  %v684_v58 = vsub.f32 %v366_v8, %v4641_v30 }
 0x121   : > { %875 = vmatmul.f32.gmra.mxu1 %v4608_v59  ;;  %v4632_v38 = vpop.f32.mrf.mxu0 }
 0x122   : > { %v685_v41 = vand.u32 4294901760, %v684_v58 }
 0x124   : > { %664 = vmatmul.f32.gmra.mxu0 %v663_v45  ;;  %v679_v45 = vand.u32 4294901760, %v678_v35  ;;  %v686_v8 = vsub.f32 %v684_v58, %v685_v41 }
 0x126   : > { %v4637_v60 = vpop.f32.mrf.mxu1  ;;  %1095 = vmatmul.f32.gmra.mxu2 %v668_v26  ;;  %v2386_v26 = vld [vmem:[%s5750_s3 + $0x8] sm:$0xff]  ;;  %v687_v35 = vand.u32 4294901760, %v686_v8 }
 0x127   : > { %v4654_v36 = vand.u32 4294901760, %v2386_v26 }
 0x128   : > { %1349 = vmatmul.f32.gmra.mxu3 %v669_v9 }
 0x129   : > { %879 = vmatmul.f32.gmra.mxu1 %v4619_v16  ;;  %v4643_v21 = vpop.f32.mrf.mxu0  ;;  %2522 = vmatpush.msrb.mxu2 %v4654_v36  ;;  %v4665_v24 = vsub.f32 %v2386_v26, %v4654_v36 }
 0x12a   : > { %3269 = vmatpush.msra.mxu1 %v4654_v36 }
 0x12b   : > { %3049 = vmatpush.msra.mxu0 %v4665_v24 }
 0x12c   : > { %672 = vmatmul.f32.gmra.mxu0 %v671_v62  ;;  %v692_v62 = vsub.f32 %v369_v31, %v4657_v44  ;;  %v253_v31 = vmul.f32 %v4446_v0, %v4367_v55 }
 0x12e   : > { %v4648_v1 = vpop.f32.mrf.mxu1  ;;  %1100 = vmatmul.f32.gmra.mxu2 %v676_v3  ;;  %v5770_v3 = vand.u32 4294901760, %v4665_v24  ;;  %v693_v26 = vand.u32 4294901760, %v692_v62 }
 0x130   : > { %1355 = vmatmul.f32.gmra.mxu3 %v677_v50  ;;  %v2863_v48 = vsub.f32 %v4665_v24, %v5770_v3  ;;  %v694_v27 = vsub.f32 %v692_v62, %v693_v26 }
 0x131   : > { %883 = vmatmul.f32.gmra.mxu1 %v4630_v5  ;;  %v4659_v9 = vpop.f32.mrf.mxu0  ;;  %v4678_v5 = vand.u32 4294901760, %v372_v34 }
 0x132   : > { %v2864_v53 = vand.u32 4294901760, %v2863_v48 }
 0x134   : > { %680 = vmatmul.f32.gmra.mxu0 %v679_v45  ;;  %2865 = vmatpush.msrb.mxu3 %v2864_v53 }
 0x136   : > { %v4671_v50 = vpop.f32.mrf.mxu1  ;;  %1105 = vmatmul.f32.gmra.mxu2 %v684_v58  ;;  %v375_v58 = vsel %vm256_vm0, %v253_v31, 0 }
 0x137   : > { %5819 = vst [vmem:[#allocation20_spill] sm:$0xff] %v4671_v50  ;;  %v700_v50 = vsub.f32 %v372_v34, %v4678_v5  ;;  %v4689_v48 = vand.u32 4294901760, %v375_v58 }
 0x138   : > { %1361 = vmatmul.f32.gmra.mxu3 %v685_v41  ;;  %v695_v41 = vand.u32 4294901760, %v694_v27 }
 0x139   : > { %887 = vmatmul.f32.gmra.mxu1 %v4641_v30  ;;  %v4680_v45 = vpop.f32.mrf.mxu0  ;;  %v701_v8 = vand.u32 4294901760, %v700_v50  ;;  %v708_v0 = vsub.f32 %v375_v58, %v4689_v48 }
 0x13b   : > { %v702_v55 = vsub.f32 %v700_v50, %v701_v8  ;;  %v709_v34 = vand.u32 4294901760, %v708_v0 }
 0x13c   : > { %688 = vmatmul.f32.gmra.mxu0 %v687_v35 }
 0x13e   : > { %v4685_v3 = vpop.f32.mrf.mxu1  ;;  %1110 = vmatmul.f32.gmra.mxu2 %v692_v62  ;;  %v703_v62 = vand.u32 4294901760, %v702_v55 }
 0x140   : > { %1367 = vmatmul.f32.gmra.mxu3 %v693_v26  ;;  %v710_v26 = vsub.f32 %v708_v0, %v709_v34 }
 0x141   : > { %891 = vmatmul.f32.gmra.mxu1 %v4657_v44  ;;  %v4691_v30 = vpop.f32.mrf.mxu0 }
 0x142   : > { %v711_v27 = vand.u32 4294901760, %v710_v26 }
 0x144   : > { %696 = vmatmul.f32.gmra.mxu0 %v695_v41 }
 0x146   : > { %v4694_v53 = vpop.f32.mrf.mxu1  ;;  %1115 = vmatmul.f32.gmra.mxu2 %v700_v50 }
 0x148   : > { %1373 = vmatmul.f32.gmra.mxu3 %v701_v8 }
 0x149   : > { %895 = vmatmul.f32.gmra.mxu1 %v4678_v5  ;;  %v4697_v35 = vpop.f32.mrf.mxu0 }
 0x14c   : > { %704 = vmatmul.f32.gmra.mxu0 %v703_v62 }
 0x14e   : > { %v4699_v31 = vpop.f32.mrf.mxu1  ;;  %1120 = vmatmul.f32.gmra.mxu2 %v708_v0 }
 0x150   : > { %1379 = vmatmul.f32.gmra.mxu3 %v709_v34 }
 0x151   : > { %899 = vmatmul.f32.gmra.mxu1 %v4689_v48  ;;  %v4702_v58 = vpop.f32.mrf.mxu0 }
 0x154   : > { %712 = vmatmul.f32.gmra.mxu0 %v711_v27 }
 0x156   : > { %v4704_v50 = vpop.f32.mrf.mxu1 }
 0x159   : > { %1585 = vmatmul.f32.vlgmr.msrb.gmra.mxu1 %v4316_v14  ;;  %v4707_v41 = vpop.f32.mrf.mxu0 }
 0x15c   : > { %1406 = vmatmul.f32.vlgmr.msrb.gmra.mxu0 %v4316_v14 }
 0x15e   : > { %v4710_v8 = vpop.f32.mrf.mxu1 }
 0x161   : > { %1589 = vmatmul.f32.gmra.mxu1 %v4318_v15  ;;  %v4713_v55 = vpop.f32.mrf.mxu0 }
 0x164   : > { %1410 = vmatmul.f32.gmra.mxu0 %v4318_v15 }
 0x166   : > { %v4716_v0 = vpop.f32.mrf.mxu1 }
 0x169   : > { %1593 = vmatmul.f32.gmra.mxu1 %v4328_v25  ;;  %v4719_v62 = vpop.f32.mrf.mxu0 }
 0x16c   : > { %1414 = vmatmul.f32.gmra.mxu0 %v4328_v25 }
 0x16e   : > { %v4722_v34 = vpop.f32.mrf.mxu1 }
 0x16f   : > { %5820 = vst [vmem:[#allocation21_spill] sm:$0xff] %v4722_v34 }
 0x171   : > { %1597 = vmatmul.f32.gmra.mxu1 %v4337_v33  ;;  %v4725_v14 = vpop.f32.mrf.mxu0 }
 0x174   : > { %1418 = vmatmul.f32.gmra.mxu0 %v4337_v33 }
 0x176   : > { %v4728_v26 = vpop.f32.mrf.mxu1 }
 0x177   : > { %5821 = vst [vmem:[#allocation22_spill] sm:$0xff] %v4728_v26 }
 0x179   : > { %1601 = vmatmul.f32.gmra.mxu1 %v4346_v40  ;;  %v4731_v15 = vpop.f32.mrf.mxu0 }
 0x17c   : > { %1422 = vmatmul.f32.gmra.mxu0 %v4346_v40 }
 0x17e   : > { %v4734_v27 = vpop.f32.mrf.mxu1 }
 0x17f   : > { %5822 = vst [vmem:[#allocation23_spill] sm:$0xff] %v4734_v27 }
 0x181   : > { %1605 = vmatmul.f32.gmra.mxu1 %v4355_v47  ;;  %v4737_v25 = vpop.f32.mrf.mxu0 }
 0x184   : > { %1426 = vmatmul.f32.gmra.mxu0 %v4355_v47 }
 0x186   : > { %v4740_v34 = vpop.f32.mrf.mxu1 }
 0x187   : > { %5823 = vst [vmem:[#allocation24_spill] sm:$0xff] %v4740_v34 }
 0x189   : > { %1609 = vmatmul.f32.gmra.mxu1 %v4364_v54  ;;  %v4743_v33 = vpop.f32.mrf.mxu0 }
 0x18c   : > { %1430 = vmatmul.f32.gmra.mxu0 %v4364_v54 }
 0x18e   : > { %v4746_v26 = vpop.f32.mrf.mxu1 }
 0x18f   : > { %5824 = vst [vmem:[#allocation25_spill] sm:$0xff] %v4746_v26 }
 0x191   : > { %1613 = vmatmul.f32.gmra.mxu1 %v4380_v61  ;;  %v4749_v40 = vpop.f32.mrf.mxu0 }
 0x194   : > { %1434 = vmatmul.f32.gmra.mxu0 %v4380_v61 }
 0x196   : > { %v4752_v27 = vpop.f32.mrf.mxu1 }
 0x197   : > { %5825 = vst [vmem:[#allocation26_spill] sm:$0xff] %v4752_v27 }
 0x199   : > { %1617 = vmatmul.f32.gmra.mxu1 %v4389_v4  ;;  %v4755_v47 = vpop.f32.mrf.mxu0 }
 0x19c   : > { %1438 = vmatmul.f32.gmra.mxu0 %v4389_v4 }
 0x19e   : > { %v4758_v34 = vpop.f32.mrf.mxu1 }
 0x19f   : > { %5826 = vst [vmem:[#allocation27_spill] sm:$0xff] %v4758_v34 }
 0x1a1   : > { %1621 = vmatmul.f32.gmra.mxu1 %v4398_v13  ;;  %v4761_v54 = vpop.f32.mrf.mxu0 }
 0x1a4   : > { %1442 = vmatmul.f32.gmra.mxu0 %v4398_v13 }
 0x1a6   : > { %v4764_v26 = vpop.f32.mrf.mxu1 }
 0x1a7   : > { %5827 = vst [vmem:[#allocation28_spill] sm:$0xff] %v4764_v26 }
 0x1a9   : > { %1625 = vmatmul.f32.gmra.mxu1 %v4407_v23  ;;  %v4767_v61 = vpop.f32.mrf.mxu0 }
 0x1ac   : > { %1446 = vmatmul.f32.gmra.mxu0 %v4407_v23 }
 0x1ae   : > { %v4770_v27 = vpop.f32.mrf.mxu1 }
 0x1af   : > { %5828 = vst [vmem:[#allocation29_spill] sm:$0xff] %v4770_v27 }
 0x1b1   : > { %1629 = vmatmul.f32.gmra.mxu1 %v4416_v32  ;;  %v4773_v4 = vpop.f32.mrf.mxu0 }
 0x1b2   : > { %5829 = vst [vmem:[#allocation30_spill] sm:$0xff] %v4773_v4 }
 0x1b4   : > { %1450 = vmatmul.f32.gmra.mxu0 %v4416_v32 }
 0x1b6   : > { %v4776_v34 = vpop.f32.mrf.mxu1 }
 0x1b7   : > { %5830 = vst [vmem:[#allocation31_spill] sm:$0xff] %v4776_v34 }
 0x1b9   : > { %1633 = vmatmul.f32.gmra.mxu1 %v4425_v43  ;;  %v4779_v13 = vpop.f32.mrf.mxu0 }
 0x1ba   : > { %5831 = vst [vmem:[#allocation32_spill] sm:$0xff] %v4779_v13 }
 0x1bc   : > { %1454 = vmatmul.f32.gmra.mxu0 %v4425_v43  ;;  %v2385_v43 = vld [vmem:[%s5750_s3] sm:$0xff] }
 0x1be   : > { %v4782_v26 = vpop.f32.mrf.mxu1 }
 0x1bf   : > { %5832 = vst [vmem:[#allocation33_spill] sm:$0xff] %v4782_v26  ;;  %v2523_v26 = vand.u32 4294901760, %v2385_v43 }
 0x1c1   : > { %1637 = vmatmul.f32.gmra.mxu1 %v4434_v52  ;;  %v4785_v23 = vpop.f32.mrf.mxu0  ;;  %2524 = vmatpush.msrb.mxu2 %v2523_v26 }
 0x1c2   : > { %5833 = vst [vmem:[#allocation34_spill] sm:$0xff] %v4785_v23  ;;  %v2867_v23 = vsub.f32 %v2385_v43, %v2523_v26  ;;  %3271 = vmatpush.msra.mxu1 %v2523_v26 }
 0x1c4   : > { %1458 = vmatmul.f32.gmra.mxu0 %v4434_v52 }
 0x1c5   : > { %3052 = vmatpush.msra.mxu0 %v2867_v23 }
 0x1c6   : > { %v4788_v27 = vpop.f32.mrf.mxu1 }
 0x1c7   : > { %5834 = vst [vmem:[#allocation35_spill] sm:$0xff] %v4788_v27  ;;  %v5837_v27 = vand.u32 4294901760, %v4665_v24 }
 0x1c9   : > { %1641 = vmatmul.f32.gmra.mxu1 %v4443_v63  ;;  %v4791_v32 = vpop.f32.mrf.mxu0  ;;  %3530 = vmatpush.msra.mxu2 %v5837_v27 }
 0x1ca   : > { %5835 = vst [vmem:[#allocation36_spill] sm:$0xff] %v4791_v32  ;;  %v2868_v32 = vand.u32 4294901760, %v2867_v23 }
 0x1cc   : > { %1462 = vmatmul.f32.gmra.mxu0 %v4443_v63  ;;  %v2869_v63 = vsub.f32 %v2867_v23, %v2868_v32  ;;  %3534 = vmatpush.msra.mxu2 %v2868_v32 }
 0x1ce   : > { %v4794_v34 = vpop.f32.mrf.mxu1  ;;  %v2870_v13 = vand.u32 4294901760, %v2869_v63 }
 0x1cf   : > { %5836 = vst [vmem:[#allocation37_spill] sm:$0xff] %v4794_v34 }
 0x1d0   : > { %2871 = vmatpush.msrb.mxu3 %v2870_v13 }
 0x1d1   : > { %1645 = vmatmul.f32.gmra.mxu1 %v4452_v10  ;;  %v4800_v52 = vpop.f32.mrf.mxu0 }
 0x1d2   : > { %3711 = vmatpush.msra.mxu3 %v4654_v36 }
 0x1d4   : > { %1466 = vmatmul.f32.gmra.mxu0 %v4452_v10  ;;  %3713 = vmatpush.msra.mxu3 %v2523_v26 }
 0x1d6   : > { %v1586_v34 = vpop.f32.mrf.mxu1 }
 0x1d9   : > { %1649 = vmatmul.f32.gmra.mxu1 %v4459_v22  ;;  %v1407_v4 = vpop.f32.mrf.mxu0 }
 0x1da   : > { %v1408_v43 = vadd.f32 %v1407_v4, %v4479_v11 }
 0x1dc   : > { %1470 = vmatmul.f32.gmra.mxu0 %v4459_v22  ;;  %v1587_v24 = vadd.f32 %v1586_v34, %v1408_v43 }
 0x1de   : > { %v1590_v27 = vpop.f32.mrf.mxu1  ;;  %1745 = vxpose.xlu0.b32.start [1/2] (short) (narrow) %v1587_v24, 16 }
 0x1e1   : > { %1653 = vmatmul.f32.gmra.mxu1 %v4466_v37  ;;  %v1411_v10 = vpop.f32.mrf.mxu0 }
 0x1e2   : > { %v1412_v23 = vadd.f32 %v1411_v10, %v4488_v42 }
 0x1e4   : > { %1474 = vmatmul.f32.gmra.mxu0 %v4466_v37  ;;  %v1591_v32 = vadd.f32 %v1590_v27, %v1412_v23  ;;  %v5838_v27 = vld [vmem:[#allocation4_spill] sm:$0xff]  ;;  %v5839_v23 = vld [vmem:[#allocation2_spill] sm:$0xff] }
 0x1e6   : > { %v1594_v13 = vpop.f32.mrf.mxu1  ;;  %1746 = vxpose.xlu0.b32.end [2/2] (short) (narrow) %v1591_v32, 16 }
 0x1e9   : > { %1657 = vmatmul.f32.gmra.mxu1 %v4473_v51  ;;  %v1415_v36 = vpop.f32.mrf.mxu0 }
 0x1ea   : > { %v1416_v11 = vadd.f32 %v1415_v36, %v4497_v7 }
 0x1ec   : > { %1478 = vmatmul.f32.gmra.mxu0 %v4473_v51  ;;  %v1595_v22 = vadd.f32 %v1594_v13, %v1416_v11  ;;  %v5840_v13 = vld [vmem:[#allocation6_spill] sm:$0xff]  ;;  %v5841_v11 = vld [vmem:[#allocation3_spill] sm:$0xff] }
 0x1ee   : > { %v1598_v34 = vpop.f32.mrf.mxu1  ;;  %1777 = vxpose.xlu1.b32.start [1/2] (short) (narrow) %v1595_v22, 16 }
 0x1f1   : > { %1661 = vmatmul.f32.gmra.mxu1 %v4482_v19  ;;  %v1419_v26 = vpop.f32.mrf.mxu0 }
 0x1f2   : > { %v1420_v42 = vadd.f32 %v1419_v26, %v4506_v46 }
 0x1f4   : > { %1482 = vmatmul.f32.gmra.mxu0 %v4482_v19  ;;  %v1599_v37 = vadd.f32 %v1598_v34, %v1420_v42  ;;  %v5842_v34 = vld [vmem:[#allocation8_spill] sm:$0xff] }
 0x1f6   : > { %v1602_v4 = vpop.f32.mrf.mxu1  ;;  %1778 = vxpose.xlu1.b32.end [2/2] (short) (narrow) %v1599_v37, 16  ;;  %v5843_v37 = vld [vmem:[#allocation5_spill] sm:$0xff] }
 0x1f9   : > { %1665 = vmatmul.f32.gmra.mxu1 %v4491_v49  ;;  %v1423_v63 = vpop.f32.mrf.mxu0 }
 0x1fa   : > { %v1424_v7 = vadd.f32 %v1423_v63, %v4515_v18  ;;  %v5844_v63 = vld [vmem:[#allocation10_spill] sm:$0xff] }
 0x1fc   : > { %1486 = vmatmul.f32.gmra.mxu0 %v4491_v49  ;;  %v1603_v51 = vadd.f32 %v1602_v4, %v1424_v7 }
 0x1fe   : > { %v1606_v43 = vpop.f32.mrf.mxu1  ;;  %1809 = vxpose.xlu2.b32.start [1/2] (short) (narrow) %v1603_v51, 16  ;;  %v4832_v51 = vpop.f32.mrf.mxu3 }
 0x201   : > { %1669 = vmatmul.f32.gmra.mxu1 %v4500_v20  ;;  %v1427_v24 = vpop.f32.mrf.mxu0 }
 0x202   : > { %v1428_v46 = vadd.f32 %v1427_v24, %v5838_v27  ;;  %v5845_v27 = vld [vmem:[#allocation7_spill] sm:$0xff] }
 0x204   : > { %1490 = vmatmul.f32.gmra.mxu0 %v4500_v20  ;;  %v1607_v19 = vadd.f32 %v1606_v43, %v1428_v46 }
 0x206   : > { %v1610_v10 = vpop.f32.mrf.mxu1  ;;  %1810 = vxpose.xlu2.b32.end [2/2] (short) (narrow) %v1607_v19, 16  ;;  %v1006_v19 = vpop.f32.mrf.mxu2 }
 0x209   : > { %1673 = vmatmul.f32.gmra.mxu1 %v5839_v23  ;;  %v1431_v32 = vpop.f32.mrf.mxu0 }
 0x20a   : > { %v1432_v18 = vadd.f32 %v1431_v32, %v5840_v13  ;;  %v4838_v13 = vpop.f32.mrf.mxu3 }
 0x20c   : > { %1494 = vmatmul.f32.gmra.mxu0 %v5839_v23  ;;  %v1611_v49 = vadd.f32 %v1610_v10, %v1432_v18  ;;  %v5846_v10 = vld [vmem:[#allocation12_spill] sm:$0xff] }
 0x20e   : > { %v1614_v36 = vpop.f32.mrf.mxu1  ;;  %1841 = vxpose.xlu0.b32.start [1/2] (short) (narrow) %v1611_v49, 16  ;;  %v5847_v49 = vld [vmem:[#allocation9_spill] sm:$0xff] }
 0x211   : > { %1677 = vmatmul.f32.gmra.mxu1 %v5841_v11  ;;  %v1435_v22 = vpop.f32.mrf.mxu0 }
 0x212   : > { %v1436_v26 = vadd.f32 %v1435_v22, %v5842_v34  ;;  %v1011_v34 = vpop.f32.mrf.mxu2 }
 0x214   : > { %v1615_v42 = vadd.f32 %v1614_v36, %v1436_v26  ;;  %1498 = vmatmul.f32.gmra.mxu0 %v5841_v11  ;;  %v5848_v11 = vld [vmem:[#allocation14_spill] sm:$0xff] }
 0x216   : > { %v1618_v20 = vpop.f32.mrf.mxu1  ;;  %1842 = vxpose.xlu0.b32.end [2/2] (short) (narrow) %v1615_v42, 16 }
 0x219   : > { %1681 = vmatmul.f32.gmra.mxu1 %v5843_v37  ;;  %v1439_v4 = vpop.f32.mrf.mxu0 }
 0x21a   : > { %v1440_v7 = vadd.f32 %v1439_v4, %v5844_v63  ;;  %v5850_v63 = vld [vmem:[#allocation16_spill] sm:$0xff] }
 0x21c   : > { %1502 = vmatmul.f32.gmra.mxu0 %v5843_v37  ;;  %v1619_v43 = vadd.f32 %v1618_v20, %v1440_v7  ;;  %v4843_v20 = vpop.f32.mrf.mxu3  ;;  %v5849_v37 = vld [vmem:[#allocation11_spill] sm:$0xff] }
 0x21e   : > { %v1622_v24 = vpop.f32.mrf.mxu1  ;;  %1873 = vxpose.xlu1.b32.start [1/2] (short) (narrow) %v1619_v43, 16 }
 0x221   : > { %1685 = vmatmul.f32.gmra.mxu1 %v5845_v27  ;;  %v1443_v46 = vpop.f32.mrf.mxu0 }
 0x222   : > { %v1444_v23 = vadd.f32 %v1443_v46, %v5846_v10  ;;  %v5851_v46 = vld [vmem:[#allocation13_spill] sm:$0xff] }
 0x224   : > { %v1623_v32 = vadd.f32 %v1622_v24, %v1444_v23  ;;  %1506 = vmatmul.f32.gmra.mxu0 %v5845_v27  ;;  %v1016_v27 = vpop.f32.mrf.mxu2  ;;  %v4849_v10 = vpop.f32.mrf.mxu3 }
 0x226   : > { %v1626_v18 = vpop.f32.mrf.mxu1  ;;  %1874 = vxpose.xlu1.b32.end [2/2] (short) (narrow) %v1623_v32, 16  ;;  %v5852_v32 = vld [vmem:[#allocation17_spill] sm:$0xff] }
 0x229   : > { %1689 = vmatmul.f32.gmra.mxu1 %v5847_v49  ;;  %v1447_v36 = vpop.f32.mrf.mxu0 }
 0x22a   : > { %v1448_v22 = vadd.f32 %v1447_v36, %v5848_v11 }
 0x22c   : > { %1510 = vmatmul.f32.gmra.mxu0 %v5847_v49  ;;  %v1627_v26 = vadd.f32 %v1626_v18, %v1448_v22  ;;  %v1021_v11 = vpop.f32.mrf.mxu2  ;;  %v5853_v22 = vld [vmem:[#allocation15_spill] sm:$0xff] }
 0x22e   : > { %v1630_v42 = vpop.f32.mrf.mxu1  ;;  %1905 = vxpose.xlu2.b32.start [1/2] (short) (narrow) %v1627_v26, 16 }
 0x231   : > { %1693 = vmatmul.f32.gmra.mxu1 %v5849_v37  ;;  %v1451_v4 = vpop.f32.mrf.mxu0 }
 0x232   : > { %v1452_v7 = vadd.f32 %v1451_v4, %v5850_v63 }
 0x234   : > { %v1631_v43 = vadd.f32 %v1630_v42, %v1452_v7  ;;  %1514 = vmatmul.f32.gmra.mxu0 %v5849_v37  ;;  %v4855_v37 = vpop.f32.mrf.mxu3 }
 0x236   : > { %v1634_v24 = vpop.f32.mrf.mxu1  ;;  %1906 = vxpose.xlu2.b32.end [2/2] (short) (narrow) %v1631_v43, 16  ;;  %v1026_v43 = vpop.f32.mrf.mxu2 }
 0x239   : > { %1697 = vmatmul.f32.gmra.mxu1 %v5851_v46  ;;  %v1455_v23 = vpop.f32.mrf.mxu0 }
 0x23a   : > { %v1456_v18 = vadd.f32 %v1455_v23, %v5852_v32 }
 0x23c   : > { %1518 = vmatmul.f32.gmra.mxu0 %v5851_v46  ;;  %v1635_v49 = vadd.f32 %v1634_v24, %v1456_v18  ;;  %v4861_v23 = vpop.f32.mrf.mxu3 }
 0x23e   : > { %v1638_v36 = vpop.f32.mrf.mxu1  ;;  %1937 = vxpose.xlu0.b32.start [1/2] (short) (narrow) %v1635_v49, 16 }
 0x241   : > { %1701 = vmatmul.f32.gmra.mxu1 %v5853_v22  ;;  %v1459_v26 = vpop.f32.mrf.mxu0 }
 0x242   : > { %v1460_v42 = vadd.f32 %v1459_v26, %v4596_v6  ;;  %v809_v6 = vadd.f32 %v4613_v2, %v4621_v17 }
 0x244   : > { %v1639_v4 = vadd.f32 %v1638_v36, %v1460_v42  ;;  %1522 = vmatmul.f32.gmra.mxu0 %v5853_v22  ;;  %v1007_v36 = vadd.f32 %v1006_v19, %v809_v6  ;;  %v1031_v22 = vpop.f32.mrf.mxu2 }
 0x246   : > { %v1642_v63 = vpop.f32.mrf.mxu1  ;;  %1938 = vxpose.xlu0.b32.end [2/2] (short) (narrow) %v1639_v4, 16  ;;  %v1243_v42 = vadd.f32 %v4832_v51, %v1007_v36  ;;  %v813_v4 = vadd.f32 %v4626_v39, %v4632_v38 }
 0x249   : > { %1705 = vmatmul.f32.gmra.mxu1 %v4581_v12  ;;  %v1463_v7 = vpop.f32.mrf.mxu0 }
 0x24a   : > { %v1464_v24 = vadd.f32 %v1463_v7, %v4605_v57 }
 0x24c   : > { %1526 = vmatmul.f32.gmra.mxu0 %v4581_v12  ;;  %v1643_v46 = vadd.f32 %v1642_v63, %v1464_v24  ;;  %v4868_v12 = vpop.f32.mrf.mxu3  ;;  %v1012_v63 = vadd.f32 %v1011_v34, %v813_v4  ;;  %v1036_v7 = vpop.f32.mrf.mxu2  ;;  %v817_v24 = vadd.f32 %v4637_v60, %v4643_v21 }
 0x24e   : > { %v1646_v32 = vpop.f32.mrf.mxu1  ;;  %1969 = vxpose.xlu1.b32.start [1/2] (short) (narrow) %v1643_v46, 16  ;;  %v1017_v46 = vadd.f32 %v1016_v27, %v817_v24 }
 0x250   : > { %v1255_v34 = vadd.f32 %v4843_v20, %v1017_v46  ;;  %v5854_v20 = vld [vmem:[#allocation20_spill] sm:$0xff] }
 0x251   : > { %1709 = vmatmul.f32.gmra.mxu1 %v4590_v56  ;;  %v1467_v18 = vpop.f32.mrf.mxu0 }
 0x252   : > { %v1468_v49 = vadd.f32 %v1467_v18, %v4616_v28 }
 0x254   : > { %v1647_v26 = vadd.f32 %v1646_v32, %v1468_v49  ;;  %1530 = vmatmul.f32.gmra.mxu0 %v4590_v56  ;;  %v1249_v56 = vadd.f32 %v4838_v13, %v1012_v63  ;;  %v4879_v51 = vpop.f32.mrf.mxu3  ;;  %v821_v13 = vadd.f32 %v4648_v1, %v4659_v9  ;;  %v1041_v6 = vpop.f32.mrf.mxu2 }
 0x256   : > { %v1650_v57 = vpop.f32.mrf.mxu1  ;;  %1970 = vxpose.xlu1.b32.end [2/2] (short) (narrow) %v1647_v26, 16  ;;  %v1022_v49 = vadd.f32 %v1021_v11, %v821_v13  ;;  %v825_v26 = vadd.f32 %v5854_v20, %v4680_v45  ;;  %v5856_v45 = vld [vmem:[#allocation19_spill] sm:$0xff] }
 0x258   : > { %v1027_v4 = vadd.f32 %v1026_v43, %v825_v26 }
 0x259   : > { %1713 = vmatmul.f32.gmra.mxu1 %v4599_v29  ;;  %v1471_v2 = vpop.f32.mrf.mxu0 }
 0x25a   : > { %v1472_v17 = vadd.f32 %v1471_v2, %v1243_v42 }
 0x25c   : > { %1534 = vmatmul.f32.gmra.mxu0 %v4599_v29  ;;  %v1651_v28 = vadd.f32 %v1650_v57, %v1472_v17  ;;  %v4886_v18 = vpop.f32.mrf.mxu3  ;;  %v5855_v57 = vld [vmem:[#allocation18_spill] sm:$0xff]  ;;  %v4893_v9 = vpop.f32.mrf.mxu2  ;;  %v1267_v17 = vadd.f32 %v4855_v37, %v1027_v4  ;;  %v833_v37 = vadd.f32 %v4694_v53, %v4697_v35  ;;  %v837_v35 = vadd.f32 %v4699_v31, %v4702_v58 }
 0x25e   : > { %v1654_v19 = vpop.f32.mrf.mxu1  ;;  %2001 = vxpose.xlu2.b32.start [1/2] (short) (narrow) %v1651_v28, 16  ;;  %v1042_v20 = vadd.f32 %v1041_v6, %v837_v35 }
 0x260   : > { %v1285_v58 = vadd.f32 %v4879_v51, %v1042_v20 }
 0x261   : > { %1717 = vmatmul.f32.gmra.mxu1 %v4608_v59  ;;  %v1475_v39 = vpop.f32.mrf.mxu0 }
 0x262   : > { %v1476_v38 = vadd.f32 %v1475_v39, %v1249_v56 }
 0x264   : > { %v1655_v32 = vadd.f32 %v1654_v19, %v1476_v38  ;;  %1538 = vmatmul.f32.gmra.mxu0 %v4608_v59  ;;  %v1261_v59 = vadd.f32 %v4849_v10, %v1022_v49  ;;  %v4896_v11 = vpop.f32.mrf.mxu3  ;;  %v829_v10 = vadd.f32 %v4685_v3, %v4691_v30  ;;  %v4902_v56 = vpop.f32.mrf.mxu2 }
 0x266   : > { %v1658_v29 = vpop.f32.mrf.mxu1  ;;  %2002 = vxpose.xlu2.b32.end [2/2] (short) (narrow) %v1655_v32, 16  ;;  %v1032_v19 = vadd.f32 %v1031_v22, %v829_v10  ;;  %v1037_v32 = vadd.f32 %v1036_v7, %v833_v37 }
 0x268   : > { %v1273_v38 = vadd.f32 %v4861_v23, %v1032_v19  ;;  %v1279_v53 = vadd.f32 %v4868_v12, %v1037_v32 }
 0x269   : > { %1721 = vmatmul.f32.gmra.mxu1 %v4619_v16  ;;  %v1479_v60 = vpop.f32.mrf.mxu0 }
 0x26a   : > { %v1480_v21 = vadd.f32 %v1479_v60, %v1255_v34 }
 0x26c   : > { %1542 = vmatmul.f32.gmra.mxu0 %v4619_v16  ;;  %v1659_v27 = vadd.f32 %v1658_v29, %v1480_v21  ;;  %v4905_v39 = vpop.f32.mrf.mxu3  ;;  %v4915_v60 = vpop.f32.mrf.mxu2 }
 0x26e   : > { %v1662_v36 = vpop.f32.mrf.mxu1  ;;  %2033 = vxpose.xlu0.b32.start [1/2] (short) (narrow) %v1659_v27, 16 }
 0x271   : > { %1725 = vmatmul.f32.gmra.mxu1 %v5855_v57  ;;  %v1483_v1 = vpop.f32.mrf.mxu0 }
 0x272   : > { %v1484_v42 = vadd.f32 %v1483_v1, %v1261_v59 }
 0x274   : > { %v1663_v2 = vadd.f32 %v1662_v36, %v1484_v42  ;;  %1546 = vmatmul.f32.gmra.mxu0 %v5855_v57  ;;  %v4923_v7 = vpop.f32.mrf.mxu3  ;;  %v841_v42 = vadd.f32 %v4704_v50, %v4707_v41  ;;  %v4936_v6 = vpop.f32.mrf.mxu2 }
 0x276   : > { %v1666_v16 = vpop.f32.mrf.mxu1  ;;  %2034 = vxpose.xlu0.b32.end [2/2] (short) (narrow) %v1663_v2, 16  ;;  %v1047_v51 = vadd.f32 %v4893_v9, %v841_v42 }
 0x279   : > { %1729 = vmatmul.f32.gmra.mxu1 %v5856_v45  ;;  %v1487_v63 = vpop.f32.mrf.mxu0 }
 0x27a   : > { %v1488_v28 = vadd.f32 %v1487_v63, %v1267_v17 }
 0x27c   : > { %1550 = vmatmul.f32.gmra.mxu0 %v5856_v45  ;;  %v1667_v43 = vadd.f32 %v1666_v16, %v1488_v28  ;;  %v4941_v10 = vpop.f32.mrf.mxu3 }
 0x27e   : > { %v1670_v24 = vpop.f32.mrf.mxu1  ;;  %2065 = vxpose.xlu1.b32.start [1/2] (short) (narrow) %v1667_v43, 16  ;;  %v845_v43 = vadd.f32 %v4710_v8, %v4713_v55 }
 0x280   : > { %v1052_v32 = vadd.f32 %v4902_v56, %v845_v43 }
 0x281   : > { %1733 = vmatmul.f32.gmra.mxu1 %v4657_v44  ;;  %v1491_v30 = vpop.f32.mrf.mxu0 }
 0x282   : > { %v1492_v3 = vadd.f32 %v1491_v30, %v1273_v38  ;;  %v1761_v46 = vpop.trf.xlu0  ;;  %v1291_v38 = vadd.f32 %v4886_v18, %v1047_v51 }
 0x283   : > { %v2388_v22 = vsel %vm256_vm0, %v1761_v46, 0 }
 0x284   : > { %v1671_v29 = vadd.f32 %v1670_v24, %v1492_v3  ;;  %v4912_v34 = vand.u32 4294901760, %v2388_v22  ;;  %1554 = vmatmul.f32.gmra.mxu0 %v4657_v44 }
 0x286   : > { %v1674_v13 = vpop.f32.mrf.mxu1  ;;  %v2526_v23 = vsub.f32 %v2388_v22, %v4912_v34  ;;  %2066 = vxpose.xlu1.b32.end [2/2] (short) (narrow) %v1671_v29, 16  ;;  %2873 = vmatmul.f32.vlgmr.msrb.gmra.mxu3 %v4912_v34 }
 0x288   : > { %v2527_v21 = vand.u32 4294901760, %v2526_v23 }
 0x289   : > { %1737 = vmatmul.f32.gmra.mxu1 %v4678_v5  ;;  %v1495_v49 = vpop.f32.mrf.mxu0 }
 0x28a   : > { %v2528_v44 = vsub.f32 %v2526_v23, %v2527_v21  ;;  %v1496_v27 = vadd.f32 %v1495_v49, %v1279_v53  ;;  %v1762_v36 = vpop.trf.xlu0  ;;  %v4962_v53 = vpop.f32.mrf.mxu3  ;;  %v849_v49 = vadd.f32 %v4716_v0, %v4719_v62 }
 0x28b   : > { %v2391_v59 = vsel %vm256_vm0, %v1762_v36, 0 }
 0x28c   : > { %v2529_v26 = vand.u32 4294901760, %v2528_v44  ;;  %v4926_v57 = vand.u32 4294901760, %v2391_v59  ;;  %1558 = vmatmul.f32.gmra.mxu0 %v4678_v5  ;;  %v1675_v12 = vadd.f32 %v1674_v13, %v1496_v27  ;;  %v1297_v44 = vadd.f32 %v4896_v11, %v1052_v32 }
 0x28e   : > { %v1678_v1 = vpop.f32.mrf.mxu1  ;;  %v4930_v31 = vsub.f32 %v2391_v59, %v4926_v57  ;;  %2097 = vxpose.xlu2.b32.start [1/2] (short) (narrow) %v1675_v12, 16  ;;  %2530 = vmatmul.f32.vlgmr.msrb.gmra.mxu2 %v2529_v26  ;;  %v1057_v12 = vadd.f32 %v4915_v60, %v849_v49  ;;  %v5857_v60 = vld [vmem:[#allocation21_spill] sm:$0xff] }
 0x28f   : > { %2877 = vmatmul.f32.gmra.mxu3 %v4926_v57 }
 0x290   : > { %v2535_v4 = vand.u32 4294901760, %v4930_v31 }
 0x291   : > { %1741 = vmatmul.f32.gmra.mxu1 %v4689_v48  ;;  %v1499_v5 = vpop.f32.mrf.mxu0 }
 0x292   : > { %v1500_v2 = vadd.f32 %v1499_v5, %v1285_v58  ;;  %v1793_v16 = vpop.trf.xlu1  ;;  %v2536_v17 = vsub.f32 %v4930_v31, %v2535_v4  ;;  %v1303_v5 = vadd.f32 %v4905_v39, %v1057_v12 }
 0x293   : > { %v2394_v45 = vsel %vm256_vm0, %v1793_v16, 0 }
 0x294   : > { %v1679_v63 = vadd.f32 %v1678_v1, %v1500_v2  ;;  %v4945_v28 = vand.u32 4294901760, %v2394_v45  ;;  %1562 = vmatmul.f32.gmra.mxu0 %v4689_v48  ;;  %v2537_v50 = vand.u32 4294901760, %v2536_v17  ;;  %v4954_v48 = vpop.f32.mrf.mxu2  ;;  %v853_v2 = vadd.f32 %v5857_v60, %v4725_v14 }
 0x296   : > { %v1682_v41 = vpop.f32.mrf.mxu1  ;;  %v2542_v19 = vsub.f32 %v2394_v45, %v4945_v28  ;;  %2098 = vxpose.xlu2.b32.end [2/2] (short) (narrow) %v1679_v63, 16  ;;  %2538 = vmatmul.f32.gmra.mxu2 %v2537_v50  ;;  %v1062_v51 = vadd.f32 %v4936_v6, %v853_v2 }
 0x297   : > { %2881 = vmatmul.f32.gmra.mxu3 %v4945_v28  ;;  %v1825_v24 = vpop.trf.xlu2 }
 0x298   : > { %v2543_v9 = vand.u32 4294901760, %v2542_v19  ;;  %v2400_v30 = vsel %vm256_vm0, %v1825_v24, 0  ;;  %v1309_v14 = vadd.f32 %v4923_v7, %v1062_v51  ;;  %v5858_v24 = vld [vmem:[#allocation22_spill] sm:$0xff] }
 0x299   : > { %3275 = vmatmul.f32.vlgmr.msra.gmra.mxu1 %v2527_v21  ;;  %v1503_v37 = vpop.f32.mrf.mxu0  ;;  %v4960_v55 = vand.u32 4294901760, %v2400_v30 }
 0x29a   : > { %v1504_v3 = vadd.f32 %v1503_v37, %v1291_v38  ;;  %v1794_v46 = vpop.trf.xlu1  ;;  %v2544_v22 = vsub.f32 %v2542_v19, %v2543_v9  ;;  %v857_v38 = vadd.f32 %v5858_v24, %v4731_v15 }
 0x29b   : > { %v2397_v29 = vsel %vm256_vm0, %v1794_v46, 0  ;;  %v4970_v27 = vsub.f32 %v2400_v30, %v4960_v55 }
 0x29c   : > { %v4958_v8 = vand.u32 4294901760, %v2397_v29  ;;  %3055 = vmatmul.f32.vlgmr.msra.gmra.mxu0 %v2526_v23  ;;  %v1683_v18 = vadd.f32 %v1682_v41, %v1504_v3  ;;  %v2545_v13 = vand.u32 4294901760, %v2544_v22  ;;  %v1071_v1 = vpop.f32.mrf.mxu2  ;;  %v1067_v46 = vadd.f32 %v4954_v48, %v857_v38 }
 0x29d   : > { %v2559_v0 = vand.u32 4294901760, %v4970_v27 }
 0x29e   : > { %v1686_v35 = vpop.f32.mrf.mxu1  ;;  %v2550_v21 = vsub.f32 %v2397_v29, %v4958_v8  ;;  %2129 = vxpose.xlu0.b32.start [1/2] (short) (narrow) %v1683_v18, 16  ;;  %2546 = vmatmul.f32.gmra.mxu2 %v2545_v13  ;;  %v1315_v18 = vadd.f32 %v4941_v10, %v1067_v46  ;;  %v5859_v13 = vld [vmem:[#allocation23_spill] sm:$0xff] }
 0x29f   : > { %2885 = vmatmul.f32.gmra.mxu3 %v4958_v8  ;;  %v1826_v56 = vpop.trf.xlu2 }
 0x2a0   : > { %v2551_v23 = vand.u32 4294901760, %v2550_v21  ;;  %v2403_v59 = vsel %vm256_vm0, %v1826_v56, 0 }
 0x2a1   : > { %3281 = vmatmul.f32.gmra.mxu1 %v2535_v4  ;;  %v1507_v36 = vpop.f32.mrf.mxu0  ;;  %v4976_v58 = vand.u32 4294901760, %v2403_v59  ;;  %v4978_v4 = vpop.f32.mrf.mxu3 }
 0x2a2   : > { %v1508_v20 = vadd.f32 %v1507_v36, %v1297_v44  ;;  %v2552_v26 = vsub.f32 %v2550_v21, %v2551_v23 }
 0x2a3   : > { %v4985_v16 = vsub.f32 %v2403_v59, %v4976_v58 }
 0x2a4   : > { %v1687_v62 = vadd.f32 %v1686_v35, %v1508_v20  ;;  %3060 = vmatmul.f32.gmra.mxu0 %v4930_v31  ;;  %v2553_v11 = vand.u32 4294901760, %v2552_v26  ;;  %v2560_v31 = vsub.f32 %v4970_v27, %v2559_v0  ;;  %v1076_v39 = vpop.f32.mrf.mxu2  ;;  %v861_v35 = vadd.f32 %v5859_v13, %v4737_v25 }
 0x2a5   : > { %v2567_v63 = vand.u32 4294901760, %v4985_v16 }
 0x2a6   : > { %v1690_v42 = vpop.f32.mrf.mxu1  ;;  %2130 = vxpose.xlu0.b32.end [2/2] (short) (narrow) %v1687_v62, 16  ;;  %2554 = vmatmul.f32.gmra.mxu2 %v2553_v11  ;;  %v2561_v41 = vand.u32 4294901760, %v2560_v31  ;;  %v1072_v20 = vadd.f32 %v1071_v1, %v861_v35  ;;  %v5860_v11 = vld [vmem:[#allocation24_spill] sm:$0xff]  ;;  %v5862_v35 = vld [vmem:[#allocation26_spill] sm:$0xff] }
 0x2a7   : > { %2889 = vmatmul.f32.gmra.mxu3 %v4960_v55 }
 0x2a9   : > { %3287 = vmatmul.f32.gmra.mxu1 %v2543_v9  ;;  %v1511_v17 = vpop.f32.mrf.mxu0  ;;  %v2568_v9 = vsub.f32 %v4985_v16, %v2567_v63  ;;  %v4995_v6 = vpop.f32.mrf.mxu3 }
 0x2aa   : > { %v1512_v45 = vadd.f32 %v1511_v17, %v1303_v5 }
 0x2ab   : > { %v2569_v7 = vand.u32 4294901760, %v2568_v9 }
 0x2ac   : > { %3065 = vmatmul.f32.gmra.mxu0 %v2542_v19  ;;  %v1691_v50 = vadd.f32 %v1690_v42, %v1512_v45  ;;  %v1081_v49 = vpop.f32.mrf.mxu2  ;;  %v865_v42 = vadd.f32 %v5860_v11, %v4743_v33 }
 0x2ae   : > { %v1694_v43 = vpop.f32.mrf.mxu1  ;;  %2161 = vxpose.xlu1.b32.start [1/2] (short) (narrow) %v1691_v50, 16  ;;  %2562 = vmatmul.f32.gmra.mxu2 %v2561_v41  ;;  %v1077_v45 = vadd.f32 %v1076_v39, %v865_v42 }
 0x2af   : > { %2893 = vmatmul.f32.gmra.mxu3 %v4976_v58 }
 0x2b0   : > { %v1327_v39 = vadd.f32 %v4978_v4, %v1077_v45 }
 0x2b1   : > { %3293 = vmatmul.f32.gmra.mxu1 %v2551_v23  ;;  %v1515_v37 = vpop.f32.mrf.mxu0  ;;  %v5006_v36 = vpop.f32.mrf.mxu3 }
 0x2b2   : > { %v1516_v19 = vadd.f32 %v1515_v37, %v1309_v14  ;;  %v1857_v30 = vpop.trf.xlu0 }
 0x2b3   : > { %v2406_v3 = vsel %vm256_vm0, %v1857_v30, 0 }
 0x2b4   : > { %v1695_v22 = vadd.f32 %v1694_v43, %v1516_v19  ;;  %v4999_v32 = vand.u32 4294901760, %v2406_v3  ;;  %3070 = vmatmul.f32.gmra.mxu0 %v2550_v21  ;;  %v1086_v60 = vpop.f32.mrf.mxu2 }
 0x2b6   : > { %v1698_v29 = vpop.f32.mrf.mxu1  ;;  %v2574_v15 = vsub.f32 %v2406_v3, %v4999_v32  ;;  %2162 = vxpose.xlu1.b32.end [2/2] (short) (narrow) %v1695_v22, 16  ;;  %2570 = vmatmul.f32.gmra.mxu2 %v2569_v7 }
 0x2b7   : > { %2897 = vmatmul.f32.gmra.mxu3 %v4999_v32 }
 0x2b8   : > { %v2575_v56 = vand.u32 4294901760, %v2574_v15 }
 0x2b9   : > { %3299 = vmatmul.f32.gmra.mxu1 %v2559_v0  ;;  %v1519_v48 = vpop.f32.mrf.mxu0  ;;  %v1321_v0 = vadd.f32 %v4962_v53, %v1072_v20  ;;  %v5021_v53 = vpop.f32.mrf.mxu3 }
 0x2ba   : > { %v1520_v44 = vadd.f32 %v1519_v48, %v1315_v18  ;;  %v1858_v23 = vpop.trf.xlu0  ;;  %v2576_v21 = vsub.f32 %v2574_v15, %v2575_v56 }
 0x2bb   : > { %v2409_v59 = vsel %vm256_vm0, %v1858_v23, 0 }
 0x2bc   : > { %v5009_v26 = vand.u32 4294901760, %v2409_v59  ;;  %3075 = vmatmul.f32.gmra.mxu0 %v4970_v27  ;;  %v1699_v10 = vadd.f32 %v1698_v29, %v1520_v44  ;;  %v2577_v12 = vand.u32 4294901760, %v2576_v21  ;;  %v1091_v22 = vpop.f32.mrf.mxu2 }
 0x2be   : > { %v1702_v62 = vpop.f32.mrf.mxu1  ;;  %v2582_v25 = vsub.f32 %v2409_v59, %v5009_v26  ;;  %2193 = vxpose.xlu2.b32.start [1/2] (short) (narrow) %v1699_v10, 16  ;;  %2578 = vmatmul.f32.gmra.mxu2 %v2577_v12 }
 0x2bf   : > { %2901 = vmatmul.f32.gmra.mxu3 %v5009_v26 }
 0x2c0   : > { %v2583_v5 = vand.u32 4294901760, %v2582_v25 }
 0x2c1   : > { %3305 = vmatmul.f32.gmra.mxu1 %v2567_v63  ;;  %v1523_v1 = vpop.f32.mrf.mxu0  ;;  %v5861_v63 = vld [vmem:[#allocation25_spill] sm:$0xff]  ;;  %v1350_v48 = vpop.f32.mrf.mxu3 }
 0x2c2   : > { %v1524_v2 = vadd.f32 %v1523_v1, %v1321_v0  ;;  %v1889_v27 = vpop.trf.xlu1  ;;  %v2584_v31 = vsub.f32 %v2582_v25, %v2583_v5  ;;  %v869_v14 = vadd.f32 %v5861_v63, %v4749_v40  ;;  %v5863_v1 = vld [vmem:[#allocation27_spill] sm:$0xff] }
 0x2c3   : > { %v2412_v17 = vsel %vm256_vm0, %v1889_v27, 0 }
 0x2c4   : > { %v1703_v51 = vadd.f32 %v1702_v62, %v1524_v2  ;;  %v5018_v50 = vand.u32 4294901760, %v2412_v17  ;;  %3080 = vmatmul.f32.gmra.mxu0 %v4985_v16  ;;  %v2585_v41 = vand.u32 4294901760, %v2584_v31  ;;  %v1082_v3 = vadd.f32 %v1081_v49, %v869_v14 }
 0x2c5   : > { %v877_v2 = vadd.f32 %v5863_v1, %v4761_v54 }
 0x2c6   : > { %v1706_v43 = vpop.f32.mrf.mxu1  ;;  %v2590_v33 = vsub.f32 %v2412_v17, %v5018_v50  ;;  %2194 = vxpose.xlu2.b32.end [2/2] (short) (narrow) %v1703_v51, 16  ;;  %2586 = vmatmul.f32.gmra.mxu2 %v2585_v41  ;;  %v1333_v44 = vadd.f32 %v4995_v6, %v1082_v3  ;;  %v1096_v6 = vpop.f32.mrf.mxu2 }
 0x2c7   : > { %2905 = vmatmul.f32.gmra.mxu3 %v5018_v50  ;;  %v1921_v24 = vpop.trf.xlu2  ;;  %v1092_v45 = vadd.f32 %v1091_v22, %v877_v2 }
 0x2c8   : > { %v2591_v38 = vand.u32 4294901760, %v2590_v33  ;;  %v2418_v16 = vsel %vm256_vm0, %v1921_v24, 0 }
 0x2c9   : > { %3311 = vmatmul.f32.gmra.mxu1 %v2575_v56  ;;  %v1527_v9 = vpop.f32.mrf.mxu0  ;;  %v5032_v40 = vand.u32 4294901760, %v2418_v16  ;;  %v873_v56 = vadd.f32 %v5862_v35, %v4755_v47  ;;  %v1356_v27 = vpop.f32.mrf.mxu3  ;;  %v1345_v54 = vadd.f32 %v5021_v53, %v1092_v45 }
 0x2ca   : > { %v1528_v37 = vadd.f32 %v1527_v9, %v1327_v39  ;;  %v1890_v19 = vpop.trf.xlu1  ;;  %v2592_v30 = vsub.f32 %v2590_v33, %v2591_v38 }
 0x2cb   : > { %v2415_v46 = vsel %vm256_vm0, %v1890_v19, 0  ;;  %v1087_v12 = vadd.f32 %v1086_v60, %v873_v56 }
 0x2cc   : > { %v5030_v7 = vand.u32 4294901760, %v2415_v46  ;;  %3085 = vmatmul.f32.gmra.mxu0 %v2574_v15  ;;  %v1707_v29 = vadd.f32 %v1706_v43, %v1528_v37  ;;  %v2593_v18 = vand.u32 4294901760, %v2592_v30  ;;  %v5040_v15 = vsub.f32 %v2418_v16, %v5032_v40 }
 0x2ce   : > { %v1710_v4 = vpop.f32.mrf.mxu1  ;;  %v2598_v13 = vsub.f32 %v2415_v46, %v5030_v7  ;;  %2225 = vxpose.xlu0.b32.start [1/2] (short) (narrow) %v1707_v29, 16  ;;  %2594 = vmatmul.f32.gmra.mxu2 %v2593_v18  ;;  %v2607_v62 = vand.u32 4294901760, %v5040_v15  ;;  %v1101_v24 = vpop.f32.mrf.mxu2  ;;  %v5865_v29 = vld [vmem:[#allocation30_spill] sm:$0xff]  ;;  %v5866_v18 = vld [vmem:[#allocation29_spill] sm:$0xff] }
 0x2cf   : > { %2909 = vmatmul.f32.gmra.mxu3 %v5030_v7  ;;  %v1922_v49 = vpop.trf.xlu2 }
 0x2d0   : > { %v2599_v23 = vand.u32 4294901760, %v2598_v13  ;;  %v2421_v59 = vsel %vm256_vm0, %v1922_v49, 0 }
 0x2d1   : > { %3317 = vmatmul.f32.gmra.mxu1 %v2583_v5  ;;  %v1531_v21 = vpop.f32.mrf.mxu0  ;;  %v5044_v0 = vand.u32 4294901760, %v2421_v59  ;;  %v1339_v5 = vadd.f32 %v5006_v36, %v1087_v12  ;;  %v5864_v36 = vld [vmem:[#allocation28_spill] sm:$0xff] }
 0x2d2   : > { %v1532_v20 = vadd.f32 %v1531_v21, %v1333_v44  ;;  %v2600_v10 = vsub.f32 %v2598_v13, %v2599_v23  ;;  %v881_v14 = vadd.f32 %v5864_v36, %v4767_v61 }
 0x2d3   : > { %v5051_v60 = vsub.f32 %v2421_v59, %v5044_v0 }
 0x2d4   : > { %v1711_v47 = vadd.f32 %v1710_v4, %v1532_v20  ;;  %3090 = vmatmul.f32.gmra.mxu0 %v2582_v25  ;;  %v2601_v11 = vand.u32 4294901760, %v2600_v10  ;;  %v2608_v25 = vsub.f32 %v5040_v15, %v2607_v62  ;;  %v1097_v19 = vadd.f32 %v1096_v6, %v881_v14  ;;  %v5868_v6 = vld [vmem:[#allocation31_spill] sm:$0xff]  ;;  %v5870_v14 = vld [vmem:[#allocation33_spill] sm:$0xff] }
 0x2d5   : > { %v2615_v51 = vand.u32 4294901760, %v5051_v60  ;;  %v885_v4 = vadd.f32 %v5866_v18, %v5865_v29 }
 0x2d6   : > { %v1714_v42 = vpop.f32.mrf.mxu1  ;;  %2226 = vxpose.xlu0.b32.end [2/2] (short) (narrow) %v1711_v47, 16  ;;  %2602 = vmatmul.f32.gmra.mxu2 %v2601_v11  ;;  %v2609_v43 = vand.u32 4294901760, %v2608_v25  ;;  %v1351_v61 = vadd.f32 %v1350_v48, %v1097_v19  ;;  %v1106_v49 = vpop.f32.mrf.mxu2 }
 0x2d7   : > { %2913 = vmatmul.f32.gmra.mxu3 %v5032_v40  ;;  %v2616_v39 = vsub.f32 %v5051_v60, %v2615_v51  ;;  %v1102_v59 = vadd.f32 %v1101_v24, %v885_v4 }
 0x2d9   : > { %3323 = vmatmul.f32.gmra.mxu1 %v2591_v38  ;;  %v1535_v31 = vpop.f32.mrf.mxu0  ;;  %v2617_v46 = vand.u32 4294901760, %v2616_v39 }
 0x2da   : > { %v1536_v17 = vadd.f32 %v1535_v31, %v1339_v5 }
 0x2dc   : > { %3095 = vmatmul.f32.gmra.mxu0 %v2590_v33  ;;  %v1715_v41 = vadd.f32 %v1714_v42, %v1536_v17  ;;  %v1362_v33 = vpop.f32.mrf.mxu3  ;;  %v5867_v42 = vld [vmem:[#allocation32_spill] sm:$0xff] }
 0x2dd   : > { %v889_v5 = vadd.f32 %v5868_v6, %v5867_v42 }
 0x2de   : > { %v1718_v63 = vpop.f32.mrf.mxu1  ;;  %2257 = vxpose.xlu1.b32.start [1/2] (short) (narrow) %v1715_v41, 16  ;;  %2610 = vmatmul.f32.gmra.mxu2 %v2609_v43  ;;  %v1111_v41 = vpop.f32.mrf.mxu2 }
 0x2df   : > { %2917 = vmatmul.f32.gmra.mxu3 %v5044_v0  ;;  %v1107_v45 = vadd.f32 %v1106_v49, %v889_v5 }
 0x2e1   : > { %3329 = vmatmul.f32.gmra.mxu1 %v2599_v23  ;;  %v1539_v38 = vpop.f32.mrf.mxu0 }
 0x2e2   : > { %v1540_v9 = vadd.f32 %v1539_v38, %v1345_v54  ;;  %v1953_v16 = vpop.trf.xlu0 }
 0x2e3   : > { %v2424_v37 = vsel %vm256_vm0, %v1953_v16, 0 }
 0x2e4   : > { %v1719_v30 = vadd.f32 %v1718_v63, %v1540_v9  ;;  %v5061_v3 = vand.u32 4294901760, %v2424_v37  ;;  %3100 = vmatmul.f32.gmra.mxu0 %v2598_v13  ;;  %v1368_v48 = vpop.f32.mrf.mxu3  ;;  %v1363_v9 = vadd.f32 %v1362_v33, %v1107_v45 }
 0x2e6   : > { %v1722_v53 = vpop.f32.mrf.mxu1  ;;  %v2622_v22 = vsub.f32 %v2424_v37, %v5061_v3  ;;  %2258 = vxpose.xlu1.b32.end [2/2] (short) (narrow) %v1719_v30, 16  ;;  %2618 = vmatmul.f32.gmra.mxu2 %v2617_v46  ;;  %v1116_v33 = vpop.f32.mrf.mxu2 }
 0x2e7   : > { %2921 = vmatmul.f32.gmra.mxu3 %v5061_v3 }
 0x2e8   : > { %v2623_v35 = vand.u32 4294901760, %v2622_v22 }
 0x2e9   : > { %3335 = vmatmul.f32.gmra.mxu1 %v2607_v62  ;;  %v1543_v56 = vpop.f32.mrf.mxu0  ;;  %v1357_v62 = vadd.f32 %v1356_v27, %v1102_v59 }
 0x2ea   : > { %v1544_v44 = vadd.f32 %v1543_v56, %v1351_v61  ;;  %v1954_v23 = vpop.trf.xlu0  ;;  %v2624_v21 = vsub.f32 %v2622_v22, %v2623_v35 }
 0x2eb   : > { %v2427_v13 = vsel %vm256_vm0, %v1954_v23, 0  ;;  %v5872_v23 = vld [vmem:[#allocation35_spill] sm:$0xff] }
 0x2ec   : > { %v5068_v20 = vand.u32 4294901760, %v2427_v13  ;;  %3105 = vmatmul.f32.gmra.mxu0 %v5040_v15  ;;  %v1723_v10 = vadd.f32 %v1722_v53, %v1544_v44  ;;  %v2625_v12 = vand.u32 4294901760, %v2624_v21  ;;  %v1374_v39 = vpop.f32.mrf.mxu3  ;;  %v5871_v44 = vld [vmem:[#allocation36_spill] sm:$0xff] }
 0x2ed   : > { %v897_v21 = vadd.f32 %v5872_v23, %v5871_v44 }
 0x2ee   : > { %v1726_v47 = vpop.f32.mrf.mxu1  ;;  %v2630_v11 = vsub.f32 %v2427_v13, %v5068_v20  ;;  %2289 = vxpose.xlu2.b32.start [1/2] (short) (narrow) %v1723_v10, 16  ;;  %2626 = vmatmul.f32.gmra.mxu2 %v2625_v12 }
 0x2ef   : > { %2925 = vmatmul.f32.gmra.mxu3 %v5068_v20  ;;  %v1117_v5 = vadd.f32 %v1116_v33, %v897_v21 }
 0x2f0   : > { %v2631_v1 = vand.u32 4294901760, %v2630_v11 }
 0x2f1   : > { %3341 = vmatmul.f32.gmra.mxu1 %v2615_v51  ;;  %v1547_v2 = vpop.f32.mrf.mxu0  ;;  %v5869_v51 = vld [vmem:[#allocation34_spill] sm:$0xff] }
 0x2f2   : > { %v1548_v25 = vadd.f32 %v1547_v2, %v1357_v62  ;;  %v1985_v31 = vpop.trf.xlu1  ;;  %v2632_v15 = vsub.f32 %v2630_v11, %v2631_v1  ;;  %v893_v24 = vadd.f32 %v5870_v14, %v5869_v51 }
 0x2f3   : > { %v2430_v17 = vsel %vm256_vm0, %v1985_v31, 0 }
 0x2f4   : > { %v1727_v43 = vadd.f32 %v1726_v47, %v1548_v25  ;;  %v5076_v63 = vand.u32 4294901760, %v2430_v17  ;;  %3110 = vmatmul.f32.gmra.mxu0 %v5051_v60  ;;  %v2633_v54 = vand.u32 4294901760, %v2632_v15  ;;  %v1112_v53 = vadd.f32 %v1111_v41, %v893_v24  ;;  %v1380_v12 = vpop.f32.mrf.mxu3  ;;  %v1121_v41 = vpop.f32.mrf.mxu2 }
 0x2f6   : > { %v1730_v27 = vpop.f32.mrf.mxu1  ;;  %v2638_v36 = vsub.f32 %v2430_v17, %v5076_v63  ;;  %2290 = vxpose.xlu2.b32.end [2/2] (short) (narrow) %v1727_v43, 16  ;;  %2634 = vmatmul.f32.gmra.mxu2 %v2633_v54  ;;  %v1369_v59 = vadd.f32 %v1368_v48, %v1112_v53  ;;  %v5873_v17 = vld [vmem:[#allocation37_spill] sm:$0xff] }
 0x2f7   : > { %2929 = vmatmul.f32.gmra.mxu3 %v5076_v63  ;;  %v2017_v38 = vpop.trf.xlu2  ;;  %v901_v45 = vadd.f32 %v5873_v17, %v4800_v52 }
 0x2f8   : > { %v2639_v16 = vand.u32 4294901760, %v2638_v36  ;;  %v2436_v19 = vsel %vm256_vm0, %v2017_v38, 0 }
 0x2f9   : > { %3347 = vmatmul.f32.gmra.mxu1 %v2623_v35  ;;  %v1551_v37 = vpop.f32.mrf.mxu0  ;;  %v5087_v18 = vand.u32 4294901760, %v2436_v19  ;;  %v1122_v14 = vadd.f32 %v1121_v41, %v901_v45 }
 0x2fa   : > { %v1552_v60 = vadd.f32 %v1551_v37, %v1363_v9  ;;  %v1986_v30 = vpop.trf.xlu1  ;;  %v2640_v46 = vsub.f32 %v2638_v36, %v2639_v16 }
 0x2fb   : > { %v2433_v61 = vsel %vm256_vm0, %v1986_v30, 0  ;;  %v1381_v52 = vadd.f32 %v1380_v12, %v1122_v14 }
 0x2fc   : > { %v5085_v29 = vand.u32 4294901760, %v2433_v61  ;;  %3115 = vmatmul.f32.gmra.mxu0 %v2622_v22  ;;  %v1731_v4 = vadd.f32 %v1730_v27, %v1552_v60  ;;  %v2641_v56 = vand.u32 4294901760, %v2640_v46  ;;  %v5094_v22 = vsub.f32 %v2436_v19, %v5087_v18 }
 0x2fe   : > { %v1734_v49 = vpop.f32.mrf.mxu1  ;;  %v2646_v35 = vsub.f32 %v2433_v61, %v5085_v29  ;;  %2321 = vxpose.xlu0.b32.start [1/2] (short) (narrow) %v1731_v4, 16  ;;  %2642 = vmatmul.f32.gmra.mxu2 %v2641_v56  ;;  %v2655_v2 = vand.u32 4294901760, %v5094_v22 }
 0x2ff   : > { %2933 = vmatmul.f32.gmra.mxu3 %v5085_v29  ;;  %v2018_v13 = vpop.trf.xlu2 }
 0x300   : > { %v2647_v10 = vand.u32 4294901760, %v2646_v35  ;;  %v2439_v62 = vsel %vm256_vm0, %v2018_v13, 0  ;;  %v2656_v54 = vsub.f32 %v5094_v22, %v2655_v2 }
 0x301   : > { %3353 = vmatmul.f32.gmra.mxu1 %v2631_v1  ;;  %v1555_v47 = vpop.f32.mrf.mxu0  ;;  %v5098_v31 = vand.u32 4294901760, %v2439_v62  ;;  %v1375_v1 = vadd.f32 %v1374_v39, %v1117_v5 }
 0x302   : > { %v1556_v42 = vadd.f32 %v1555_v47, %v1369_v59  ;;  %v2648_v6 = vsub.f32 %v2646_v35, %v2647_v10  ;;  %v2657_v9 = vand.u32 4294901760, %v2656_v54 }
 0x303   : > { %v2662_v43 = vsub.f32 %v2439_v62, %v5098_v31 }
 0x304   : > { %v1735_v25 = vadd.f32 %v1734_v49, %v1556_v42  ;;  %3120 = vmatmul.f32.gmra.mxu0 %v2630_v11  ;;  %v2649_v15 = vand.u32 4294901760, %v2648_v6 }
 0x305   : > { %v2663_v24 = vand.u32 4294901760, %v2662_v43 }
 0x306   : > { %v1738_v48 = vpop.f32.mrf.mxu1  ;;  %2322 = vxpose.xlu0.b32.end [2/2] (short) (narrow) %v1735_v25, 16  ;;  %2650 = vmatmul.f32.gmra.mxu2 %v2649_v15 }
 0x307   : > { %2937 = vmatmul.f32.gmra.mxu3 %v5087_v18  ;;  %v2664_v39 = vsub.f32 %v2662_v43, %v2663_v24 }
 0x309   : > { %3359 = vmatmul.f32.gmra.mxu1 %v2639_v16  ;;  %v1559_v27 = vpop.f32.mrf.mxu0  ;;  %v2874_v11 = vpop.f32.mrf.mxu3  ;;  %v2665_v56 = vand.u32 4294901760, %v2664_v39 }
 0x30a   : > { %v1560_v51 = vadd.f32 %v1559_v27, %v1375_v1 }
 0x30c   : > { %3125 = vmatmul.f32.gmra.mxu0 %v2638_v36  ;;  %v1739_v38 = vadd.f32 %v1738_v48, %v1560_v51 }
 0x30e   : > { %v1742_v37 = vpop.f32.mrf.mxu1  ;;  %2353 = vxpose.xlu1.b32.start [1/2] (short) (narrow) %v1739_v38, 16  ;;  %2658 = vmatmul.f32.gmra.mxu2 %v2657_v9 }
 0x30f   : > { %2941 = vmatmul.f32.gmra.mxu3 %v5098_v31 }
 0x311   : > { %3365 = vmatmul.f32.gmra.mxu1 %v2647_v10  ;;  %v1563_v19 = vpop.f32.mrf.mxu0  ;;  %v2531_v16 = vpop.f32.mrf.mxu2 }
 0x312   : > { %v1564_v60 = vadd.f32 %v1563_v19, %v1381_v52  ;;  %v2875_v30 = vadd.f32 %v2874_v11, %v2531_v16  ;;  %v2878_v46 = vpop.f32.mrf.mxu3  ;;  %v2049_v53 = vpop.trf.xlu0 }
 0x313   : > { %v2442_v61 = vsel %vm256_vm0, %v2049_v53, 0 }
 0x314   : > { %v1743_v4 = vadd.f32 %v1742_v37, %v1564_v60  ;;  %v5107_v36 = vand.u32 4294901760, %v2442_v61  ;;  %3130 = vmatmul.f32.gmra.mxu0 %v2646_v35 }
 0x316   : > { %v3276_v49 = vpop.f32.mrf.mxu1  ;;  %v2670_v33 = vsub.f32 %v2442_v61, %v5107_v36  ;;  %2666 = vmatmul.f32.gmra.mxu2 %v2665_v56  ;;  %2354 = vxpose.xlu1.b32.end [2/2] (short) (narrow) %v1743_v4, 16 }
 0x317   : > { %2945 = vmatmul.f32.gmra.mxu3 %v5107_v36 }
 0x318   : > { %v2671_v44 = vand.u32 4294901760, %v2670_v33 }
 0x319   : > { %3371 = vmatmul.f32.gmra.mxu1 %v2655_v2  ;;  %v2539_v23 = vpop.f32.mrf.mxu2  ;;  %v3056_v21 = vpop.f32.mrf.mxu0 }
 0x31a   : > { %v2879_v13 = vadd.f32 %v2878_v46, %v2539_v23  ;;  %v2882_v59 = vpop.f32.mrf.mxu3  ;;  %v3057_v10 = vadd.f32 %v3056_v21, %v2875_v30  ;;  %v2050_v12 = vpop.trf.xlu0  ;;  %v2672_v47 = vsub.f32 %v2670_v33, %v2671_v44 }
 0x31b   : > { %v2445_v62 = vsel %vm256_vm0, %v2050_v12, 0 }
 0x31c   : > { %v5112_v35 = vand.u32 4294901760, %v2445_v62  ;;  %3135 = vmatmul.f32.gmra.mxu0 %v5094_v22  ;;  %v2673_v42 = vand.u32 4294901760, %v2672_v47  ;;  %v5115_v6 = vadd.f32 %v3276_v49, %v3057_v10 }
 0x31e   : > { %v3282_v5 = vpop.f32.mrf.mxu1  ;;  %v2678_v25 = vsub.f32 %v2445_v62, %v5112_v35  ;;  %2674 = vmatmul.f32.gmra.mxu2 %v2673_v42 }
 0x31f   : > { %2949 = vmatmul.f32.gmra.mxu3 %v5112_v35 }
 0x320   : > { %v2679_v2 = vand.u32 4294901760, %v2678_v25 }
 0x321   : > { %3377 = vmatmul.f32.gmra.mxu1 %v2663_v24  ;;  %v2547_v15 = vpop.f32.mrf.mxu2  ;;  %v3061_v48 = vpop.f32.mrf.mxu0 }
 0x322   : > { %v2883_v1 = vadd.f32 %v2882_v59, %v2547_v15  ;;  %v2886_v17 = vpop.f32.mrf.mxu3  ;;  %v3062_v45 = vadd.f32 %v3061_v48, %v2879_v13  ;;  %v2081_v41 = vpop.trf.xlu1  ;;  %v2680_v54 = vsub.f32 %v2678_v25, %v2679_v2 }
 0x323   : > { %v2448_v22 = vsel %vm256_vm0, %v2081_v41, 0 }
 0x324   : > { %v5120_v27 = vand.u32 4294901760, %v2448_v22  ;;  %3140 = vmatmul.f32.gmra.mxu0 %v2662_v43  ;;  %v2681_v11 = vand.u32 4294901760, %v2680_v54  ;;  %v5122_v51 = vadd.f32 %v3282_v5, %v3062_v45 }
 0x326   : > { %v3288_v14 = vpop.f32.mrf.mxu1  ;;  %v2686_v38 = vsub.f32 %v2448_v22, %v5120_v27  ;;  %2682 = vmatmul.f32.gmra.mxu2 %v2681_v11 }
 0x327   : > { %2953 = vmatmul.f32.gmra.mxu3 %v5120_v27  ;;  %v2113_v24 = vpop.trf.xlu2 }
 0x328   : > { %v2687_v9 = vand.u32 4294901760, %v2686_v38  ;;  %v2454_v39 = vsel %vm256_vm0, %v2113_v24, 0 }
 0x329   : > { %3383 = vmatmul.f32.gmra.mxu1 %v2671_v44  ;;  %v2555_v37 = vpop.f32.mrf.mxu2  ;;  %v3066_v52 = vpop.f32.mrf.mxu0  ;;  %v5130_v61 = vand.u32 4294901760, %v2454_v39 }
 0x32a   : > { %v2887_v19 = vadd.f32 %v2886_v17, %v2555_v37  ;;  %v2890_v16 = vpop.f32.mrf.mxu3  ;;  %v3067_v60 = vadd.f32 %v3066_v52, %v2883_v1  ;;  %v2082_v43 = vpop.trf.xlu1  ;;  %v2688_v30 = vsub.f32 %v2686_v38, %v2687_v9 }
 0x32b   : > { %v2451_v46 = vsel %vm256_vm0, %v2082_v43, 0  ;;  %v2702_v13 = vsub.f32 %v2454_v39, %v5130_v61 }
 0x32c   : > { %v5128_v53 = vand.u32 4294901760, %v2451_v46  ;;  %3145 = vmatmul.f32.gmra.mxu0 %v2670_v33  ;;  %v2689_v4 = vand.u32 4294901760, %v2688_v30  ;;  %v5132_v56 = vadd.f32 %v3288_v14, %v3067_v60 }
 0x32d   : > { %v2703_v5 = vand.u32 4294901760, %v2702_v13 }
 0x32e   : > { %v3294_v49 = vpop.f32.mrf.mxu1  ;;  %v2694_v44 = vsub.f32 %v2451_v46, %v5128_v53  ;;  %2690 = vmatmul.f32.gmra.mxu2 %v2689_v4 }
 0x32f   : > { %2957 = vmatmul.f32.gmra.mxu3 %v5128_v53  ;;  %v2114_v23 = vpop.trf.xlu2  ;;  %v2704_v45 = vsub.f32 %v2702_v13, %v2703_v5 }
 0x330   : > { %v2695_v21 = vand.u32 4294901760, %v2694_v44  ;;  %v2457_v33 = vsel %vm256_vm0, %v2114_v23, 0 }
 0x331   : > { %3389 = vmatmul.f32.gmra.mxu1 %v2679_v2  ;;  %v2563_v59 = vpop.f32.mrf.mxu2  ;;  %v3071_v10 = vpop.f32.mrf.mxu0  ;;  %v5138_v15 = vand.u32 4294901760, %v2457_v33 }
 0x332   : > { %v2891_v12 = vadd.f32 %v2890_v16, %v2563_v59  ;;  %v2894_v47 = vpop.f32.mrf.mxu3  ;;  %v3072_v62 = vadd.f32 %v3071_v10, %v2887_v19  ;;  %v2696_v42 = vsub.f32 %v2694_v44, %v2695_v21 }
 0x333   : > { %v2710_v2 = vsub.f32 %v2457_v33, %v5138_v15 }
 0x334   : > { %3150 = vmatmul.f32.gmra.mxu0 %v2678_v25  ;;  %v2697_v48 = vand.u32 4294901760, %v2696_v42  ;;  %v5140_v1 = vadd.f32 %v3294_v49, %v3072_v62  ;;  %v2705_v25 = vand.u32 4294901760, %v2704_v45 }
 0x335   : > { %v2711_v24 = vand.u32 4294901760, %v2710_v2 }
 0x336   : > { %v3300_v17 = vpop.f32.mrf.mxu1  ;;  %2698 = vmatmul.f32.gmra.mxu2 %v2697_v48 }
 0x337   : > { %2961 = vmatmul.f32.gmra.mxu3 %v5130_v61  ;;  %v2712_v39 = vsub.f32 %v2710_v2, %v2711_v24 }
 0x339   : > { %3395 = vmatmul.f32.gmra.mxu1 %v2687_v9  ;;  %v2571_v41 = vpop.f32.mrf.mxu2  ;;  %v3076_v54 = vpop.f32.mrf.mxu0 }
 0x33a   : > { %v2895_v22 = vadd.f32 %v2894_v47, %v2571_v41  ;;  %v2898_v11 = vpop.f32.mrf.mxu3  ;;  %v3077_v14 = vadd.f32 %v3076_v54, %v2891_v12 }
 0x33c   : > { %3155 = vmatmul.f32.gmra.mxu0 %v2686_v38  ;;  %v5144_v37 = vadd.f32 %v3300_v17, %v3077_v14  ;;  %v2713_v38 = vand.u32 4294901760, %v2712_v39 }
 0x33e   : > { %v3306_v52 = vpop.f32.mrf.mxu1  ;;  %2706 = vmatmul.f32.gmra.mxu2 %v2705_v25 }
 0x33f   : > { %2965 = vmatmul.f32.gmra.mxu3 %v5138_v15 }
 0x341   : > { %3401 = vmatmul.f32.gmra.mxu1 %v2695_v21  ;;  %v2579_v19 = vpop.f32.mrf.mxu2  ;;  %v3081_v16 = vpop.f32.mrf.mxu0 }
 0x342   : > { %v2899_v9 = vadd.f32 %v2898_v11, %v2579_v19  ;;  %v2902_v60 = vpop.f32.mrf.mxu3  ;;  %v3082_v43 = vadd.f32 %v3081_v16, %v2895_v22  ;;  %v2145_v30 = vpop.trf.xlu0 }
 0x343   : > { %v2460_v46 = vsel %vm256_vm0, %v2145_v30, 0 }
 0x344   : > { %v5148_v4 = vand.u32 4294901760, %v2460_v46  ;;  %3160 = vmatmul.f32.gmra.mxu0 %v2694_v44  ;;  %v5150_v49 = vadd.f32 %v3306_v52, %v3082_v43 }
 0x346   : > { %v3312_v23 = vpop.f32.mrf.mxu1  ;;  %v2718_v59 = vsub.f32 %v2460_v46, %v5148_v4  ;;  %2714 = vmatmul.f32.gmra.mxu2 %v2713_v38 }
 0x347   : > { %2969 = vmatmul.f32.gmra.mxu3 %v5148_v4 }
 0x348   : > { %v2719_v21 = vand.u32 4294901760, %v2718_v59 }
 0x349   : > { %3407 = vmatmul.f32.gmra.mxu1 %v2703_v5  ;;  %v2587_v10 = vpop.f32.mrf.mxu2  ;;  %v3086_v33 = vpop.f32.mrf.mxu0 }
 0x34a   : > { %v2903_v12 = vadd.f32 %v2902_v60, %v2587_v10  ;;  %v2906_v47 = vpop.f32.mrf.mxu3  ;;  %v3087_v62 = vadd.f32 %v3086_v33, %v2899_v9  ;;  %v2146_v42 = vpop.trf.xlu0  ;;  %v2720_v48 = vsub.f32 %v2718_v59, %v2719_v21 }
 0x34b   : > { %v2463_v44 = vsel %vm256_vm0, %v2146_v42, 0 }
 0x34c   : > { %v5155_v17 = vand.u32 4294901760, %v2463_v44  ;;  %3165 = vmatmul.f32.gmra.mxu0 %v2702_v13  ;;  %v2721_v45 = vand.u32 4294901760, %v2720_v48  ;;  %v5157_v41 = vadd.f32 %v3312_v23, %v3087_v62 }
 0x34e   : > { %v3318_v54 = vpop.f32.mrf.mxu1  ;;  %v2726_v22 = vsub.f32 %v2463_v44, %v5155_v17  ;;  %2722 = vmatmul.f32.gmra.mxu2 %v2721_v45 }
 0x34f   : > { %2973 = vmatmul.f32.gmra.mxu3 %v5155_v17 }
 0x350   : > { %v2727_v5 = vand.u32 4294901760, %v2726_v22 }
 0x351   : > { %3413 = vmatmul.f32.gmra.mxu1 %v2711_v24  ;;  %v2595_v11 = vpop.f32.mrf.mxu2  ;;  %v3091_v14 = vpop.f32.mrf.mxu0 }
 0x352   : > { %v2907_v25 = vadd.f32 %v2906_v47, %v2595_v11  ;;  %v2910_v52 = vpop.f32.mrf.mxu3  ;;  %v3092_v39 = vadd.f32 %v3091_v14, %v2903_v12  ;;  %v2177_v19 = vpop.trf.xlu1  ;;  %v2728_v16 = vsub.f32 %v2726_v22, %v2727_v5 }
 0x353   : > { %v2466_v13 = vsel %vm256_vm0, %v2177_v19, 0 }
 0x354   : > { %v5162_v9 = vand.u32 4294901760, %v2466_v13  ;;  %3170 = vmatmul.f32.gmra.mxu0 %v2710_v2  ;;  %v2729_v60 = vand.u32 4294901760, %v2728_v16  ;;  %v5164_v43 = vadd.f32 %v3318_v54, %v3092_v39 }
 0x356   : > { %v3324_v30 = vpop.f32.mrf.mxu1  ;;  %v2734_v46 = vsub.f32 %v2466_v13, %v5162_v9  ;;  %2730 = vmatmul.f32.gmra.mxu2 %v2729_v60 }
 0x357   : > { %2977 = vmatmul.f32.gmra.mxu3 %v5162_v9  ;;  %v2209_v24 = vpop.trf.xlu2 }
 0x358   : > { %v2735_v38 = vand.u32 4294901760, %v2734_v46  ;;  %v2472_v33 = vsel %vm256_vm0, %v2209_v24, 0 }
 0x359   : > { %3419 = vmatmul.f32.gmra.mxu1 %v2719_v21  ;;  %v2603_v23 = vpop.f32.mrf.mxu2  ;;  %v3096_v10 = vpop.f32.mrf.mxu0  ;;  %v5172_v45 = vand.u32 4294901760, %v2472_v33 }
 0x35a   : > { %v2911_v12 = vadd.f32 %v2910_v52, %v2603_v23  ;;  %v2914_v47 = vpop.f32.mrf.mxu3  ;;  %v3097_v62 = vadd.f32 %v3096_v10, %v2907_v25  ;;  %v2178_v2 = vpop.trf.xlu1  ;;  %v2736_v42 = vsub.f32 %v2734_v46, %v2735_v38 }
 0x35b   : > { %v2469_v48 = vsel %vm256_vm0, %v2178_v2, 0  ;;  %5875 = vst [vmem:[#allocation2_spill] sm:$0xff] %v5172_v45  ;;  %v2750_v39 = vsub.f32 %v2472_v33, %v5172_v45 }
 0x35c   : > { %v5170_v44 = vand.u32 4294901760, %v2469_v48  ;;  %3175 = vmatmul.f32.gmra.mxu0 %v2718_v59  ;;  %v2737_v54 = vand.u32 4294901760, %v2736_v42  ;;  %v5174_v11 = vadd.f32 %v3324_v30, %v3097_v62 }
 0x35d   : > { %v2751_v23 = vand.u32 4294901760, %v2750_v39 }
 0x35e   : > { %5874 = vst [vmem:[#allocation4_spill] sm:$0xff] %v5170_v44  ;;  %v3330_v21 = vpop.f32.mrf.mxu1  ;;  %v2742_v14 = vsub.f32 %v2469_v48, %v5170_v44  ;;  %2738 = vmatmul.f32.gmra.mxu2 %v2737_v54 }
 0x35f   : > { %2981 = vmatmul.f32.gmra.mxu3 %v5170_v44  ;;  %v2210_v52 = vpop.trf.xlu2  ;;  %v2752_v33 = vsub.f32 %v2750_v39, %v2751_v23 }
 0x360   : > { %v2743_v25 = vand.u32 4294901760, %v2742_v14  ;;  %v2475_v59 = vsel %vm256_vm0, %v2210_v52, 0 }
 0x361   : > { %3425 = vmatmul.f32.gmra.mxu1 %v2727_v5  ;;  %v2611_v19 = vpop.f32.mrf.mxu2  ;;  %v3101_v16 = vpop.f32.mrf.mxu0  ;;  %v5180_v10 = vand.u32 4294901760, %v2475_v59 }
 0x362   : > { %v2915_v13 = vadd.f32 %v2914_v47, %v2611_v19  ;;  %v2918_v60 = vpop.f32.mrf.mxu3  ;;  %v3102_v24 = vadd.f32 %v3101_v16, %v2911_v12  ;;  %v2744_v30 = vsub.f32 %v2742_v14, %v2743_v25 }
 0x363   : > { %5876 = vst [vmem:[#allocation6_spill] sm:$0xff] %v5180_v10  ;;  %v2758_v5 = vsub.f32 %v2475_v59, %v5180_v10 }
 0x364   : > { %3180 = vmatmul.f32.gmra.mxu0 %v2726_v22  ;;  %v2745_v62 = vand.u32 4294901760, %v2744_v30  ;;  %v5182_v2 = vadd.f32 %v3330_v21, %v3102_v24  ;;  %v2753_v22 = vand.u32 4294901760, %v2752_v33 }
 0x365   : > { %v2759_v19 = vand.u32 4294901760, %v2758_v5 }
 0x366   : > { %v3336_v42 = vpop.f32.mrf.mxu1  ;;  %2746 = vmatmul.f32.gmra.mxu2 %v2745_v62 }
 0x367   : > { %2985 = vmatmul.f32.gmra.mxu3 %v5172_v45  ;;  %v2760_v24 = vsub.f32 %v2758_v5, %v2759_v19 }
 0x369   : > { %3431 = vmatmul.f32.gmra.mxu1 %v2735_v38  ;;  %v2619_v48 = vpop.f32.mrf.mxu2  ;;  %v3106_v47 = vpop.f32.mrf.mxu0 }
 0x36a   : > { %v2919_v54 = vadd.f32 %v2918_v60, %v2619_v48  ;;  %v2922_v12 = vpop.f32.mrf.mxu3  ;;  %v3107_v52 = vadd.f32 %v3106_v47, %v2915_v13 }
 0x36c   : > { %3185 = vmatmul.f32.gmra.mxu0 %v2734_v46  ;;  %v5186_v16 = vadd.f32 %v3336_v42, %v3107_v52  ;;  %v2761_v46 = vand.u32 4294901760, %v2760_v24 }
 0x36e   : > { %5877 = vst [vmem:[#allocation3_spill] sm:$0xff] %v5186_v16  ;;  %v3342_v21 = vpop.f32.mrf.mxu1  ;;  %2754 = vmatmul.f32.gmra.mxu2 %v2753_v22 }
 0x36f   : > { %2989 = vmatmul.f32.gmra.mxu3 %v5180_v10 }
 0x371   : > { %3437 = vmatmul.f32.gmra.mxu1 %v2743_v25  ;;  %v2627_v30 = vpop.f32.mrf.mxu2  ;;  %v3111_v59 = vpop.f32.mrf.mxu0 }
 0x372   : > { %v2923_v38 = vadd.f32 %v2922_v12, %v2627_v30  ;;  %v2926_v62 = vpop.f32.mrf.mxu3  ;;  %v3112_v45 = vadd.f32 %v3111_v59, %v2919_v54  ;;  %v2241_v44 = vpop.trf.xlu0 }
 0x373   : > { %v2478_v60 = vsel %vm256_vm0, %v2241_v44, 0 }
 0x374   : > { %v5190_v13 = vand.u32 4294901760, %v2478_v60  ;;  %3190 = vmatmul.f32.gmra.mxu0 %v2742_v14  ;;  %v5192_v42 = vadd.f32 %v3342_v21, %v3112_v45 }
 0x376   : > { %5878 = vst [vmem:[#allocation8_spill] sm:$0xff] %v5190_v13  ;;  %v3348_v33 = vpop.f32.mrf.mxu1  ;;  %v2766_v48 = vsub.f32 %v2478_v60, %v5190_v13  ;;  %2762 = vmatmul.f32.gmra.mxu2 %v2761_v46 }
 0x377   : > { %5879 = vst [vmem:[#allocation5_spill] sm:$0xff] %v5192_v42  ;;  %2993 = vmatmul.f32.gmra.mxu3 %v5190_v13 }
 0x378   : > { %v2767_v25 = vand.u32 4294901760, %v2766_v48 }
 0x379   : > { %3443 = vmatmul.f32.gmra.mxu1 %v2751_v23  ;;  %v2635_v47 = vpop.f32.mrf.mxu2  ;;  %v3116_v12 = vpop.f32.mrf.mxu0 }
 0x37a   : > { %v2927_v54 = vadd.f32 %v2926_v62, %v2635_v47  ;;  %v2930_v52 = vpop.f32.mrf.mxu3  ;;  %v3117_v22 = vadd.f32 %v3116_v12, %v2923_v38  ;;  %v2242_v44 = vpop.trf.xlu0  ;;  %v2768_v30 = vsub.f32 %v2766_v48, %v2767_v25 }
 0x37b   : > { %v2481_v14 = vsel %vm256_vm0, %v2242_v44, 0 }
 0x37c   : > { %v5197_v24 = vand.u32 4294901760, %v2481_v14  ;;  %3195 = vmatmul.f32.gmra.mxu0 %v2750_v39  ;;  %v2769_v45 = vand.u32 4294901760, %v2768_v30  ;;  %v5199_v21 = vadd.f32 %v3348_v33, %v3117_v22 }
 0x37e   : > { %5880 = vst [vmem:[#allocation10_spill] sm:$0xff] %v5197_v24  ;;  %v3354_v59 = vpop.f32.mrf.mxu1  ;;  %v2774_v60 = vsub.f32 %v2481_v14, %v5197_v24  ;;  %2770 = vmatmul.f32.gmra.mxu2 %v2769_v45 }
 0x37f   : > { %5881 = vst [vmem:[#allocation7_spill] sm:$0xff] %v5199_v21  ;;  %2997 = vmatmul.f32.gmra.mxu3 %v5197_v24 }
 0x380   : > { %v2775_v23 = vand.u32 4294901760, %v2774_v60 }
 0x381   : > { %3449 = vmatmul.f32.gmra.mxu1 %v2759_v19  ;;  %v2643_v62 = vpop.f32.mrf.mxu2  ;;  %v3121_v38 = vpop.f32.mrf.mxu0 }
 0x382   : > { %v2931_v46 = vadd.f32 %v2930_v52, %v2643_v62  ;;  %v2934_v47 = vpop.f32.mrf.mxu3  ;;  %v3122_v12 = vadd.f32 %v3121_v38, %v2927_v54  ;;  %v2273_v44 = vpop.trf.xlu1  ;;  %v2776_v13 = vsub.f32 %v2774_v60, %v2775_v23 }
 0x383   : > { %v2484_v39 = vsel %vm256_vm0, %v2273_v44, 0 }
 0x384   : > { %v5204_v30 = vand.u32 4294901760, %v2484_v39  ;;  %3200 = vmatmul.f32.gmra.mxu0 %v2758_v5  ;;  %v2777_v33 = vand.u32 4294901760, %v2776_v13  ;;  %v5206_v22 = vadd.f32 %v3354_v59, %v3122_v12 }
 0x386   : > { %5882 = vst [vmem:[#allocation12_spill] sm:$0xff] %v5204_v30  ;;  %v3360_v14 = vpop.f32.mrf.mxu1  ;;  %v2782_v45 = vsub.f32 %v2484_v39, %v5204_v30  ;;  %2778 = vmatmul.f32.gmra.mxu2 %v2777_v33 }
 0x387   : > { %5883 = vst [vmem:[#allocation9_spill] sm:$0xff] %v5206_v22  ;;  %3001 = vmatmul.f32.gmra.mxu3 %v5204_v30  ;;  %v2305_v19 = vpop.trf.xlu2 }
 0x388   : > { %v2783_v52 = vand.u32 4294901760, %v2782_v45  ;;  %v2490_v38 = vsel %vm256_vm0, %v2305_v19, 0 }
 0x389   : > { %3455 = vmatmul.f32.gmra.mxu1 %v2767_v25  ;;  %v2651_v54 = vpop.f32.mrf.mxu2  ;;  %v3126_v62 = vpop.f32.mrf.mxu0  ;;  %v5214_v39 = vand.u32 4294901760, %v2490_v38 }
 0x38a   : > { %v2935_v44 = vadd.f32 %v2934_v47, %v2651_v54  ;;  %v2938_v24 = vpop.f32.mrf.mxu3  ;;  %v3127_v21 = vadd.f32 %v3126_v62, %v2931_v46  ;;  %v2274_v5 = vpop.trf.xlu1  ;;  %v2784_v13 = vsub.f32 %v2782_v45, %v2783_v52 }
 0x38b   : > { %v2487_v59 = vsel %vm256_vm0, %v2274_v5, 0  ;;  %5885 = vst [vmem:[#allocation11_spill] sm:$0xff] %v5214_v39  ;;  %v2798_v19 = vsub.f32 %v2490_v38, %v5214_v39 }
 0x38c   : > { %v5212_v12 = vand.u32 4294901760, %v2487_v59  ;;  %3205 = vmatmul.f32.gmra.mxu0 %v2766_v48  ;;  %v2785_v33 = vand.u32 4294901760, %v2784_v13  ;;  %v5216_v30 = vadd.f32 %v3360_v14, %v3127_v21 }
 0x38d   : > { %v2799_v14 = vand.u32 4294901760, %v2798_v19 }
 0x38e   : > { %5884 = vst [vmem:[#allocation14_spill] sm:$0xff] %v5212_v12  ;;  %v3366_v25 = vpop.f32.mrf.mxu1  ;;  %v2790_v22 = vsub.f32 %v2487_v59, %v5212_v12  ;;  %2786 = vmatmul.f32.gmra.mxu2 %v2785_v33 }
 0x38f   : > { %5886 = vst [vmem:[#allocation16_spill] sm:$0xff] %v5216_v30  ;;  %3005 = vmatmul.f32.gmra.mxu3 %v5212_v12  ;;  %v2306_v47 = vpop.trf.xlu2  ;;  %v2800_v38 = vsub.f32 %v2798_v19, %v2799_v14 }
 0x390   : > { %v2791_v46 = vand.u32 4294901760, %v2790_v22  ;;  %v2493_v48 = vsel %vm256_vm0, %v2306_v47, 0 }
 0x391   : > { %3461 = vmatmul.f32.gmra.mxu1 %v2775_v23  ;;  %v2659_v54 = vpop.f32.mrf.mxu2  ;;  %v3131_v62 = vpop.f32.mrf.mxu0  ;;  %v5222_v30 = vand.u32 4294901760, %v2493_v48 }
 0x392   : > { %v2939_v5 = vadd.f32 %v2938_v24, %v2659_v54  ;;  %v2942_v10 = vpop.f32.mrf.mxu3  ;;  %v3132_v13 = vadd.f32 %v3131_v62, %v2935_v44  ;;  %v2792_v21 = vsub.f32 %v2790_v22, %v2791_v46 }
 0x393   : > { %v2806_v23 = vsub.f32 %v2493_v48, %v5222_v30 }
 0x394   : > { %3210 = vmatmul.f32.gmra.mxu0 %v2774_v60  ;;  %v2793_v59 = vand.u32 4294901760, %v2792_v21  ;;  %v5224_v33 = vadd.f32 %v3366_v25, %v3132_v13  ;;  %v2801_v60 = vand.u32 4294901760, %v2800_v38 }
 0x395   : > { %v2807_v42 = vand.u32 4294901760, %v2806_v23 }
 0x396   : > { %5887 = vst [vmem:[#allocation13_spill] sm:$0xff] %v5224_v33  ;;  %v3372_v12 = vpop.f32.mrf.mxu1  ;;  %2794 = vmatmul.f32.gmra.mxu2 %v2793_v59 }
 0x397   : > { %3009 = vmatmul.f32.gmra.mxu3 %v5214_v39  ;;  %v2808_v13 = vsub.f32 %v2806_v23, %v2807_v42 }
 0x399   : > { %3467 = vmatmul.f32.gmra.mxu1 %v2783_v52  ;;  %v2667_v47 = vpop.f32.mrf.mxu2  ;;  %v3136_v24 = vpop.f32.mrf.mxu0 }
 0x39a   : > { %v2943_v54 = vadd.f32 %v2942_v10, %v2667_v47  ;;  %v2946_v44 = vpop.f32.mrf.mxu3  ;;  %v3137_v62 = vadd.f32 %v3136_v24, %v2939_v5 }
 0x39c   : > { %3215 = vmatmul.f32.gmra.mxu0 %v2782_v45  ;;  %v5228_v16 = vadd.f32 %v3372_v12, %v3137_v62  ;;  %v2809_v45 = vand.u32 4294901760, %v2808_v13 }
 0x39e   : > { %v3378_v25 = vpop.f32.mrf.mxu1  ;;  %2802 = vmatmul.f32.gmra.mxu2 %v2801_v60 }
 0x39f   : > { %3013 = vmatmul.f32.gmra.mxu3 %v5222_v30 }
 0x3a1   : > { %3473 = vmatmul.f32.gmra.mxu1 %v2791_v46  ;;  %v2675_v21 = vpop.f32.mrf.mxu2  ;;  %v3141_v48 = vpop.f32.mrf.mxu0 }
 0x3a2   : > { %v2947_v52 = vadd.f32 %v2946_v44, %v2675_v21  ;;  %v2950_v59 = vpop.f32.mrf.mxu3  ;;  %v3142_v39 = vadd.f32 %v3141_v48, %v2943_v54  ;;  %v2337_v33 = vpop.trf.xlu0 }
 0x3a3   : > { %v2496_v10 = vsel %vm256_vm0, %v2337_v33, 0 }
 0x3a4   : > { %v5232_v5 = vand.u32 4294901760, %v2496_v10  ;;  %3220 = vmatmul.f32.gmra.mxu0 %v2790_v22  ;;  %v5234_v12 = vadd.f32 %v3378_v25, %v3142_v39 }
 0x3a6   : > { %5888 = vst [vmem:[#allocation17_spill] sm:$0xff] %v5232_v5  ;;  %v3384_v38 = vpop.f32.mrf.mxu1  ;;  %v2814_v47 = vsub.f32 %v2496_v10, %v5232_v5  ;;  %2810 = vmatmul.f32.gmra.mxu2 %v2809_v45 }
 0x3a7   : > { %3017 = vmatmul.f32.gmra.mxu3 %v5232_v5 }
 0x3a8   : > { %v2815_v46 = vand.u32 4294901760, %v2814_v47 }
 0x3a9   : > { %3479 = vmatmul.f32.gmra.mxu1 %v2799_v14  ;;  %v2683_v24 = vpop.f32.mrf.mxu2  ;;  %v3146_v44 = vpop.f32.mrf.mxu0 }
 0x3aa   : > { %v2951_v54 = vadd.f32 %v2950_v59, %v2683_v24  ;;  %v2954_v62 = vpop.f32.mrf.mxu3  ;;  %v3147_v60 = vadd.f32 %v3146_v44, %v2947_v52  ;;  %v2338_v33 = vpop.trf.xlu0  ;;  %v2816_v21 = vsub.f32 %v2814_v47, %v2815_v46 }
 0x3ab   : > { %v2499_v22 = vsel %vm256_vm0, %v2338_v33, 0 }
 0x3ac   : > { %v5239_v13 = vand.u32 4294901760, %v2499_v22  ;;  %3225 = vmatmul.f32.gmra.mxu0 %v2798_v19  ;;  %v2817_v39 = vand.u32 4294901760, %v2816_v21  ;;  %v5241_v25 = vadd.f32 %v3384_v38, %v3147_v60 }
 0x3ae   : > { %5889 = vst [vmem:[#allocation15_spill] sm:$0xff] %v5239_v13  ;;  %v3390_v48 = vpop.f32.mrf.mxu1  ;;  %v2822_v10 = vsub.f32 %v2499_v22, %v5239_v13  ;;  %2818 = vmatmul.f32.gmra.mxu2 %v2817_v39 }
 0x3af   : > { %5890 = vst [vmem:[#allocation20_spill] sm:$0xff] %v5241_v25  ;;  %3021 = vmatmul.f32.gmra.mxu3 %v5239_v13 }
 0x3b0   : > { %v2823_v14 = vand.u32 4294901760, %v2822_v10 }
 0x3b1   : > { %3485 = vmatmul.f32.gmra.mxu1 %v2807_v42  ;;  %v2691_v59 = vpop.f32.mrf.mxu2  ;;  %v3151_v52 = vpop.f32.mrf.mxu0 }
 0x3b2   : > { %v2955_v45 = vadd.f32 %v2954_v62, %v2691_v59  ;;  %v2958_v24 = vpop.f32.mrf.mxu3  ;;  %v3152_v44 = vadd.f32 %v3151_v52, %v2951_v54  ;;  %v2369_v33 = vpop.trf.xlu1  ;;  %v2824_v5 = vsub.f32 %v2822_v10, %v2823_v14 }
 0x3b3   : > { %v2502_v19 = vsel %vm256_vm0, %v2369_v33, 0 }
 0x3b4   : > { %v5246_v21 = vand.u32 4294901760, %v2502_v19  ;;  %3230 = vmatmul.f32.gmra.mxu0 %v2806_v23  ;;  %v2825_v38 = vand.u32 4294901760, %v2824_v5  ;;  %v5248_v60 = vadd.f32 %v3390_v48, %v3152_v44 }
 0x3b6   : > { %5891 = vst [vmem:[#allocation18_spill] sm:$0xff] %v5246_v21  ;;  %v3396_v22 = vpop.f32.mrf.mxu1  ;;  %v2830_v39 = vsub.f32 %v2502_v19, %v5246_v21  ;;  %2826 = vmatmul.f32.gmra.mxu2 %v2825_v38 }
 0x3b7   : > { %5892 = vst [vmem:[#allocation19_spill] sm:$0xff] %v5248_v60  ;;  %3025 = vmatmul.f32.gmra.mxu3 %v5246_v21 }
 0x3b8   : > { %v2831_v42 = vand.u32 4294901760, %v2830_v39 }
 0x3b9   : > { %3491 = vmatmul.f32.gmra.mxu1 %v2815_v46  ;;  %v2699_v62 = vpop.f32.mrf.mxu2  ;;  %v3156_v54 = vpop.f32.mrf.mxu0 }
 0x3ba   : > { %v2959_v59 = vadd.f32 %v2958_v24, %v2699_v62  ;;  %v2962_v52 = vpop.f32.mrf.mxu3  ;;  %v3157_v13 = vadd.f32 %v3156_v54, %v2955_v45  ;;  %v2370_v33 = vpop.trf.xlu1  ;;  %v2832_v25 = vsub.f32 %v2830_v39, %v2831_v42 }
 0x3bb   : > { %v2505_v23 = vsel %vm256_vm0, %v2370_v33, 0 }
 0x3bc   : > { %v5253_v5 = vand.u32 4294901760, %v2505_v23  ;;  %3235 = vmatmul.f32.gmra.mxu0 %v2814_v47  ;;  %v2833_v48 = vand.u32 4294901760, %v2832_v25  ;;  %v5255_v44 = vadd.f32 %v3396_v22, %v3157_v13 }
 0x3be   : > { %5893 = vst [vmem:[#allocation21_spill] sm:$0xff] %v5253_v5  ;;  %v3402_v19 = vpop.f32.mrf.mxu1  ;;  %v2838_v38 = vsub.f32 %v2505_v23, %v5253_v5  ;;  %2834 = vmatmul.f32.gmra.mxu2 %v2833_v48 }
 0x3bf   : > { %3029 = vmatmul.f32.gmra.mxu3 %v5253_v5 }
 0x3c0   : > { %v2839_v46 = vand.u32 4294901760, %v2838_v38 }
 0x3c1   : > { %3497 = vmatmul.f32.gmra.mxu1 %v2823_v14  ;;  %v2707_v24 = vpop.f32.mrf.mxu2  ;;  %v3161_v45 = vpop.f32.mrf.mxu0 }
 0x3c2   : > { %v2963_v62 = vadd.f32 %v2962_v52, %v2707_v24  ;;  %v2966_v54 = vpop.f32.mrf.mxu3  ;;  %v3162_v21 = vadd.f32 %v3161_v45, %v2959_v59  ;;  %v2840_v33 = vsub.f32 %v2838_v38, %v2839_v46 }
 0x3c4   : > { %3240 = vmatmul.f32.gmra.mxu0 %v2822_v10  ;;  %v2841_v60 = vand.u32 4294901760, %v2840_v33  ;;  %v5259_v47 = vadd.f32 %v3402_v19, %v3162_v21 }
 0x3c6   : > { %v3408_v13 = vpop.f32.mrf.mxu1  ;;  %2842 = vmatmul.f32.gmra.mxu2 %v2841_v60 }
 0x3c7   : > { %3715 = vmatmul.f32.vlgmr.msra.gmra.mxu3 %v4912_v34 }
 0x3c9   : > { %3503 = vmatmul.f32.gmra.mxu1 %v2831_v42  ;;  %v2715_v25 = vpop.f32.mrf.mxu2  ;;  %v3166_v22 = vpop.f32.mrf.mxu0 }
 0x3ca   : > { %v2967_v23 = vadd.f32 %v2966_v54, %v2715_v25  ;;  %v2970_v48 = vpop.f32.mrf.mxu3  ;;  %v3167_v14 = vadd.f32 %v3166_v22, %v2963_v62 }
 0x3cc   : > { %3245 = vmatmul.f32.gmra.mxu0 %v2830_v39  ;;  %v5262_v5 = vadd.f32 %v3408_v13, %v3167_v14 }
 0x3ce   : > { %v3414_v52 = vpop.f32.mrf.mxu1  ;;  %3536 = vmatmul.f32.vlgmr.msra.gmra.mxu2 %v4912_v34 }
 0x3cf   : > { %3719 = vmatmul.f32.gmra.mxu3 %v4926_v57 }
 0x3d1   : > { %3509 = vmatmul.f32.gmra.mxu1 %v2839_v46  ;;  %v2723_v10 = vpop.f32.mrf.mxu2  ;;  %v3171_v21 = vpop.f32.mrf.mxu0 }
 0x3d2   : > { %v2971_v60 = vadd.f32 %v2970_v48, %v2723_v10  ;;  %v2974_v59 = vpop.f32.mrf.mxu3  ;;  %v3172_v19 = vadd.f32 %v3171_v21, %v2967_v23 }
 0x3d4   : > { %3250 = vmatmul.f32.gmra.mxu0 %v2838_v38  ;;  %v5266_v42 = vadd.f32 %v3414_v52, %v3172_v19 }
 0x3d6   : > { %v3420_v24 = vpop.f32.mrf.mxu1  ;;  %3540 = vmatmul.f32.gmra.mxu2 %v4926_v57 }
 0x3d7   : > { %3723 = vmatmul.f32.gmra.mxu3 %v4945_v28 }
 0x3d9   : > { %v2731_v39 = vpop.f32.mrf.mxu2  ;;  %v3176_v45 = vpop.f32.mrf.mxu0 }
 0x3da   : > { %v2975_v62 = vadd.f32 %v2974_v59, %v2731_v39  ;;  %v2978_v34 = vpop.f32.mrf.mxu3  ;;  %v3177_v54 = vadd.f32 %v3176_v45, %v2971_v60 }
 0x3dc   : > { %v5270_v33 = vadd.f32 %v3420_v24, %v3177_v54 }
 0x3de   : > { %v3426_v46 = vpop.f32.mrf.mxu1  ;;  %3544 = vmatmul.f32.gmra.mxu2 %v4945_v28 }
 0x3df   : > { %3727 = vmatmul.f32.gmra.mxu3 %v4958_v8 }
 0x3e1   : > { %v2739_v38 = vpop.f32.mrf.mxu2  ;;  %v3181_v13 = vpop.f32.mrf.mxu0 }
 0x3e2   : > { %v2979_v25 = vadd.f32 %v2978_v34, %v2739_v38  ;;  %v2982_v22 = vpop.f32.mrf.mxu3  ;;  %v3182_v23 = vadd.f32 %v3181_v13, %v2975_v62 }
 0x3e4   : > { %v5274_v57 = vadd.f32 %v3426_v46, %v3182_v23 }
 0x3e6   : > { %v3432_v48 = vpop.f32.mrf.mxu1  ;;  %3548 = vmatmul.f32.gmra.mxu2 %v4958_v8 }
 0x3e7   : > { %3731 = vmatmul.f32.gmra.mxu3 %v4960_v55 }
 0x3e9   : > { %v2747_v14 = vpop.f32.mrf.mxu2  ;;  %v3186_v52 = vpop.f32.mrf.mxu0 }
 0x3ea   : > { %v2983_v10 = vadd.f32 %v2982_v22, %v2747_v14  ;;  %v2986_v21 = vpop.f32.mrf.mxu3  ;;  %v3187_v60 = vadd.f32 %v3186_v52, %v2979_v25 }
 0x3ec   : > { %v5278_v28 = vadd.f32 %v3432_v48, %v3187_v60 }
 0x3ee   : > { %3552 = vmatmul.f32.gmra.mxu2 %v4960_v55  ;;  %v3438_v59 = vpop.f32.mrf.mxu1 }
 0x3ef   : > { %3735 = vmatmul.f32.gmra.mxu3 %v4976_v58 }
 0x3f1   : > { %v2755_v19 = vpop.f32.mrf.mxu2  ;;  %v3191_v24 = vpop.f32.mrf.mxu0 }
 0x3f2   : > { %v2987_v39 = vadd.f32 %v2986_v21, %v2755_v19  ;;  %v2990_v45 = vpop.f32.mrf.mxu3  ;;  %v3192_v62 = vadd.f32 %v3191_v24, %v2983_v10 }
 0x3f4   : > { %v5282_v8 = vadd.f32 %v3438_v59, %v3192_v62 }
 0x3f6   : > { %3556 = vmatmul.f32.gmra.mxu2 %v4976_v58  ;;  %v3444_v13 = vpop.f32.mrf.mxu1 }
 0x3f7   : > { %3739 = vmatmul.f32.gmra.mxu3 %v4999_v32 }
 0x3f9   : > { %v2763_v34 = vpop.f32.mrf.mxu2  ;;  %v3196_v54 = vpop.f32.mrf.mxu0 }
 0x3fa   : > { %v5286_v46 = vadd.f32 %v2990_v45, %v2763_v34  ;;  %v2994_v38 = vpop.f32.mrf.mxu3  ;;  %v3197_v55 = vadd.f32 %v3196_v54, %v2987_v39 }
 0x3fc   : > { %v5288_v25 = vadd.f32 %v3444_v13, %v3197_v55 }
 0x3fe   : > { %3560 = vmatmul.f32.gmra.mxu2 %v4999_v32 }
 0x3ff   : > { %3743 = vmatmul.f32.gmra.mxu3 %v5009_v26 }
 0x401   : > { %v2771_v22 = vpop.f32.mrf.mxu2 }
 0x402   : > { %v5292_v23 = vadd.f32 %v2994_v38, %v2771_v22  ;;  %v2998_v48 = vpop.f32.mrf.mxu3 }
 0x406   : > { %3564 = vmatmul.f32.gmra.mxu2 %v5009_v26 }
 0x407   : > { %3747 = vmatmul.f32.gmra.mxu3 %v5018_v50 }
 0x409   : > { %v2779_v58 = vpop.f32.mrf.mxu2 }
 0x40a   : > { %v5296_v14 = vadd.f32 %v2998_v48, %v2779_v58  ;;  %v3002_v52 = vpop.f32.mrf.mxu3 }
 0x40e   : > { %3568 = vmatmul.f32.gmra.mxu2 %v5018_v50 }
 0x40f   : > { %3751 = vmatmul.f32.gmra.mxu3 %v5030_v7 }
 0x411   : > { %v2787_v10 = vpop.f32.mrf.mxu2 }
 0x412   : > { %v5300_v32 = vadd.f32 %v3002_v52, %v2787_v10  ;;  %v3006_v21 = vpop.f32.mrf.mxu3 }
 0x416   : > { %3572 = vmatmul.f32.gmra.mxu2 %v5030_v7 }
 0x417   : > { %3755 = vmatmul.f32.gmra.mxu3 %v5032_v40 }
 0x419   : > { %v2795_v60 = vpop.f32.mrf.mxu2 }
 0x41a   : > { %v5304_v26 = vadd.f32 %v3006_v21, %v2795_v60  ;;  %v3010_v59 = vpop.f32.mrf.mxu3 }
 0x41e   : > { %3576 = vmatmul.f32.gmra.mxu2 %v5032_v40 }
 0x41f   : > { %3759 = vmatmul.f32.gmra.mxu3 %v5044_v0 }
 0x421   : > { %v2803_v19 = vpop.f32.mrf.mxu2 }
 0x422   : > { %v5308_v50 = vadd.f32 %v3010_v59, %v2803_v19  ;;  %v3014_v24 = vpop.f32.mrf.mxu3 }
 0x426   : > { %3580 = vmatmul.f32.gmra.mxu2 %v5044_v0 }
 0x427   : > { %3763 = vmatmul.f32.gmra.mxu3 %v5061_v3 }
 0x429   : > { %v2811_v39 = vpop.f32.mrf.mxu2 }
 0x42a   : > { %v5312_v7 = vadd.f32 %v3014_v24, %v2811_v39  ;;  %v3018_v45 = vpop.f32.mrf.mxu3 }
 0x42e   : > { %3584 = vmatmul.f32.gmra.mxu2 %v5061_v3 }
 0x42f   : > { %3767 = vmatmul.f32.gmra.mxu3 %v5068_v20 }
 0x431   : > { %v2819_v62 = vpop.f32.mrf.mxu2 }
 0x432   : > { %v5316_v40 = vadd.f32 %v3018_v45, %v2819_v62  ;;  %v3022_v34 = vpop.f32.mrf.mxu3 }
 0x436   : > { %3588 = vmatmul.f32.gmra.mxu2 %v5068_v20 }
 0x437   : > { %3771 = vmatmul.f32.gmra.mxu3 %v5076_v63 }
 0x439   : > { %v2827_v54 = vpop.f32.mrf.mxu2 }
 0x43a   : > { %v5320_v0 = vadd.f32 %v3022_v34, %v2827_v54  ;;  %v3026_v38 = vpop.f32.mrf.mxu3 }
 0x43e   : > { %3592 = vmatmul.f32.gmra.mxu2 %v5076_v63 }
 0x43f   : > { %3775 = vmatmul.f32.gmra.mxu3 %v5085_v29 }
 0x441   : > { %v2835_v55 = vpop.f32.mrf.mxu2 }
 0x442   : > { %v5324_v3 = vadd.f32 %v3026_v38, %v2835_v55  ;;  %v3030_v13 = vpop.f32.mrf.mxu3 }
 0x444   : > { %5894 = vst [vmem:[#allocation22_spill] sm:$0xff] %v5324_v3 }
 0x446   : > { %3596 = vmatmul.f32.gmra.mxu2 %v5085_v29 }
 0x447   : > { %3779 = vmatmul.f32.gmra.mxu3 %v5087_v18 }
 0x449   : > { %v2843_v22 = vpop.f32.mrf.mxu2 }
 0x44a   : > { %v5328_v20 = vadd.f32 %v3030_v13, %v2843_v22  ;;  %v3716_v48 = vpop.f32.mrf.mxu3 }
 0x44c   : > { %5895 = vst [vmem:[#allocation23_spill] sm:$0xff] %v5328_v20  ;;  %v5913_v20 = vld [vmem:[#allocation11_spill] sm:$0xff] }
 0x44e   : > { %3600 = vmatmul.f32.gmra.mxu2 %v5087_v18 }
 0x44f   : > { %3783 = vmatmul.f32.gmra.mxu3 %v5098_v31 }
 0x451   : > { %v3537_v58 = vpop.f32.mrf.mxu2 }
 0x452   : > { %v3538_v63 = vadd.f32 %v3537_v58, %v5115_v6  ;;  %v3720_v52 = vpop.f32.mrf.mxu3 }
 0x454   : > { %v3717_v10 = vadd.f32 %v3716_v48, %v3538_v63 }
 0x456   : > { %3604 = vmatmul.f32.gmra.mxu2 %v5098_v31 }
 0x457   : > { %3787 = vmatmul.f32.gmra.mxu3 %v5107_v36 }
 0x459   : > { %v3541_v29 = vpop.f32.mrf.mxu2 }
 0x45a   : > { %v3542_v21 = vadd.f32 %v3541_v29, %v5122_v51  ;;  %v3724_v60 = vpop.f32.mrf.mxu3 }
 0x45c   : > { %v3721_v59 = vadd.f32 %v3720_v52, %v3542_v21  ;;  %v5367_v52 = vmul.f32 %v3717_v10, %v3717_v10 }
 0x45e   : > { %3608 = vmatmul.f32.gmra.mxu2 %v5107_v36 }
 0x45f   : > { %3791 = vmatmul.f32.gmra.mxu3 %v5112_v35 }
 0x461   : > { %v3545_v18 = vpop.f32.mrf.mxu2 }
 0x462   : > { %v3546_v19 = vadd.f32 %v3545_v18, %v5132_v56  ;;  %v3728_v24 = vpop.f32.mrf.mxu3  ;;  %v5380_v18 = vmul.f32 %v3721_v59, %v3721_v59 }
 0x464   : > { %v3725_v6 = vadd.f32 %v3724_v60, %v3546_v19 }
 0x466   : > { %3612 = vmatmul.f32.gmra.mxu2 %v5112_v35 }
 0x467   : > { %3795 = vmatmul.f32.gmra.mxu3 %v5120_v27 }
 0x469   : > { %v3549_v31 = vpop.f32.mrf.mxu2 }
 0x46a   : > { %v3550_v39 = vadd.f32 %v3549_v31, %v5140_v1  ;;  %v3732_v45 = vpop.f32.mrf.mxu3 }
 0x46c   : > { %v5342_v51 = vadd.f32 %v3728_v24, %v3550_v39  ;;  %v5897_v39 = vld [vmem:[#allocation3_spill] sm:$0xff] }
 0x46e   : > { %3616 = vmatmul.f32.gmra.mxu2 %v5120_v27 }
 0x46f   : > { %3799 = vmatmul.f32.gmra.mxu3 %v5128_v53 }
 0x471   : > { %v3553_v36 = vpop.f32.mrf.mxu2 }
 0x472   : > { %v3554_v62 = vadd.f32 %v3553_v36, %v5144_v37  ;;  %v3736_v56 = vpop.f32.mrf.mxu3 }
 0x474   : > { %v5347_v34 = vadd.f32 %v3732_v45, %v3554_v62  ;;  %v5393_v62 = vmul.f32 %v3725_v6, %v3725_v6 }
 0x476   : > { %3620 = vmatmul.f32.gmra.mxu2 %v5128_v53 }
 0x477   : > { %3803 = vmatmul.f32.gmra.mxu3 %v5130_v61 }
 0x479   : > { %v3557_v35 = vpop.f32.mrf.mxu2 }
 0x47a   : > { %v3558_v1 = vadd.f32 %v3557_v35, %v5150_v49  ;;  %v3740_v54 = vpop.f32.mrf.mxu3 }
 0x47c   : > { %v5352_v38 = vadd.f32 %v3736_v56, %v3558_v1 }
 0x47e   : > { %3624 = vmatmul.f32.gmra.mxu2 %v5130_v61 }
 0x47f   : > { %3807 = vmatmul.f32.gmra.mxu3 %v5138_v15 }
 0x481   : > { %v3561_v27 = vpop.f32.mrf.mxu2 }
 0x482   : > { %v3562_v37 = vadd.f32 %v3561_v27, %v5157_v41  ;;  %v3744_v55 = vpop.f32.mrf.mxu3 }
 0x484   : > { %v5357_v13 = vadd.f32 %v3740_v54, %v3562_v37  ;;  %v5899_v54 = vld [vmem:[#allocation5_spill] sm:$0xff] }
 0x486   : > { %3628 = vmatmul.f32.gmra.mxu2 %v5138_v15 }
 0x487   : > { %3811 = vmatmul.f32.gmra.mxu3 %v5148_v4 }
 0x489   : > { %v3565_v53 = vpop.f32.mrf.mxu2 }
 0x48a   : > { %v3566_v49 = vadd.f32 %v3565_v53, %v5164_v43  ;;  %v3748_v22 = vpop.f32.mrf.mxu3  ;;  %v5408_v53 = vmul.f32 %v5342_v51, %v5342_v51 }
 0x48c   : > { %v5362_v48 = vadd.f32 %v3744_v55, %v3566_v49 }
 0x48e   : > { %3632 = vmatmul.f32.gmra.mxu2 %v5148_v4 }
 0x48f   : > { %3815 = vmatmul.f32.gmra.mxu3 %v5155_v17 }
 0x491   : > { %v3569_v61 = vpop.f32.mrf.mxu2 }
 0x492   : > { %v3570_v41 = vadd.f32 %v3569_v61, %v5174_v11  ;;  %v3752_v58 = vpop.f32.mrf.mxu3 }
 0x494   : > { %v3749_v63 = vadd.f32 %v3748_v22, %v3570_v41  ;;  %v5900_v22 = vld [vmem:[#allocation6_spill] sm:$0xff] }
 0x496   : > { %v5369_v15 = vmul.f32 %v3749_v63, %v3749_v63  ;;  %v5371_v29 = vmul.f32 %v3749_v63, %v3717_v10  ;;  %3636 = vmatmul.f32.gmra.mxu2 %v5155_v17  ;;  %v5896_v17 = vld [vmem:[#allocation4_spill] sm:$0xff] }
 0x497   : > { %3819 = vmatmul.f32.gmra.mxu3 %v5162_v9 }
 0x498   : > { %v5377_v4 = vadd.f32 %v5369_v15, %v5367_v52 }
 0x499   : > { %v3573_v43 = vpop.f32.mrf.mxu2 }
 0x49a   : > { %v3574_v21 = vadd.f32 %v3573_v43, %v5182_v2  ;;  %v3756_v11 = vpop.f32.mrf.mxu3 }
 0x49c   : > { %v3753_v60 = vadd.f32 %v3752_v58, %v3574_v21  ;;  %v5901_v58 = vld [vmem:[#allocation7_spill] sm:$0xff] }
 0x49e   : > { %v5382_v19 = vmul.f32 %v3753_v60, %v3753_v60  ;;  %v5384_v24 = vmul.f32 %v3753_v60, %v3721_v59  ;;  %3640 = vmatmul.f32.gmra.mxu2 %v5162_v9  ;;  %v5898_v9 = vld [vmem:[#allocation2_spill] sm:$0xff] }
 0x49f   : > { %3823 = vmatmul.f32.gmra.mxu3 %v5896_v17 }
 0x4a0   : > { %v5390_v10 = vadd.f32 %v5382_v19, %v5380_v18 }
 0x4a1   : > { %v3577_v31 = vpop.f32.mrf.mxu2 }
 0x4a2   : > { %v3578_v45 = vadd.f32 %v3577_v31, %v5897_v39  ;;  %v3760_v2 = vpop.f32.mrf.mxu3 }
 0x4a4   : > { %v3757_v36 = vadd.f32 %v3756_v11, %v3578_v45  ;;  %v5424_v11 = vmul.f32 %v5347_v34, %v5347_v34  ;;  %v5904_v45 = vld [vmem:[#allocation9_spill] sm:$0xff] }
 0x4a6   : > { %v5395_v56 = vmul.f32 %v3757_v36, %v3757_v36  ;;  %v5397_v35 = vmul.f32 %v3757_v36, %v3725_v6  ;;  %3644 = vmatmul.f32.gmra.mxu2 %v5896_v17  ;;  %v5903_v17 = vld [vmem:[#allocation8_spill] sm:$0xff] }
 0x4a7   : > { %3827 = vmatmul.f32.gmra.mxu3 %v5898_v9 }
 0x4a8   : > { %v5403_v59 = vadd.f32 %v5395_v56, %v5393_v62 }
 0x4a9   : > { %v3581_v1 = vpop.f32.mrf.mxu2 }
 0x4aa   : > { %v3582_v27 = vadd.f32 %v3581_v1, %v5899_v54  ;;  %v3764_v37 = vpop.f32.mrf.mxu3  ;;  %v5440_v1 = vmul.f32 %v5352_v38, %v5352_v38 }
 0x4ac   : > { %v3761_v55 = vadd.f32 %v3760_v2, %v3582_v27  ;;  %v5906_v27 = vld [vmem:[#allocation10_spill] sm:$0xff] }
 0x4ae   : > { %v5410_v49 = vmul.f32 %v3761_v55, %v3761_v55  ;;  %v5413_v6 = vmul.f32 %v3761_v55, %v5342_v51  ;;  %3648 = vmatmul.f32.gmra.mxu2 %v5898_v9 }
 0x4af   : > { %3831 = vmatmul.f32.gmra.mxu3 %v5900_v22 }
 0x4b0   : > { %v5419_v61 = vadd.f32 %v5410_v49, %v5408_v53 }
 0x4b1   : > { %v3585_v41 = vpop.f32.mrf.mxu2 }
 0x4b2   : > { %v3586_v63 = vadd.f32 %v3585_v41, %v5901_v58  ;;  %v3768_v43 = vpop.f32.mrf.mxu3 }
 0x4b4   : > { %v3765_v21 = vadd.f32 %v3764_v37, %v3586_v63 }
 0x4b6   : > { %v5426_v60 = vmul.f32 %v3765_v21, %v3765_v21  ;;  %v5429_v51 = vmul.f32 %v3765_v21, %v5347_v34  ;;  %3652 = vmatmul.f32.gmra.mxu2 %v5900_v22  ;;  %v5907_v22 = vld [vmem:[#allocation16_spill] sm:$0xff] }
 0x4b7   : > { %3835 = vmatmul.f32.gmra.mxu3 %v5903_v17 }
 0x4b8   : > { %5902 = vst [vmem:[#allocation24_spill] sm:$0xff] %v5429_v51  ;;  %v5435_v31 = vadd.f32 %v5426_v60, %v5424_v11 }
 0x4b9   : > { %v3589_v39 = vpop.f32.mrf.mxu2 }
 0x4ba   : > { %v3590_v2 = vadd.f32 %v3589_v39, %v5904_v45  ;;  %v3772_v36 = vpop.f32.mrf.mxu3 }
 0x4bc   : > { %v3769_v9 = vadd.f32 %v3768_v43, %v3590_v2  ;;  %v5456_v43 = vmul.f32 %v5357_v13, %v5357_v13  ;;  %v5910_v2 = vld [vmem:[#allocation13_spill] sm:$0xff] }
 0x4be   : > { %v5442_v54 = vmul.f32 %v3769_v9, %v3769_v9  ;;  %v5445_v34 = vmul.f32 %v3769_v9, %v5352_v38  ;;  %3656 = vmatmul.f32.gmra.mxu2 %v5903_v17  ;;  %v5909_v17 = vld [vmem:[#allocation12_spill] sm:$0xff] }
 0x4bf   : > { %3839 = vmatmul.f32.gmra.mxu3 %v5906_v27 }
 0x4c0   : > { %5905 = vst [vmem:[#allocation25_spill] sm:$0xff] %v5445_v34  ;;  %v5451_v37 = vadd.f32 %v5442_v54, %v5440_v1 }
 0x4c1   : > { %v3593_v55 = vpop.f32.mrf.mxu2 }
 0x4c2   : > { %v3594_v41 = vadd.f32 %v3593_v55, %v5907_v22  ;;  %v3776_v58 = vpop.f32.mrf.mxu3  ;;  %v5472_v22 = vmul.f32 %v5362_v48, %v5362_v48 }
 0x4c4   : > { %v3773_v63 = vadd.f32 %v3772_v36, %v3594_v41 }
 0x4c6   : > { %v5458_v21 = vmul.f32 %v3773_v63, %v3773_v63  ;;  %v5461_v38 = vmul.f32 %v3773_v63, %v5357_v13  ;;  %3660 = vmatmul.f32.gmra.mxu2 %v5906_v27  ;;  %v5912_v27 = vld [vmem:[#allocation14_spill] sm:$0xff] }
 0x4c7   : > { %3843 = vmatmul.f32.gmra.mxu3 %v5909_v17 }
 0x4c8   : > { %5908 = vst [vmem:[#allocation26_spill] sm:$0xff] %v5461_v38  ;;  %v5467_v39 = vadd.f32 %v5458_v21, %v5456_v43 }
 0x4c9   : > { %v3597_v45 = vpop.f32.mrf.mxu2 }
 0x4ca   : > { %v3598_v36 = vadd.f32 %v3597_v45, %v5910_v2  ;;  %v3780_v9 = vpop.f32.mrf.mxu3 }
 0x4cc   : > { %v3777_v55 = vadd.f32 %v3776_v58, %v3598_v36 }
 0x4ce   : > { %v5474_v41 = vmul.f32 %v3777_v55, %v3777_v55  ;;  %v5477_v13 = vmul.f32 %v3777_v55, %v5362_v48  ;;  %3664 = vmatmul.f32.gmra.mxu2 %v5909_v17 }
 0x4cf   : > { %3847 = vmatmul.f32.gmra.mxu3 %v5912_v27 }
 0x4d0   : > { %5911 = vst [vmem:[#allocation27_spill] sm:$0xff] %v5477_v13  ;;  %v5483_v63 = vadd.f32 %v5474_v41, %v5472_v22 }
 0x4d1   : > { %v3601_v45 = vpop.f32.mrf.mxu2 }
 0x4d2   : > { %v3602_v58 = vadd.f32 %v3601_v45, %v5228_v16  ;;  %v3784_v2 = vpop.f32.mrf.mxu3  ;;  %v5914_v45 = vld [vmem:[#allocation20_spill] sm:$0xff] }
 0x4d4   : > { %v3781_v36 = vadd.f32 %v3780_v9, %v3602_v58 }
 0x4d6   : > { %v3899_v38 = vsub.f32 %v3781_v36, %v5367_v52  ;;  %3668 = vmatmul.f32.gmra.mxu2 %v5912_v27  ;;  %v5916_v36 = vld [vmem:[#allocation19_spill] sm:$0xff] }
 0x4d7   : > { %3851 = vmatmul.f32.gmra.mxu3 %v5913_v20 }
 0x4d9   : > { %v3605_v48 = vpop.f32.mrf.mxu2 }
 0x4da   : > { %v3606_v17 = vadd.f32 %v3605_v48, %v5234_v12  ;;  %v3788_v55 = vpop.f32.mrf.mxu3  ;;  %v5915_v12 = vld [vmem:[#allocation17_spill] sm:$0xff] }
 0x4dc   : > { %v3785_v13 = vadd.f32 %v3784_v2, %v3606_v17  ;;  %v5917_v17 = vld [vmem:[#allocation15_spill] sm:$0xff] }
 0x4de   : > { %v3900_v34 = vsub.f32 %v3785_v13, %v5380_v18  ;;  %3672 = vmatmul.f32.gmra.mxu2 %v5913_v20 }
 0x4df   : > { %3855 = vmatmul.f32.gmra.mxu3 %v5222_v30 }
 0x4e1   : > { %v3609_v16 = vpop.f32.mrf.mxu2 }
 0x4e2   : > { %v3610_v9 = vadd.f32 %v3609_v16, %v5914_v45  ;;  %v3792_v58 = vpop.f32.mrf.mxu3 }
 0x4e4   : > { %v5494_v52 = vadd.f32 %v3788_v55, %v3610_v9  ;;  %v5918_v9 = vld [vmem:[#allocation18_spill] sm:$0xff] }
 0x4e6   : > { %v3901_v27 = vsub.f32 %v5494_v52, %v5393_v62  ;;  %3676 = vmatmul.f32.gmra.mxu2 %v5222_v30 }
 0x4e7   : > { %3859 = vmatmul.f32.gmra.mxu3 %v5915_v12 }
 0x4e9   : > { %v3613_v2 = vpop.f32.mrf.mxu2 }
 0x4ea   : > { %v3614_v18 = vadd.f32 %v3613_v2, %v5916_v36  ;;  %v3796_v13 = vpop.f32.mrf.mxu3 }
 0x4ec   : > { %v5501_v20 = vadd.f32 %v3792_v58, %v3614_v18 }
 0x4ee   : > { %3680 = vmatmul.f32.gmra.mxu2 %v5915_v12 }
 0x4ef   : > { %3863 = vmatmul.f32.gmra.mxu3 %v5917_v17 }
 0x4f1   : > { %v3617_v55 = vpop.f32.mrf.mxu2 }
 0x4f2   : > { %v3618_v62 = vadd.f32 %v3617_v55, %v5255_v44  ;;  %v3800_v16 = vpop.f32.mrf.mxu3  ;;  %v5919_v44 = vld [vmem:[#allocation21_spill] sm:$0xff] }
 0x4f4   : > { %v5508_v30 = vadd.f32 %v3796_v13, %v3618_v62 }
 0x4f6   : > { %3684 = vmatmul.f32.gmra.mxu2 %v5917_v17 }
 0x4f7   : > { %3867 = vmatmul.f32.gmra.mxu3 %v5918_v9 }
 0x4f9   : > { %v3621_v58 = vpop.f32.mrf.mxu2 }
 0x4fa   : > { %v3622_v52 = vadd.f32 %v3621_v58, %v5259_v47  ;;  %v3804_v2 = vpop.f32.mrf.mxu3 }
 0x4fc   : > { %v5515_v12 = vadd.f32 %v3800_v16, %v3622_v52 }
 0x4fe   : > { %3688 = vmatmul.f32.gmra.mxu2 %v5918_v9 }
 0x4ff   : > { %3871 = vmatmul.f32.gmra.mxu3 %v5919_v44 }
 0x501   : > { %v3625_v18 = vpop.f32.mrf.mxu2 }
 0x502   : > { %v3626_v13 = vadd.f32 %v3625_v18, %v5262_v5  ;;  %v3808_v55 = vpop.f32.mrf.mxu3 }
 0x504   : > { %v5522_v17 = vadd.f32 %v3804_v2, %v3626_v13 }
 0x506   : > { %3692 = vmatmul.f32.gmra.mxu2 %v5919_v44  ;;  %v3971_v44 = vadd.f32 0.0001, %v5377_v4 }
 0x509   : > { %v3629_v47 = vpop.f32.mrf.mxu2 }
 0x50a   : > { %v3630_v16 = vadd.f32 %v3629_v47, %v5266_v42  ;;  %v3812_v58 = vpop.f32.mrf.mxu3 }
 0x50c   : > { %v5528_v52 = vadd.f32 %v3808_v55, %v3630_v16  ;;  %v3201_v55 = vpop.f32.mrf.mxu0 }
 0x511   : > { %v3633_v36 = vpop.f32.mrf.mxu2 }
 0x512   : > { %v3634_v5 = vadd.f32 %v3633_v36, %v5270_v33  ;;  %v3816_v18 = vpop.f32.mrf.mxu3  ;;  %v3450_v36 = vpop.f32.mrf.mxu1 }
 0x514   : > { %v3813_v2 = vadd.f32 %v3812_v58, %v3634_v5  ;;  %v3972_v58 = vadd.f32 0.0001, %v5390_v10 }
 0x516   : > { %v3907_v13 = vsub.f32 %v3813_v2, %v5369_v15 }
 0x518   : > { %v3979_v45 = vadd.f32 %v3907_v13, %v3899_v38 }
 0x519   : > { %v3637_v62 = vpop.f32.mrf.mxu2 }
 0x51a   : > { %v3987_v48 = vadd.f32 0.0009, %v3979_v45  ;;  %v3638_v42 = vadd.f32 %v3637_v62, %v5274_v57  ;;  %v3820_v47 = vpop.f32.mrf.mxu3  ;;  %v3206_v57 = vpop.f32.mrf.mxu0 }
 0x51c   : > { %v5536_v16 = vmul.f32 %v3987_v48, %v3971_v44  ;;  %v3817_v3 = vadd.f32 %v3816_v18, %v3638_v42  ;;  %v3973_v18 = vadd.f32 0.0001, %v5403_v59  ;;  %v5920_v44 = vsub.f32 %v5501_v20, %v5408_v53 }
 0x51e   : > { %v3908_v9 = vsub.f32 %v3817_v3, %v5382_v19  ;;  %4233 = vrcp.f32 %v5536_v16  ;;  %vm4008_vm2 = vweird.f32 %v5536_v16 }
 0x520   : > { %v3980_v51 = vadd.f32 %v3908_v9, %v3900_v34  ;;  %v3456_v9 = vpop.f32.mrf.mxu1 }
 0x521   : > { %v3641_v33 = vpop.f32.mrf.mxu2 }
 0x522   : > { %v3988_v15 = vadd.f32 0.0009, %v3980_v51  ;;  %v3642_v38 = vadd.f32 %v3641_v33, %v5278_v28  ;;  %v3824_v5 = vpop.f32.mrf.mxu3  ;;  %v3211_v13 = vpop.f32.mrf.mxu0 }
 0x524   : > { %v5541_v4 = vmul.f32 %v3988_v15, %v3972_v58  ;;  %v3821_v45 = vadd.f32 %v3820_v47, %v3642_v38 }
 0x526   : > { %v3909_v62 = vsub.f32 %v3821_v45, %v5395_v56  ;;  %4235 = vrcp.f32 %v5541_v4  ;;  %vm4023_vm6 = vweird.f32 %v5541_v4 }
 0x528   : > { %v3981_v48 = vadd.f32 %v3909_v62, %v3901_v27  ;;  %v3974_v27 = vadd.f32 0.0001, %v5419_v61  ;;  %v3462_v38 = vpop.f32.mrf.mxu1  ;;  %v3975_v61 = vadd.f32 0.0001, %v5435_v31  ;;  %v3976_v31 = vadd.f32 0.0001, %v5451_v37 }
 0x529   : > { %v3645_v2 = vpop.f32.mrf.mxu2 }
 0x52a   : > { %v3989_v3 = vadd.f32 0.0009, %v3981_v48  ;;  %v3646_v19 = vadd.f32 %v3645_v2, %v5282_v8  ;;  %v3828_v34 = vpop.f32.mrf.mxu3  ;;  %v3202_v8 = vadd.f32 %v3201_v55, %v5286_v46  ;;  %v3216_v62 = vpop.f32.mrf.mxu0  ;;  %v3207_v46 = vadd.f32 %v3206_v57, %v5292_v23 }
 0x52b   : > { %v3212_v23 = vadd.f32 %v3211_v13, %v5296_v14 }
 0x52c   : > { %v5546_v10 = vmul.f32 %v3989_v3, %v3973_v18  ;;  %v3825_v51 = vadd.f32 %v3824_v5, %v3646_v19  ;;  %v5921_v5 = vsub.f32 %v5508_v30, %v5424_v11  ;;  %v3451_v20 = vadd.f32 %v3450_v36, %v3202_v8 }
 0x52d   : > { %v5922_v11 = vsub.f32 %v5515_v12, %v5440_v1  ;;  %v3457_v36 = vadd.f32 %v3456_v9, %v3207_v46  ;;  %v5923_v1 = vsub.f32 %v5522_v17, %v5456_v43  ;;  %v3463_v9 = vadd.f32 %v3462_v38, %v3212_v23 }
 0x52e   : > { %v3910_v28 = vsub.f32 %v3825_v51, %v5410_v49  ;;  %v3217_v8 = vadd.f32 %v3216_v62, %v5300_v32  ;;  %4237 = vrcp.f32 %v5546_v10  ;;  %vm4038_vm10 = vweird.f32 %v5546_v10 }
 0x530   : > { %v3982_v42 = vadd.f32 %v3910_v28, %v5920_v44 }
 0x531   : > { %v3649_v56 = vpop.f32.mrf.mxu2 }
 0x532   : > { %v3990_v47 = vadd.f32 0.0009, %v3982_v42  ;;  %v3650_v59 = vadd.f32 %v3649_v56, %v5288_v25  ;;  %v3832_v33 = vpop.f32.mrf.mxu3  ;;  %v3221_v57 = vpop.f32.mrf.mxu0 }
 0x533   : > { %v4234_v56 = vpop.eup %4233 }
 0x534   : > { %v5555_v58 = vmul.f32 %v3990_v47, %v3974_v27  ;;  %v3829_v15 = vadd.f32 %v3828_v34, %v3650_v59  ;;  %v3977_v47 = vadd.f32 0.0001, %v5467_v39  ;;  %v4004_v14 = vmul.f32 %v4234_v56, %v5536_v16  ;;  %v5585_v38 = vpop.eup %4235 }
 0x535   : > { %v5924_v39 = vsub.f32 %v5528_v52, %v5472_v22  ;;  %v4019_v32 = vmul.f32 %v5585_v38, %v5541_v4  ;;  %v3923_v22 = vmul.f32 2.0, %v5371_v29  ;;  %v5598_v52 = vpop.eup %4237  ;;  %vm4009_vm1 = vweird.f32 %v4234_v56 }
 0x536   : > { %v3911_v49 = vsub.f32 %v3829_v15, %v5426_v60  ;;  %v3468_v60 = vpop.f32.mrf.mxu1  ;;  %v4005_v17 = vsub.f32 1.0, %v4004_v14  ;;  %4239 = vrcp.f32 %v5555_v58  ;;  %vm4010_vm3 = vmor %vm4008_vm2, %vm4009_vm1  ;;  %vm4024_vm5 = vweird.f32 %v5585_v38 }
 0x537   : > { %vm5619_vm7 = vmor %vm4023_vm6, %vm4024_vm5  ;;  %vm4039_vm9 = vweird.f32 %v5598_v52  ;;  %vm4053_vm14 = vweird.f32 %v5555_v58 }
 0x538   : > { %v3983_v53 = vadd.f32 %v3911_v49, %v5921_v5  ;;  %vm5642_vm11 = vmor %vm4038_vm10, %vm4039_vm9 }
 0x539   : > { %v3653_v45 = vpop.f32.mrf.mxu2 }
 0x53a   : > { %v3991_v48 = vadd.f32 0.0009, %v3983_v53  ;;  %v3654_v25 = vadd.f32 %v3653_v45, %v3451_v20  ;;  %v3836_v2 = vpop.f32.mrf.mxu3  ;;  %v3226_v49 = vpop.f32.mrf.mxu0  ;;  %v3469_v53 = vadd.f32 %v3468_v60, %v3217_v8  ;;  %v3978_v20 = vadd.f32 0.0001, %v5483_v63 }
 0x53b   : > { %v4020_v60 = vsub.f32 1.0, %v4019_v32  ;;  %v4027_v8 = vand.u32 2147483647, %v5541_v4 }
 0x53c   : > { %v5563_v55 = vmul.f32 %v3991_v48, %v3975_v61  ;;  %v3833_v18 = vadd.f32 %v3832_v33, %v3654_v25  ;;  %v4006_v48 = vmul.f32 %v4234_v56, %v4005_v17  ;;  %v3222_v25 = vadd.f32 %v3221_v57, %v5304_v26 }
 0x53d   : > { %v4012_v26 = vand.u32 2147483647, %v5536_v16  ;;  %v4021_v57 = vmul.f32 %v5585_v38, %v4020_v60  ;;  %vm4028_vm8 = vcmp.eq.f32.partialorder %v4027_v8, 8.507059e+37  ;;  %v4057_v8 = vand.u32 2147483647, %v5555_v58 }
 0x53e   : > { %v3912_v3 = vsub.f32 %v3833_v18, %v5442_v54  ;;  %v3474_v27 = vpop.f32.mrf.mxu1  ;;  %4241 = vrcp.f32 %v5563_v55 }
 0x53f   : > { %vm4013_vm4 = vcmp.eq.f32.partialorder %v4012_v26, 8.507059e+37  ;;  %vm4058_vm1 = vcmp.eq.f32.partialorder %v4057_v8, 8.507059e+37 }
 0x540   : > { %v3984_v30 = vadd.f32 %v3912_v3, %v5922_v11  ;;  %v4007_v3 = vadd.f32 %v4234_v56, %v4006_v48  ;;  %v4014_v11 = vand.u32 2147483648, %v5536_v16 }
 0x541   : > { %v3657_v19 = vpop.f32.mrf.mxu2 }
 0x542   : > { %v3992_v34 = vadd.f32 0.0009, %v3984_v30  ;;  %v3658_v51 = vadd.f32 %v3657_v19, %v3457_v36  ;;  %v3840_v28 = vpop.f32.mrf.mxu3  ;;  %v3231_v30 = vpop.f32.mrf.mxu0  ;;  %v3475_v19 = vadd.f32 %v3474_v27, %v3222_v25 }
 0x544   : > { %v5572_v44 = vmul.f32 %v3992_v34, %v3976_v31  ;;  %v3837_v54 = vadd.f32 %v3836_v2, %v3658_v51  ;;  %v3931_v31 = vadd.f32 0.0001, %v3923_v22  ;;  %v4034_v34 = vmul.f32 %v5598_v52, %v5546_v10 }
 0x546   : > { %v3913_v42 = vsub.f32 %v3837_v54, %v5458_v21  ;;  %v3480_v2 = vpop.f32.mrf.mxu1  ;;  %v4035_v27 = vsub.f32 1.0, %v4034_v34  ;;  %4243 = vrcp.f32 %v5572_v44 }
 0x548   : > { %v3985_v12 = vadd.f32 %v3913_v42, %v5923_v1  ;;  %v4015_v42 = vor.u32 1.1754944e-38, %v4014_v11  ;;  %v3227_v1 = vadd.f32 %v3226_v49, %v5308_v50  ;;  %v4036_v17 = vmul.f32 %v5598_v52, %v4035_v27 }
 0x549   : > { %v3661_v37 = vpop.f32.mrf.mxu2 }
 0x54a   : > { %v3993_v13 = vadd.f32 0.0009, %v3985_v12  ;;  %v3662_v59 = vadd.f32 %v3661_v37, %v3463_v9  ;;  %v3844_v33 = vpop.f32.mrf.mxu3  ;;  %v3924_v9 = vmul.f32 2.0, %v5384_v24 }
 0x54c   : > { %v5582_v21 = vmul.f32 %v3993_v13, %v3977_v47  ;;  %v3841_v15 = vadd.f32 %v3840_v28, %v3662_v59  ;;  %v4011_v28 = vsel %vm4010_vm3, %v4234_v56, %v4007_v3  ;;  %v4022_v56 = vadd.f32 %v5585_v38, %v4021_v57  ;;  %v5613_v59 = vpop.eup %4239 }
 0x54d   : > { %v4016_v37 = vsel %vm4013_vm4, %v4015_v42, %v4011_v28  ;;  %v3932_v49 = vadd.f32 0.0001, %v3924_v9  ;;  %v4044_v3 = vand.u32 2147483648, %v5546_v10  ;;  %vm4054_vm13 = vweird.f32 %v5613_v59 }
 0x54e   : > { %v3914_v43 = vsub.f32 %v3841_v15, %v5474_v41  ;;  %v3486_v47 = vpop.f32.mrf.mxu1  ;;  %v3481_v15 = vadd.f32 %v3480_v2, %v3227_v1  ;;  %v4037_v2 = vadd.f32 %v5598_v52, %v4036_v17  ;;  %4245 = vrcp.f32 %v5582_v21  ;;  %vm5666_vm15 = vmor %vm4053_vm14, %vm4054_vm13 }
 0x54f   : > { %vm4068_vm3 = vweird.f32 %v5563_v55 }
 0x550   : > { %v3986_v5 = vadd.f32 %v3914_v43, %v5924_v39  ;;  %v3236_v39 = vpop.f32.mrf.mxu0  ;;  %v4041_v34 = vsel %vm5642_vm11, %v5598_v52, %v4037_v2  ;;  %vm4098_vm11 = vweird.f32 %v5582_v21 }
 0x551   : > { %v3665_v45 = vpop.f32.mrf.mxu2  ;;  %v3237_v57 = vadd.f32 %v3236_v39, %v5316_v40  ;;  %v4059_v40 = vand.u32 2147483648, %v5555_v58 }
 0x552   : > { %v3994_v62 = vadd.f32 0.0009, %v3986_v5  ;;  %v3666_v61 = vadd.f32 %v3665_v45, %v3469_v53  ;;  %v3848_v41 = vpop.f32.mrf.mxu3  ;;  %v4049_v5 = vmul.f32 %v5613_v59, %v5555_v58  ;;  %v3232_v45 = vadd.f32 %v3231_v30, %v5312_v7 }
 0x553   : > { %v4042_v7 = vand.u32 2147483647, %v5546_v10 }
 0x554   : > { %v5595_v46 = vmul.f32 %v3994_v62, %v3978_v20  ;;  %v3845_v18 = vadd.f32 %v3844_v33, %v3666_v61  ;;  %v4029_v33 = vand.u32 2147483648, %v5541_v4  ;;  %v4026_v4 = vsel %vm5619_vm7, %v5585_v38, %v4022_v56  ;;  %v5634_v38 = vpop.eup %4241 }
 0x555   : > { %v3487_v60 = vadd.f32 %v3486_v47, %v3232_v45  ;;  %vm4043_vm12 = vcmp.eq.f32.partialorder %v4042_v7, 8.507059e+37  ;;  %vm4069_vm2 = vweird.f32 %v5634_v38  ;;  %vm4083_vm7 = vweird.f32 %v5572_v44 }
 0x556   : > { %v3915_v63 = vsub.f32 %v3845_v18, %v5371_v29  ;;  %v4030_v32 = vor.u32 1.1754944e-38, %v4029_v33  ;;  %v3492_v11 = vpop.f32.mrf.mxu1  ;;  %4247 = vrcp.f32 %v5595_v46  ;;  %vm5688_vm4 = vmor %vm4068_vm3, %vm4069_vm2  ;;  %vm4148_vm3 = vcmask 0  }
 0x557   : > { %v3493_v56 = vadd.f32 %v3492_v11, %v3237_v57 }
 0x558   : > { %v3939_v36 = vmul.f32 2.0, %v3915_v63  ;;  %v4031_v25 = vsel %vm4028_vm8, %v4030_v32, %v4026_v4  ;;  %v4050_v63 = vsub.f32 1.0, %v4049_v5  ;;  %v3241_v42 = vpop.f32.mrf.mxu0 }
 0x559   : > { %v3669_v29 = vpop.f32.mrf.mxu2  ;;  %v3242_v4 = vadd.f32 %v3241_v42, %v5320_v0  ;;  %v4074_v0 = vand.u32 2147483648, %v5563_v55  ;;  %v5935_v42 = vld [vmem:[#allocation25_spill] sm:$0xff] }
 0x55a   : > { %v3947_v51 = vadd.f32 0.0009, %v3939_v36  ;;  %v3670_v23 = vadd.f32 %v3669_v29, %v3475_v19  ;;  %v3852_v54 = vpop.f32.mrf.mxu3  ;;  %v4064_v29 = vmul.f32 %v5634_v38, %v5563_v55 }
 0x55c   : > { %v3955_v12 = vmul.f32 %v3947_v51, %v3931_v31  ;;  %v3849_v16 = vadd.f32 %v3848_v41, %v3670_v23  ;;  %v3925_v41 = vmul.f32 2.0, %v5397_v35  ;;  %v4051_v23 = vmul.f32 %v5613_v59, %v4050_v63 }
 0x55e   : > { %v4017_v14 = vmul.f32 %v4016_v37, %v3955_v12  ;;  %v3916_v13 = vsub.f32 %v3849_v16, %v5384_v24  ;;  %v3933_v19 = vadd.f32 0.0001, %v3925_v41  ;;  %v3926_v16 = vmul.f32 2.0, %v5413_v6  ;;  %v5655_v37 = vpop.eup %4243  ;;  %v3498_v17 = vpop.f32.mrf.mxu1 }
 0x55f   : > { %v4079_v43 = vmul.f32 %v5655_v37, %v5572_v44  ;;  %v3499_v7 = vadd.f32 %v3498_v17, %v3242_v4  ;;  %vm4084_vm6 = vweird.f32 %v5655_v37 }
 0x560   : > { %v3940_v50 = vmul.f32 2.0, %v3916_v13  ;;  %v4123_v30 = vsel %vm256_vm0, %v4017_v14, 0.0  ;;  %v4052_v14 = vadd.f32 %v5613_v59, %v4051_v23  ;;  %v4065_v13 = vsub.f32 1.0, %v4064_v29  ;;  %vm5707_vm8 = vmor %vm4083_vm7, %vm4084_vm6 }
 0x561   : > { %v3673_v24 = vpop.f32.mrf.mxu2  ;;  %v4080_v41 = vsub.f32 1.0, %v4079_v43  ;;  %v4075_v29 = vor.u32 1.1754944e-38, %v4074_v0  ;;  %v4102_v0 = vand.u32 2147483647, %v5582_v21 }
 0x562   : > { %v3948_v53 = vadd.f32 0.0009, %v3940_v50  ;;  %v3674_v20 = vadd.f32 %v3673_v24, %v3481_v15  ;;  %v3856_v62 = vpop.f32.mrf.mxu3  ;;  %v3934_v15 = vadd.f32 0.0001, %v3926_v16  ;;  %v4056_v58 = vsel %vm5666_vm15, %v5613_v59, %v4052_v14  ;;  %v5681_v59 = vpop.eup %4245 }
 0x563   : > { %vm4099_vm10 = vweird.f32 %v5681_v59  ;;  %vm4103_vm13 = vcmp.eq.f32.partialorder %v4102_v0, 8.507059e+37  ;;  %vm4113_vm15 = vweird.f32 %v5595_v46 }
 0x564   : > { %v3956_v61 = vmul.f32 %v3948_v53, %v3932_v49  ;;  %v3853_v48 = vadd.f32 %v3852_v54, %v3674_v20  ;;  %v4045_v54 = vor.u32 1.1754944e-38, %v4044_v3  ;;  %v4066_v53 = vmul.f32 %v5634_v38, %v4065_v13 }
 0x565   : > { %v4060_v20 = vor.u32 1.1754944e-38, %v4059_v40 }
 0x566   : > { %v4032_v18 = vmul.f32 %v4031_v25, %v3956_v61  ;;  %v3917_v22 = vsub.f32 %v3853_v48, %v5397_v35  ;;  %v4046_v9 = vsel %vm4043_vm12, %v4045_v54, %v4041_v34  ;;  %v3246_v25 = vpop.f32.mrf.mxu0  ;;  %v4081_v35 = vmul.f32 %v5655_v37, %v4080_v41  ;;  %vm4100_vm12 = vmor %vm4098_vm11, %vm4099_vm10 }
 0x567   : > { %v4061_v48 = vsel %vm4058_vm1, %v4060_v20, %v4056_v58 }
 0x568   : > { %v4124_v36 = vsel %vm256_vm0, %v4032_v18, 0.0  ;;  %v3941_v26 = vmul.f32 2.0, %v3917_v22  ;;  %v4067_v22 = vadd.f32 %v5634_v38, %v4066_v53  ;;  %v4082_v16 = vadd.f32 %v5655_v37, %v4081_v35 }
 0x569   : > { %v4125_v31 = vadd.f32 %v4124_v36, %v4123_v30  ;;  %v3677_v10 = vpop.f32.mrf.mxu2 }
 0x56a   : > { %v3949_v51 = vadd.f32 0.0009, %v3941_v26  ;;  %v3678_v28 = vadd.f32 %v3677_v10, %v3487_v60  ;;  %v3860_v52 = vpop.f32.mrf.mxu3  ;;  %v4072_v60 = vand.u32 2147483647, %v5563_v55  ;;  %v4071_v34 = vsel %vm5688_vm4, %v5634_v38, %v4067_v22 }
 0x56b   : > { %v4094_v55 = vmul.f32 %v5681_v59, %v5582_v21 }
 0x56c   : > { %v3957_v1 = vmul.f32 %v3949_v51, %v3933_v19  ;;  %v3857_v12 = vadd.f32 %v3856_v62, %v3678_v28  ;;  %v5931_v62 = vld [vmem:[#allocation24_spill] sm:$0xff]  ;;  %v3504_v51 = vpop.f32.mrf.mxu1  ;;  %v5934_v28 = vld [vmem:[#allocation22_spill] sm:$0xff]  ;;  %vm4073_vm5 = vcmp.eq.f32.partialorder %v4072_v60, 8.507059e+37 }
 0x56d   : > { %v3927_v61 = vmul.f32 2.0, %v5931_v62  ;;  %v3247_v23 = vadd.f32 %v3246_v25, %v5934_v28 }
 0x56e   : > { %v4047_v27 = vmul.f32 %v4046_v9, %v3957_v1  ;;  %v3918_v47 = vsub.f32 %v3857_v12, %v5413_v6  ;;  %v3928_v1 = vmul.f32 2.0, %v5935_v42  ;;  %v4076_v12 = vsel %vm4073_vm5, %v4075_v29, %v4071_v34  ;;  %v3251_v14 = vpop.f32.mrf.mxu0 }
 0x56f   : > { %v3935_v30 = vadd.f32 0.0001, %v3927_v61  ;;  %v3505_v40 = vadd.f32 %v3504_v51, %v3247_v23  ;;  %v4119_v23 = vand.u32 2147483648, %v5595_v46 }
 0x570   : > { %v4126_v33 = vsel %vm256_vm0, %v4047_v27, 0.0  ;;  %v3942_v50 = vmul.f32 2.0, %v3918_v47  ;;  %v5703_v27 = vpop.eup %4247  ;;  %v4089_v47 = vand.u32 2147483648, %v5572_v44  ;;  %v3936_v8 = vadd.f32 0.0001, %v3928_v1 }
 0x571   : > { %v3681_v49 = vpop.f32.mrf.mxu2  ;;  %v4127_v24 = vadd.f32 %v4126_v33, %v4125_v31  ;;  %v4087_v33 = vand.u32 2147483647, %v5572_v44  ;;  %v4109_v58 = vmul.f32 %v5703_v27, %v5595_v46  ;;  %vm4114_vm14 = vweird.f32 %v5703_v27 }
 0x572   : > { %v3950_v39 = vadd.f32 0.0009, %v3942_v50  ;;  %v3682_v5 = vadd.f32 %v3681_v49, %v3493_v56  ;;  %v3864_v63 = vpop.f32.mrf.mxu3  ;;  %v4086_v49 = vsel %vm5707_vm8, %v5655_v37, %v4082_v16  ;;  %v4090_v44 = vor.u32 1.1754944e-38, %v4089_v47  ;;  %vm4115_vm1 = vmor %vm4113_vm15, %vm4114_vm14 }
 0x573   : > { %vm4088_vm9 = vcmp.eq.f32.partialorder %v4087_v33, 8.507059e+37  ;;  %v4110_v25 = vsub.f32 1.0, %v4109_v58 }
 0x574   : > { %v3958_v45 = vmul.f32 %v3950_v39, %v3934_v15  ;;  %v3861_v32 = vadd.f32 %v3860_v52, %v3682_v5  ;;  %v4095_v52 = vsub.f32 1.0, %v4094_v55  ;;  %v5938_v5 = vld [vmem:[#allocation23_spill] sm:$0xff]  ;;  %v3510_v37 = vpop.f32.mrf.mxu1 }
 0x575   : > { %v3252_v53 = vadd.f32 %v3251_v14, %v5938_v5 }
 0x576   : > { %v4062_v2 = vmul.f32 %v4061_v48, %v3958_v45  ;;  %v3919_v18 = vsub.f32 %v3861_v32, %v5931_v62  ;;  %v4096_v39 = vmul.f32 %v5681_v59, %v4095_v52  ;;  %v5939_v45 = vld [vmem:[#allocation26_spill] sm:$0xff]  ;;  %v4091_v62 = vsel %vm4088_vm9, %v4090_v44, %v4086_v49 }
 0x577   : > { %v3929_v32 = vmul.f32 2.0, %v5939_v45 }
 0x578   : > { %v3943_v3 = vmul.f32 2.0, %v3919_v18  ;;  %v4128_v11 = vsel %vm256_vm0, %v4062_v2, 0.0  ;;  %v4097_v41 = vadd.f32 %v5681_v59, %v4096_v39  ;;  %v3511_v2 = vadd.f32 %v3510_v37, %v3252_v53 }
 0x579   : > { %v3685_v26 = vpop.f32.mrf.mxu2  ;;  %v4129_v19 = vadd.f32 %v4128_v11, %v4127_v24  ;;  %v4104_v18 = vand.u32 2147483648, %v5582_v21 }
 0x57a   : > { %v3951_v31 = vadd.f32 0.0009, %v3943_v3  ;;  %v3686_v10 = vadd.f32 %v3685_v26, %v3499_v7  ;;  %v3868_v15 = vpop.f32.mrf.mxu3  ;;  %v3937_v7 = vadd.f32 0.0001, %v3929_v32  ;;  %v4101_v36 = vsel %vm4100_vm12, %v5681_v59, %v4097_v41 }
 0x57b   : > { %v4111_v26 = vmul.f32 %v5703_v27, %v4110_v25 }
 0x57c   : > { %v3959_v57 = vmul.f32 %v3951_v31, %v3935_v30  ;;  %v3865_v54 = vadd.f32 %v3864_v63, %v3686_v10  ;;  %v5940_v10 = vld [vmem:[#allocation27_spill] sm:$0xff] }
 0x57d   : > { %v3930_v55 = vmul.f32 2.0, %v5940_v10  ;;  %v4112_v28 = vadd.f32 %v5703_v27, %v4111_v26 }
 0x57e   : > { %v4077_v9 = vmul.f32 %v4076_v12, %v3959_v57  ;;  %v3920_v38 = vsub.f32 %v3865_v54, %v5935_v42  ;;  %v4117_v57 = vand.u32 2147483647, %v5595_v46 }
 0x57f   : > { %v3938_v1 = vadd.f32 0.0001, %v3930_v55  ;;  %v4116_v16 = vsel %vm4115_vm1, %v5703_v27, %v4112_v28 }
 0x580   : > { %v3944_v13 = vmul.f32 2.0, %v3920_v38  ;;  %v4130_v50 = vsel %vm256_vm0, %v4077_v9, 0.0  ;;  %v4120_v9 = vor.u32 1.1754944e-38, %v4119_v23  ;;  %vm4118_vm2 = vcmp.eq.f32.partialorder %v4117_v57, 8.507059e+37 }
 0x581   : > { %v3689_v6 = vpop.f32.mrf.mxu2  ;;  %v4131_v43 = vadd.f32 %v4130_v50, %v4129_v19  ;;  %v4105_v19 = vor.u32 1.1754944e-38, %v4104_v18 }
 0x582   : > { %v3952_v24 = vadd.f32 0.0009, %v3944_v13  ;;  %v3690_v17 = vadd.f32 %v3689_v6, %v3505_v40  ;;  %v3872_v35 = vpop.f32.mrf.mxu3  ;;  %v4121_v52 = vsel %vm4118_vm2, %v4120_v9, %v4116_v16 }
 0x583   : > { %v4106_v21 = vsel %vm4103_vm13, %v4105_v19, %v4101_v36 }
 0x584   : > { %v3960_v4 = vmul.f32 %v3952_v24, %v3936_v8  ;;  %v3869_v20 = vadd.f32 %v3868_v15, %v3690_v17 }
 0x586   : > { %v3921_v61 = vsub.f32 %v3869_v20, %v5939_v45  ;;  %v4092_v48 = vmul.f32 %v4091_v62, %v3960_v4 }
 0x588   : > { %v3945_v22 = vmul.f32 2.0, %v3921_v61  ;;  %v4132_v63 = vsel %vm256_vm0, %v4092_v48, 0.0 }
 0x589   : > { %v3693_v3 = vpop.f32.mrf.mxu2  ;;  %v4133_v60 = vadd.f32 %v4132_v63, %v4131_v43 }
 0x58a   : > { %v3953_v11 = vadd.f32 0.0009, %v3945_v22  ;;  %v3694_v30 = vadd.f32 %v3693_v3, %v3511_v2 }
 0x58c   : > { %v3961_v31 = vmul.f32 %v3953_v11, %v3937_v7  ;;  %v3873_v34 = vadd.f32 %v3872_v35, %v3694_v30 }
 0x58e   : > { %v3922_v29 = vsub.f32 %v3873_v34, %v5940_v10  ;;  %v4107_v51 = vmul.f32 %v4106_v21, %v3961_v31 }
 0x590   : > { %v3946_v59 = vmul.f32 2.0, %v3922_v29  ;;  %v4134_v54 = vsel %vm256_vm0, %v4107_v51, 0.0 }
 0x591   : > { %v4135_v42 = vadd.f32 %v4134_v54, %v4133_v60 }
 0x592   : > { %v3954_v12 = vadd.f32 0.0009, %v3946_v59 }
 0x594   : > { %v3962_v38 = vmul.f32 %v3954_v12, %v3938_v1 }
 0x596   : > { %v4122_v47 = vmul.f32 %v4121_v52, %v3962_v38 }
 0x598   : > { %v4136_v14 = vsel %vm256_vm0, %v4122_v47, 0.0 }
 0x599   : > { %v4137_v13 = vadd.f32 %v4136_v14, %v4135_v42 }
 0x59b   : > { %4138 = vadd.xlane.f32.xlu2 %v4137_v13 }
 0x60e   : > { %v4139_v40 = vpop.xlane.xlu2 %4138 }
 0x60f   : > { %v4140_v46 = vrot.slane %v4139_v40, 4 }
 0x611   : > { %v4141_v56 = vadd.f32 %v4140_v46, %v4139_v40 }
 0x613   : > { %v4142_v33 = vrot.slane %v4141_v56, 2 }
 0x615   : > { %v4143_v50 = vadd.f32 %v4142_v33, %v4141_v56 }
 0x617   : > { %v4144_v8 = vrot.slane %v4143_v50, 1 }
 0x619   : > { %v4145_v15 = vadd.f32 %v4144_v8, %v4143_v50 }
 0x61b   : > { %4222 = vpush %v4145_v15 }
 0x64c   : > { %s4223_s9 = spop %4222 }
 0x64d   : > { %v4147_v27 = vstv %s4223_s9 }
 0x64e   : > { %4149 = vst.msk [vmem:[%s213_s8] sm:$0x1] %vm4148_vm3, %v4147_v27 }
 0x64f PF: > { %s14_s15 = sadd.s32 1, %s4255_s15  }
 0x650   : > { %p11_p4 = scmp.ge.s32.totalorder %s14_s15, 4  }
 0x652   :  { %13 = sbr.rel (!%p11_p4) target bundleno = 1 (0x1), region = 69 }

</bundles_post_ra>
